<compile_context>
chip_gen: v7x
topology: tpu7x:2x2x1
jax: 0.10.0
libtpu: 0.0.40
codegen_flags: <defaults>
</compile_context>

<pallas_src>
import jax
import jax.numpy as jnp
from jax import lax
from jax.experimental import pallas as pl
from jax.experimental.pallas import tpu as pltpu

# ----------------------------- config -------------------------------------
B = 2        # batch
T_IN = 8     # encoder sequence length
T_DEC = 8    # decoder max length
V_IN = 32    # encoder vocab size
V_OUT = 32   # decoder vocab size
E = 32       # embedding dim (== hidden, as in IBM DecoderRNN)
H = 32       # hidden size
VPAD = 128   # lane-dense padded vocab width for the logp output
SOS_ID = 1

KEY_SEQUENCE = "sequence"
KEY_LENGTH = "length"


# --------------------------- shared GRU math --------------------------------
def _gru_gates(gi, gh, h):
    """PyTorch nn.GRU cell given precomputed input/hidden projections."""
    hd = h.shape[-1]
    r = jax.nn.sigmoid(gi[:, 0:hd] + gh[:, 0:hd])
    z = jax.nn.sigmoid(gi[:, hd:2 * hd] + gh[:, hd:2 * hd])
    n = jnp.tanh(gi[:, 2 * hd:3 * hd] + r * gh[:, 2 * hd:3 * hd])
    return (1.0 - z) * n + z * h


# --------------------------- fused seq2seq kernel ----------------------------
def seq2seq_kernel(emb_ref, len_ref,
                   ewih_ref, ewhh_ref, ebih_ref, ebhh_ref,
                   dembih_ref, dwhh_ref, dbih_ref, dbhh_ref,
                   wac_ref, wah_ref, ba_ref, wo_ref, bo_ref,
                   logp_ref, sym_ref):
    f32 = jnp.float32

    # ============================ encoder phase ============================
    lengths = len_ref[...]                                   # (B, 1) int32
    ewhh = ewhh_ref[...]
    ebhh = ebhh_ref[...]

    # Input projection for ALL time steps hoisted out of the serial loop:
    # one (T*B, E) @ (E, 3H) MXU push.
    gi_all = jnp.dot(emb_ref[...], ewih_ref[...],
                     preferred_element_type=f32) + ebih_ref[...]   # (T_IN*B, 3H)

    t_sel = lax.broadcasted_iota(jnp.int32, (B, T_IN, H), 1)  # time slot index
    h = jnp.zeros((B, H), f32)
    enc_bth = jnp.zeros((B, T_IN, H), f32)                    # lane-major enc out

    for t in range(T_IN):                                     # fully unrolled
        gi = gi_all[t * B:(t + 1) * B, :]                     # (B, 3H) static slice
        gh = jnp.dot(h, ewhh, preferred_element_type=f32) + ebhh
        h_new = _gru_gates(gi, gh, h)
        valid = lengths > t                                   # (B, 1) length mask
        h = jnp.where(valid, h_new, h)                        # freeze past length
        out_t = jnp.where(valid, h_new, 0.0)                  # pad_packed zeros
        enc_bth = jnp.where(t_sel == t, out_t[:, None, :], enc_bth)

    # ======================= decoder phase (greedy) ========================
    dembih = dembih_ref[...]    # (V_OUT, 3H) = dec_emb @ dec_wih.T (fused lookup)
    dwhh = dwhh_ref[...]
    dbih = dbih_ref[...]
    dbhh = dbhh_ref[...]
    wac = wac_ref[...]          # linear_out weight, ctx half   (H, H)
    wah = wah_ref[...]          # linear_out weight, hidden half (H, H)
    ba = ba_ref[...]
    wo = wo_ref[...]            # (H, VPAD) lane-dense, zero-padded columns
    bo = bo_ref[...]            # (1, VPAD), -1e30 on padded columns

    ids_v = lax.broadcasted_iota(jnp.int32, (B, V_OUT), 1)
    ids_pad = lax.broadcasted_iota(jnp.int32, (B, VPAD), 1)
    col_ids = lax.broadcasted_iota(jnp.int32, (B, T_DEC), 1)

    prev = jnp.full((B, 1), SOS_ID, jnp.int32)
    syms_acc = jnp.zeros((B, T_DEC), jnp.int32)

    for t in range(T_DEC):                                    # fully unrolled
        # embedding + input projection fused into one matmul (onehot @ dembih)
        onehot = (prev == ids_v).astype(f32)                  # (B, V_OUT)
        gi = jnp.dot(onehot, dembih, preferred_element_type=f32) + dbih
        gh = jnp.dot(h, dwhh, preferred_element_type=f32) + dbhh
        h = _gru_gates(gi, gh, h)                             # (B, H)

        # Luong dot attention, lane-major reductions (no padding mask: matches
        # reference; padded encoder positions are zero vectors).
        scores = jnp.sum(enc_bth * h[:, None, :], axis=-1)    # (B, T_IN)
        smax = jnp.max(scores, axis=-1, keepdims=True)
        sexp = jnp.exp(scores - smax)
        denom = jnp.sum(sexp, axis=-1, keepdims=True)
        attn = sexp * pl.reciprocal(denom, approx=True)       # EUP reciprocal
        ctx = jnp.sum(attn[:, :, None] * enc_bth, axis=1)     # (B, H)

        # linear_out(tanh) on [ctx, h]; two independent dots (same MXU depth).
        comb = jnp.tanh(
            jnp.dot(ctx, wac, preferred_element_type=f32)
            + jnp.dot(h, wah, preferred_element_type=f32) + ba)

        # output projection padded to 128 lanes; pad columns biased to -1e30 so
        # they never win argmax and contribute 0 to the softmax denominator.
        logits = jnp.dot(comb, wo, preferred_element_type=f32) + bo   # (B, VPAD)
        lmax = jnp.max(logits, axis=-1, keepdims=True)
        lse = jnp.log(jnp.sum(jnp.exp(logits - lmax), axis=-1,
                              keepdims=True)) + lmax
        logp = logits - lse                                   # log_softmax
        logp_ref[t] = logp.astype(logp_ref.dtype)             # lane-dense store

        # greedy symbol = first argmax (matches torch.topk(1))
        pmax = jnp.max(logp, axis=-1, keepdims=True)
        sym = jnp.min(jnp.where(logp >= pmax, ids_pad, VPAD),
                      axis=-1, keepdims=True).astype(jnp.int32)       # (B, 1)
        syms_acc = jnp.where(col_ids == t, sym, syms_acc)
        prev = sym

    sym_ref[...] = syms_acc    # single store for all greedy symbols


# ----------------------------- pallas wrapper --------------------------------
def run_seq2seq(emb_flat, lengths_b1,
                enc_wih_t, enc_whh_t, enc_bih, enc_bhh,
                dembih, dec_whh_t, dec_bih, dec_bhh,
                wac_t, wah_t, ba, wo_pad, bo_pad):
    vmem = pl.BlockSpec(memory_space=pltpu.MemorySpace.VMEM)
    return pl.pallas_call(
        seq2seq_kernel,
        out_shape=(jax.ShapeDtypeStruct((T_DEC, B, VPAD), jnp.float32),
                   jax.ShapeDtypeStruct((B, T_DEC), jnp.int32)),
        in_specs=[vmem] * 15,
        out_specs=(vmem, vmem),
    )(emb_flat, lengths_b1,
      enc_wih_t, enc_whh_t, enc_bih, enc_bhh,
      dembih, dec_whh_t, dec_bih, dec_bhh,
      wac_t, wah_t, ba, wo_pad, bo_pad)


# ----------------------------- parameters -----------------------------------
def init_params(key):
    ks = jax.random.split(key, 14)
    s = 0.1
    f = lambda k, shp: (jax.random.normal(k, shp, jnp.float32) * s)
    return {
        "enc_emb": f(ks[0], (V_IN, E)),
        "enc_wih": f(ks[1], (3 * H, E)),
        "enc_whh": f(ks[2], (3 * H, H)),
        "enc_bih": f(ks[3], (3 * H,)),
        "enc_bhh": f(ks[4], (3 * H,)),
        "dec_emb": f(ks[5], (V_OUT, E)),
        "dec_wih": f(ks[6], (3 * H, E)),
        "dec_whh": f(ks[7], (3 * H, H)),
        "dec_bih": f(ks[8], (3 * H,)),
        "dec_bhh": f(ks[9], (3 * H,)),
        "attn_w": f(ks[10], (H, 2 * H)),   # linear_out: (out=H, in=[ctx, h])
        "attn_b": f(ks[11], (H,)),
        "out_w": f(ks[12], (V_OUT, H)),
        "out_b": f(ks[13], (V_OUT,)),
    }


# ----------------------------- Seq2seq.forward ------------------------------
def seq2seq_forward(params, input_tokens, input_lengths):
    lengths = jnp.asarray(input_lengths, jnp.int32)

    # get_batch_permutation: sort lengths descending + inverse permutation
    rearrange = jnp.argsort(-lengths)
    inverse = jnp.argsort(rearrange)
    x_sorted = input_tokens[rearrange]
    lens_sorted = lengths[rearrange]

    # encoder embedding lookup, time-major flatten: row r = t*B + b
    emb_seq = jnp.take(params["enc_emb"], x_sorted, axis=0)          # (B, T, E)
    emb_flat = jnp.transpose(emb_seq, (1, 0, 2)).reshape(T_IN * B, E)

    # decoder weight prep: fuse embedding with the GRU input projection and
    # pad the output projection to a lane-dense 128-wide vocab.
    dembih = jnp.dot(params["dec_emb"], params["dec_wih"].T)         # (V_OUT, 3H)
    attn_w = params["attn_w"]
    wo_pad = jnp.zeros((H, VPAD), jnp.float32).at[:, :V_OUT].set(params["out_w"].T)
    bo_pad = jnp.full((1, VPAD), -1e30, jnp.float32).at[0, :V_OUT].set(params["out_b"])

    logp_pad, syms_bt = run_seq2seq(
        emb_flat, lens_sorted[:, None].astype(jnp.int32),
        params["enc_wih"].T, params["enc_whh"].T,
        params["enc_bih"][None, :], params["enc_bhh"][None, :],
        dembih, params["dec_whh"].T,
        params["dec_bih"][None, :], params["dec_bhh"][None, :],
        attn_w[:, :H].T, attn_w[:, H:].T, params["attn_b"][None, :],
        wo_pad, bo_pad)

    # slice off the lane padding, then apply the inverse permutation
    logp = logp_pad[:, :, :V_OUT]                                    # (T_DEC, B, V)
    logp = logp[:, inverse, :]
    syms = syms_bt[inverse, :]                                       # (B, T_DEC)

    batch = input_tokens.shape[0]
    decoder_outputs = [logp[t] for t in range(T_DEC)]                # list of (B, V)
    sos_tensor = jnp.full((batch, 1), SOS_ID, jnp.int32)
    sequences = [sos_tensor] + [syms[:, t:t + 1] for t in range(T_DEC)]
    # TODO(synk): eos-based per-sample decode lengths are not tracked; a fixed
    # max decode length is reported for every sample.
    other = {KEY_LENGTH: [T_DEC] * batch, KEY_SEQUENCE: sequences}
    return decoder_outputs, None, other


# --------------------------------- main --------------------------------------
if __name__ == "__main__":
    key = jax.random.PRNGKey(0)
    pkey, ikey = jax.random.split(key)
    params = init_params(pkey)

    input_variable = jax.random.randint(ikey, (B, T_IN), 0, V_IN,
                                        dtype=jnp.int32)
    input_lengths = [5, 8]   # unsorted on purpose -> exercises permutation path

    decoder_outputs, _, other = seq2seq_forward(params, input_variable,
                                                input_lengths)
    jax.block_until_ready(decoder_outputs[-1])
    jax.block_until_ready(other[KEY_SEQUENCE][-1])
    print("KERNEL_OK")
</pallas_src>

<mosaic_0001>
module attributes {stable_mosaic.version = 11 : i64} {
  func.func @seq2seq_kernel(%arg0: memref<16x32xf32, #tpu.memory_space<vmem>>, %arg1: memref<2x1xi32, #tpu.memory_space<vmem>>, %arg2: memref<32x96xf32, #tpu.memory_space<vmem>>, %arg3: memref<32x96xf32, #tpu.memory_space<vmem>>, %arg4: memref<1x96xf32, #tpu.memory_space<vmem>>, %arg5: memref<1x96xf32, #tpu.memory_space<vmem>>, %arg6: memref<32x96xf32, #tpu.memory_space<vmem>>, %arg7: memref<32x96xf32, #tpu.memory_space<vmem>>, %arg8: memref<1x96xf32, #tpu.memory_space<vmem>>, %arg9: memref<1x96xf32, #tpu.memory_space<vmem>>, %arg10: memref<32x32xf32, #tpu.memory_space<vmem>>, %arg11: memref<32x32xf32, #tpu.memory_space<vmem>>, %arg12: memref<1x32xf32, #tpu.memory_space<vmem>>, %arg13: memref<32x128xf32, #tpu.memory_space<vmem>>, %arg14: memref<1x128xf32, #tpu.memory_space<vmem>>, %arg15: memref<8x2x128xf32, #tpu.memory_space<vmem>>, %arg16: memref<2x8xi32, #tpu.memory_space<vmem>>) attributes {dimension_semantics = [], scalar_prefetch = 0 : i64, scratch_operands = 0 : i64, tpu.core_type = #tpu.core_type<tc>} {
    %c0 = arith.constant 0 : index
    %c0_0 = arith.constant 0 : index
    %0 = vector.load %arg1[%c0, %c0_0] : memref<2x1xi32, #tpu.memory_space<vmem>>, vector<2x1xi32>
    %c0_1 = arith.constant 0 : index
    %c0_2 = arith.constant 0 : index
    %1 = vector.load %arg3[%c0_1, %c0_2] : memref<32x96xf32, #tpu.memory_space<vmem>>, vector<32x96xf32>
    %c0_3 = arith.constant 0 : index
    %c0_4 = arith.constant 0 : index
    %2 = vector.load %arg5[%c0_3, %c0_4] : memref<1x96xf32, #tpu.memory_space<vmem>>, vector<1x96xf32>
    %c0_5 = arith.constant 0 : index
    %c0_6 = arith.constant 0 : index
    %3 = vector.load %arg0[%c0_5, %c0_6] : memref<16x32xf32, #tpu.memory_space<vmem>>, vector<16x32xf32>
    %c0_7 = arith.constant 0 : index
    %c0_8 = arith.constant 0 : index
    %4 = vector.load %arg2[%c0_7, %c0_8] : memref<32x96xf32, #tpu.memory_space<vmem>>, vector<32x96xf32>
    %cst = arith.constant dense<0.000000e+00> : vector<16x96xf32>
    %5 = tpu.matmul %3, %4, %cst {dimension_numbers = #tpu.dot_dimension_numbers<[1], [0], [0], [1], [0, 0, 1, 1], [], []>} : vector<16x32xf32>, vector<32x96xf32>, vector<16x96xf32> -> vector<16x96xf32>
    %c0_9 = arith.constant 0 : index
    %c0_10 = arith.constant 0 : index
    %6 = vector.load %arg4[%c0_9, %c0_10] : memref<1x96xf32, #tpu.memory_space<vmem>>, vector<1x96xf32>
    %7 = vector.broadcast %6 : vector<1x96xf32> to vector<16x96xf32>
    %8 = arith.addf %5, %7 : vector<16x96xf32>
    %9 = tpu.iota {dimensions = array<i32: 1>} : vector<2x8x32xi32>
    %cst_11 = arith.constant 0.000000e+00 : f32
    %10 = vector.broadcast %cst_11 : f32 to vector<2x32xf32>
    %cst_12 = arith.constant 0.000000e+00 : f32
    %11 = vector.broadcast %cst_12 : f32 to vector<2x8x32xf32>
    %12 = vector.extract_strided_slice %8 {offsets = [0, 0], sizes = [2, 96], strides = [1, 1]} : vector<16x96xf32> to vector<2x96xf32>
    %cst_13 = arith.constant dense<0.000000e+00> : vector<2x96xf32>
    %13 = tpu.matmul %10, %1, %cst_13 {dimension_numbers = #tpu.dot_dimension_numbers<[1], [0], [0], [1], [0, 0, 1, 1], [], []>} : vector<2x32xf32>, vector<32x96xf32>, vector<2x96xf32> -> vector<2x96xf32>
    %14 = vector.broadcast %2 : vector<1x96xf32> to vector<2x96xf32>
    %15 = arith.addf %13, %14 : vector<2x96xf32>
    %16 = vector.extract_strided_slice %12 {offsets = [0, 0], sizes = [2, 32], strides = [1, 1]} : vector<2x96xf32> to vector<2x32xf32>
    %17 = vector.extract_strided_slice %15 {offsets = [0, 0], sizes = [2, 32], strides = [1, 1]} : vector<2x96xf32> to vector<2x32xf32>
    %18 = arith.addf %16, %17 : vector<2x32xf32>
    %19 = arith.negf %18 : vector<2x32xf32>
    %20 = math.exp %19 : vector<2x32xf32>
    %cst_14 = arith.constant 1.000000e+00 : f32
    %21 = vector.broadcast %cst_14 : f32 to vector<2x32xf32>
    %22 = arith.addf %21, %20 : vector<2x32xf32>
    %23 = arith.divf %21, %22 : vector<2x32xf32>
    %24 = vector.extract_strided_slice %12 {offsets = [0, 32], sizes = [2, 32], strides = [1, 1]} : vector<2x96xf32> to vector<2x32xf32>
    %25 = vector.extract_strided_slice %15 {offsets = [0, 32], sizes = [2, 32], strides = [1, 1]} : vector<2x96xf32> to vector<2x32xf32>
    %26 = arith.addf %24, %25 : vector<2x32xf32>
    %27 = arith.negf %26 : vector<2x32xf32>
    %28 = math.exp %27 : vector<2x32xf32>
    %cst_15 = arith.constant 1.000000e+00 : f32
    %29 = vector.broadcast %cst_15 : f32 to vector<2x32xf32>
    %30 = arith.addf %29, %28 : vector<2x32xf32>
    %31 = arith.divf %29, %30 : vector<2x32xf32>
    %32 = vector.extract_strided_slice %12 {offsets = [0, 64], sizes = [2, 32], strides = [1, 1]} : vector<2x96xf32> to vector<2x32xf32>
    %33 = vector.extract_strided_slice %15 {offsets = [0, 64], sizes = [2, 32], strides = [1, 1]} : vector<2x96xf32> to vector<2x32xf32>
    %34 = arith.mulf %23, %33 : vector<2x32xf32>
    %35 = arith.addf %32, %34 : vector<2x32xf32>
    %36 = math.tanh %35 : vector<2x32xf32>
    %cst_16 = arith.constant 1.000000e+00 : f32
    %37 = vector.broadcast %cst_16 : f32 to vector<2x32xf32>
    %38 = arith.subf %37, %31 : vector<2x32xf32>
    %39 = arith.mulf %38, %36 : vector<2x32xf32>
    %40 = arith.mulf %31, %10 : vector<2x32xf32>
    %41 = arith.addf %39, %40 : vector<2x32xf32>
    %c0_i32 = arith.constant 0 : i32
    %42 = vector.broadcast %c0_i32 : i32 to vector<2x1xi32>
    %43 = arith.cmpi sgt, %0, %42 : vector<2x1xi32>
    %44 = vector.shape_cast %43 : vector<2x1xi1> to vector<2x1xi1>
    %45 = vector.broadcast %44 : vector<2x1xi1> to vector<2x32xi1>
    %46 = arith.select %45, %41, %10 : vector<2x32xi1>, vector<2x32xf32>
    %cst_17 = arith.constant 0.000000e+00 : f32
    %47 = vector.shape_cast %43 : vector<2x1xi1> to vector<2x1xi1>
    %48 = vector.broadcast %47 : vector<2x1xi1> to vector<2x32xi1>
    %49 = vector.broadcast %cst_17 : f32 to vector<2x32xf32>
    %50 = arith.select %48, %41, %49 : vector<2x32xi1>, vector<2x32xf32>
    %c0_i32_18 = arith.constant 0 : i32
    %51 = vector.broadcast %c0_i32_18 : i32 to vector<2x8x32xi32>
    %52 = arith.cmpi eq, %9, %51 : vector<2x8x32xi32>
    %53 = vector.shape_cast %50 : vector<2x32xf32> to vector<2x1x32xf32>
    %54 = vector.shape_cast %53 : vector<2x1x32xf32> to vector<2x1x32xf32>
    %55 = vector.broadcast %54 : vector<2x1x32xf32> to vector<2x8x32xf32>
    %56 = arith.select %52, %55, %11 : vector<2x8x32xi1>, vector<2x8x32xf32>
    %57 = vector.extract_strided_slice %8 {offsets = [2, 0], sizes = [2, 96], strides = [1, 1]} : vector<16x96xf32> to vector<2x96xf32>
    %cst_19 = arith.constant dense<0.000000e+00> : vector<2x96xf32>
    %58 = tpu.matmul %46, %1, %cst_19 {dimension_numbers = #tpu.dot_dimension_numbers<[1], [0], [0], [1], [0, 0, 1, 1], [], []>} : vector<2x32xf32>, vector<32x96xf32>, vector<2x96xf32> -> vector<2x96xf32>
    %59 = vector.broadcast %2 : vector<1x96xf32> to vector<2x96xf32>
    %60 = arith.addf %58, %59 : vector<2x96xf32>
    %61 = vector.extract_strided_slice %57 {offsets = [0, 0], sizes = [2, 32], strides = [1, 1]} : vector<2x96xf32> to vector<2x32xf32>
    %62 = vector.extract_strided_slice %60 {offsets = [0, 0], sizes = [2, 32], strides = [1, 1]} : vector<2x96xf32> to vector<2x32xf32>
    %63 = arith.addf %61, %62 : vector<2x32xf32>
    %64 = arith.negf %63 : vector<2x32xf32>
    %65 = math.exp %64 : vector<2x32xf32>
    %cst_20 = arith.constant 1.000000e+00 : f32
    %66 = vector.broadcast %cst_20 : f32 to vector<2x32xf32>
    %67 = arith.addf %66, %65 : vector<2x32xf32>
    %68 = arith.divf %66, %67 : vector<2x32xf32>
    %69 = vector.extract_strided_slice %57 {offsets = [0, 32], sizes = [2, 32], strides = [1, 1]} : vector<2x96xf32> to vector<2x32xf32>
    %70 = vector.extract_strided_slice %60 {offsets = [0, 32], sizes = [2, 32], strides = [1, 1]} : vector<2x96xf32> to vector<2x32xf32>
    %71 = arith.addf %69, %70 : vector<2x32xf32>
    %72 = arith.negf %71 : vector<2x32xf32>
    %73 = math.exp %72 : vector<2x32xf32>
    %cst_21 = arith.constant 1.000000e+00 : f32
    %74 = vector.broadcast %cst_21 : f32 to vector<2x32xf32>
    %75 = arith.addf %74, %73 : vector<2x32xf32>
    %76 = arith.divf %74, %75 : vector<2x32xf32>
    %77 = vector.extract_strided_slice %57 {offsets = [0, 64], sizes = [2, 32], strides = [1, 1]} : vector<2x96xf32> to vector<2x32xf32>
    %78 = vector.extract_strided_slice %60 {offsets = [0, 64], sizes = [2, 32], strides = [1, 1]} : vector<2x96xf32> to vector<2x32xf32>
    %79 = arith.mulf %68, %78 : vector<2x32xf32>
    %80 = arith.addf %77, %79 : vector<2x32xf32>
    %81 = math.tanh %80 : vector<2x32xf32>
    %cst_22 = arith.constant 1.000000e+00 : f32
    %82 = vector.broadcast %cst_22 : f32 to vector<2x32xf32>
    %83 = arith.subf %82, %76 : vector<2x32xf32>
    %84 = arith.mulf %83, %81 : vector<2x32xf32>
    %85 = arith.mulf %76, %46 : vector<2x32xf32>
    %86 = arith.addf %84, %85 : vector<2x32xf32>
    %c1_i32 = arith.constant 1 : i32
    %87 = vector.broadcast %c1_i32 : i32 to vector<2x1xi32>
    %88 = arith.cmpi sgt, %0, %87 : vector<2x1xi32>
    %89 = vector.shape_cast %88 : vector<2x1xi1> to vector<2x1xi1>
    %90 = vector.broadcast %89 : vector<2x1xi1> to vector<2x32xi1>
    %91 = arith.select %90, %86, %46 : vector<2x32xi1>, vector<2x32xf32>
    %cst_23 = arith.constant 0.000000e+00 : f32
    %92 = vector.shape_cast %88 : vector<2x1xi1> to vector<2x1xi1>
    %93 = vector.broadcast %92 : vector<2x1xi1> to vector<2x32xi1>
    %94 = vector.broadcast %cst_23 : f32 to vector<2x32xf32>
    %95 = arith.select %93, %86, %94 : vector<2x32xi1>, vector<2x32xf32>
    %c1_i32_24 = arith.constant 1 : i32
    %96 = vector.broadcast %c1_i32_24 : i32 to vector<2x8x32xi32>
    %97 = arith.cmpi eq, %9, %96 : vector<2x8x32xi32>
    %98 = vector.shape_cast %95 : vector<2x32xf32> to vector<2x1x32xf32>
    %99 = vector.shape_cast %98 : vector<2x1x32xf32> to vector<2x1x32xf32>
    %100 = vector.broadcast %99 : vector<2x1x32xf32> to vector<2x8x32xf32>
    %101 = arith.select %97, %100, %56 : vector<2x8x32xi1>, vector<2x8x32xf32>
    %102 = vector.extract_strided_slice %8 {offsets = [4, 0], sizes = [2, 96], strides = [1, 1]} : vector<16x96xf32> to vector<2x96xf32>
    %cst_25 = arith.constant dense<0.000000e+00> : vector<2x96xf32>
    %103 = tpu.matmul %91, %1, %cst_25 {dimension_numbers = #tpu.dot_dimension_numbers<[1], [0], [0], [1], [0, 0, 1, 1], [], []>} : vector<2x32xf32>, vector<32x96xf32>, vector<2x96xf32> -> vector<2x96xf32>
    %104 = vector.broadcast %2 : vector<1x96xf32> to vector<2x96xf32>
    %105 = arith.addf %103, %104 : vector<2x96xf32>
    %106 = vector.extract_strided_slice %102 {offsets = [0, 0], sizes = [2, 32], strides = [1, 1]} : vector<2x96xf32> to vector<2x32xf32>
    %107 = vector.extract_strided_slice %105 {offsets = [0, 0], sizes = [2, 32], strides = [1, 1]} : vector<2x96xf32> to vector<2x32xf32>
    %108 = arith.addf %106, %107 : vector<2x32xf32>
    %109 = arith.negf %108 : vector<2x32xf32>
    %110 = math.exp %109 : vector<2x32xf32>
    %cst_26 = arith.constant 1.000000e+00 : f32
    %111 = vector.broadcast %cst_26 : f32 to vector<2x32xf32>
    %112 = arith.addf %111, %110 : vector<2x32xf32>
    %113 = arith.divf %111, %112 : vector<2x32xf32>
    %114 = vector.extract_strided_slice %102 {offsets = [0, 32], sizes = [2, 32], strides = [1, 1]} : vector<2x96xf32> to vector<2x32xf32>
    %115 = vector.extract_strided_slice %105 {offsets = [0, 32], sizes = [2, 32], strides = [1, 1]} : vector<2x96xf32> to vector<2x32xf32>
    %116 = arith.addf %114, %115 : vector<2x32xf32>
    %117 = arith.negf %116 : vector<2x32xf32>
    %118 = math.exp %117 : vector<2x32xf32>
    %cst_27 = arith.constant 1.000000e+00 : f32
    %119 = vector.broadcast %cst_27 : f32 to vector<2x32xf32>
    %120 = arith.addf %119, %118 : vector<2x32xf32>
    %121 = arith.divf %119, %120 : vector<2x32xf32>
    %122 = vector.extract_strided_slice %102 {offsets = [0, 64], sizes = [2, 32], strides = [1, 1]} : vector<2x96xf32> to vector<2x32xf32>
    %123 = vector.extract_strided_slice %105 {offsets = [0, 64], sizes = [2, 32], strides = [1, 1]} : vector<2x96xf32> to vector<2x32xf32>
    %124 = arith.mulf %113, %123 : vector<2x32xf32>
    %125 = arith.addf %122, %124 : vector<2x32xf32>
    %126 = math.tanh %125 : vector<2x32xf32>
    %cst_28 = arith.constant 1.000000e+00 : f32
    %127 = vector.broadcast %cst_28 : f32 to vector<2x32xf32>
    %128 = arith.subf %127, %121 : vector<2x32xf32>
    %129 = arith.mulf %128, %126 : vector<2x32xf32>
    %130 = arith.mulf %121, %91 : vector<2x32xf32>
    %131 = arith.addf %129, %130 : vector<2x32xf32>
    %c2_i32 = arith.constant 2 : i32
    %132 = vector.broadcast %c2_i32 : i32 to vector<2x1xi32>
    %133 = arith.cmpi sgt, %0, %132 : vector<2x1xi32>
    %134 = vector.shape_cast %133 : vector<2x1xi1> to vector<2x1xi1>
    %135 = vector.broadcast %134 : vector<2x1xi1> to vector<2x32xi1>
    %136 = arith.select %135, %131, %91 : vector<2x32xi1>, vector<2x32xf32>
    %cst_29 = arith.constant 0.000000e+00 : f32
    %137 = vector.shape_cast %133 : vector<2x1xi1> to vector<2x1xi1>
    %138 = vector.broadcast %137 : vector<2x1xi1> to vector<2x32xi1>
    %139 = vector.broadcast %cst_29 : f32 to vector<2x32xf32>
    %140 = arith.select %138, %131, %139 : vector<2x32xi1>, vector<2x32xf32>
    %c2_i32_30 = arith.constant 2 : i32
    %141 = vector.broadcast %c2_i32_30 : i32 to vector<2x8x32xi32>
    %142 = arith.cmpi eq, %9, %141 : vector<2x8x32xi32>
    %143 = vector.shape_cast %140 : vector<2x32xf32> to vector<2x1x32xf32>
    %144 = vector.shape_cast %143 : vector<2x1x32xf32> to vector<2x1x32xf32>
    %145 = vector.broadcast %144 : vector<2x1x32xf32> to vector<2x8x32xf32>
    %146 = arith.select %142, %145, %101 : vector<2x8x32xi1>, vector<2x8x32xf32>
    %147 = vector.extract_strided_slice %8 {offsets = [6, 0], sizes = [2, 96], strides = [1, 1]} : vector<16x96xf32> to vector<2x96xf32>
    %cst_31 = arith.constant dense<0.000000e+00> : vector<2x96xf32>
    %148 = tpu.matmul %136, %1, %cst_31 {dimension_numbers = #tpu.dot_dimension_numbers<[1], [0], [0], [1], [0, 0, 1, 1], [], []>} : vector<2x32xf32>, vector<32x96xf32>, vector<2x96xf32> -> vector<2x96xf32>
    %149 = vector.broadcast %2 : vector<1x96xf32> to vector<2x96xf32>
    %150 = arith.addf %148, %149 : vector<2x96xf32>
    %151 = vector.extract_strided_slice %147 {offsets = [0, 0], sizes = [2, 32], strides = [1, 1]} : vector<2x96xf32> to vector<2x32xf32>
    %152 = vector.extract_strided_slice %150 {offsets = [0, 0], sizes = [2, 32], strides = [1, 1]} : vector<2x96xf32> to vector<2x32xf32>
    %153 = arith.addf %151, %152 : vector<2x32xf32>
    %154 = arith.negf %153 : vector<2x32xf32>
    %155 = math.exp %154 : vector<2x32xf32>
    %cst_32 = arith.constant 1.000000e+00 : f32
    %156 = vector.broadcast %cst_32 : f32 to vector<2x32xf32>
    %157 = arith.addf %156, %155 : vector<2x32xf32>
    %158 = arith.divf %156, %157 : vector<2x32xf32>
    %159 = vector.extract_strided_slice %147 {offsets = [0, 32], sizes = [2, 32], strides = [1, 1]} : vector<2x96xf32> to vector<2x32xf32>
    %160 = vector.extract_strided_slice %150 {offsets = [0, 32], sizes = [2, 32], strides = [1, 1]} : vector<2x96xf32> to vector<2x32xf32>
    %161 = arith.addf %159, %160 : vector<2x32xf32>
    %162 = arith.negf %161 : vector<2x32xf32>
    %163 = math.exp %162 : vector<2x32xf32>
    %cst_33 = arith.constant 1.000000e+00 : f32
    %164 = vector.broadcast %cst_33 : f32 to vector<2x32xf32>
    %165 = arith.addf %164, %163 : vector<2x32xf32>
    %166 = arith.divf %164, %165 : vector<2x32xf32>
    %167 = vector.extract_strided_slice %147 {offsets = [0, 64], sizes = [2, 32], strides = [1, 1]} : vector<2x96xf32> to vector<2x32xf32>
    %168 = vector.extract_strided_slice %150 {offsets = [0, 64], sizes = [2, 32], strides = [1, 1]} : vector<2x96xf32> to vector<2x32xf32>
    %169 = arith.mulf %158, %168 : vector<2x32xf32>
    %170 = arith.addf %167, %169 : vector<2x32xf32>
    %171 = math.tanh %170 : vector<2x32xf32>
    %cst_34 = arith.constant 1.000000e+00 : f32
    %172 = vector.broadcast %cst_34 : f32 to vector<2x32xf32>
    %173 = arith.subf %172, %166 : vector<2x32xf32>
    %174 = arith.mulf %173, %171 : vector<2x32xf32>
    %175 = arith.mulf %166, %136 : vector<2x32xf32>
    %176 = arith.addf %174, %175 : vector<2x32xf32>
    %c3_i32 = arith.constant 3 : i32
    %177 = vector.broadcast %c3_i32 : i32 to vector<2x1xi32>
    %178 = arith.cmpi sgt, %0, %177 : vector<2x1xi32>
    %179 = vector.shape_cast %178 : vector<2x1xi1> to vector<2x1xi1>
    %180 = vector.broadcast %179 : vector<2x1xi1> to vector<2x32xi1>
    %181 = arith.select %180, %176, %136 : vector<2x32xi1>, vector<2x32xf32>
    %cst_35 = arith.constant 0.000000e+00 : f32
    %182 = vector.shape_cast %178 : vector<2x1xi1> to vector<2x1xi1>
    %183 = vector.broadcast %182 : vector<2x1xi1> to vector<2x32xi1>
    %184 = vector.broadcast %cst_35 : f32 to vector<2x32xf32>
    %185 = arith.select %183, %176, %184 : vector<2x32xi1>, vector<2x32xf32>
    %c3_i32_36 = arith.constant 3 : i32
    %186 = vector.broadcast %c3_i32_36 : i32 to vector<2x8x32xi32>
    %187 = arith.cmpi eq, %9, %186 : vector<2x8x32xi32>
    %188 = vector.shape_cast %185 : vector<2x32xf32> to vector<2x1x32xf32>
    %189 = vector.shape_cast %188 : vector<2x1x32xf32> to vector<2x1x32xf32>
    %190 = vector.broadcast %189 : vector<2x1x32xf32> to vector<2x8x32xf32>
    %191 = arith.select %187, %190, %146 : vector<2x8x32xi1>, vector<2x8x32xf32>
    %192 = vector.extract_strided_slice %8 {offsets = [8, 0], sizes = [2, 96], strides = [1, 1]} : vector<16x96xf32> to vector<2x96xf32>
    %cst_37 = arith.constant dense<0.000000e+00> : vector<2x96xf32>
    %193 = tpu.matmul %181, %1, %cst_37 {dimension_numbers = #tpu.dot_dimension_numbers<[1], [0], [0], [1], [0, 0, 1, 1], [], []>} : vector<2x32xf32>, vector<32x96xf32>, vector<2x96xf32> -> vector<2x96xf32>
    %194 = vector.broadcast %2 : vector<1x96xf32> to vector<2x96xf32>
    %195 = arith.addf %193, %194 : vector<2x96xf32>
    %196 = vector.extract_strided_slice %192 {offsets = [0, 0], sizes = [2, 32], strides = [1, 1]} : vector<2x96xf32> to vector<2x32xf32>
    %197 = vector.extract_strided_slice %195 {offsets = [0, 0], sizes = [2, 32], strides = [1, 1]} : vector<2x96xf32> to vector<2x32xf32>
    %198 = arith.addf %196, %197 : vector<2x32xf32>
    %199 = arith.negf %198 : vector<2x32xf32>
    %200 = math.exp %199 : vector<2x32xf32>
    %cst_38 = arith.constant 1.000000e+00 : f32
    %201 = vector.broadcast %cst_38 : f32 to vector<2x32xf32>
    %202 = arith.addf %201, %200 : vector<2x32xf32>
    %203 = arith.divf %201, %202 : vector<2x32xf32>
    %204 = vector.extract_strided_slice %192 {offsets = [0, 32], sizes = [2, 32], strides = [1, 1]} : vector<2x96xf32> to vector<2x32xf32>
    %205 = vector.extract_strided_slice %195 {offsets = [0, 32], sizes = [2, 32], strides = [1, 1]} : vector<2x96xf32> to vector<2x32xf32>
    %206 = arith.addf %204, %205 : vector<2x32xf32>
    %207 = arith.negf %206 : vector<2x32xf32>
    %208 = math.exp %207 : vector<2x32xf32>
    %cst_39 = arith.constant 1.000000e+00 : f32
    %209 = vector.broadcast %cst_39 : f32 to vector<2x32xf32>
    %210 = arith.addf %209, %208 : vector<2x32xf32>
    %211 = arith.divf %209, %210 : vector<2x32xf32>
    %212 = vector.extract_strided_slice %192 {offsets = [0, 64], sizes = [2, 32], strides = [1, 1]} : vector<2x96xf32> to vector<2x32xf32>
    %213 = vector.extract_strided_slice %195 {offsets = [0, 64], sizes = [2, 32], strides = [1, 1]} : vector<2x96xf32> to vector<2x32xf32>
    %214 = arith.mulf %203, %213 : vector<2x32xf32>
    %215 = arith.addf %212, %214 : vector<2x32xf32>
    %216 = math.tanh %215 : vector<2x32xf32>
    %cst_40 = arith.constant 1.000000e+00 : f32
    %217 = vector.broadcast %cst_40 : f32 to vector<2x32xf32>
    %218 = arith.subf %217, %211 : vector<2x32xf32>
    %219 = arith.mulf %218, %216 : vector<2x32xf32>
    %220 = arith.mulf %211, %181 : vector<2x32xf32>
    %221 = arith.addf %219, %220 : vector<2x32xf32>
    %c4_i32 = arith.constant 4 : i32
    %222 = vector.broadcast %c4_i32 : i32 to vector<2x1xi32>
    %223 = arith.cmpi sgt, %0, %222 : vector<2x1xi32>
    %224 = vector.shape_cast %223 : vector<2x1xi1> to vector<2x1xi1>
    %225 = vector.broadcast %224 : vector<2x1xi1> to vector<2x32xi1>
    %226 = arith.select %225, %221, %181 : vector<2x32xi1>, vector<2x32xf32>
    %cst_41 = arith.constant 0.000000e+00 : f32
    %227 = vector.shape_cast %223 : vector<2x1xi1> to vector<2x1xi1>
    %228 = vector.broadcast %227 : vector<2x1xi1> to vector<2x32xi1>
    %229 = vector.broadcast %cst_41 : f32 to vector<2x32xf32>
    %230 = arith.select %228, %221, %229 : vector<2x32xi1>, vector<2x32xf32>
    %c4_i32_42 = arith.constant 4 : i32
    %231 = vector.broadcast %c4_i32_42 : i32 to vector<2x8x32xi32>
    %232 = arith.cmpi eq, %9, %231 : vector<2x8x32xi32>
    %233 = vector.shape_cast %230 : vector<2x32xf32> to vector<2x1x32xf32>
    %234 = vector.shape_cast %233 : vector<2x1x32xf32> to vector<2x1x32xf32>
    %235 = vector.broadcast %234 : vector<2x1x32xf32> to vector<2x8x32xf32>
    %236 = arith.select %232, %235, %191 : vector<2x8x32xi1>, vector<2x8x32xf32>
    %237 = vector.extract_strided_slice %8 {offsets = [10, 0], sizes = [2, 96], strides = [1, 1]} : vector<16x96xf32> to vector<2x96xf32>
    %cst_43 = arith.constant dense<0.000000e+00> : vector<2x96xf32>
    %238 = tpu.matmul %226, %1, %cst_43 {dimension_numbers = #tpu.dot_dimension_numbers<[1], [0], [0], [1], [0, 0, 1, 1], [], []>} : vector<2x32xf32>, vector<32x96xf32>, vector<2x96xf32> -> vector<2x96xf32>
    %239 = vector.broadcast %2 : vector<1x96xf32> to vector<2x96xf32>
    %240 = arith.addf %238, %239 : vector<2x96xf32>
    %241 = vector.extract_strided_slice %237 {offsets = [0, 0], sizes = [2, 32], strides = [1, 1]} : vector<2x96xf32> to vector<2x32xf32>
    %242 = vector.extract_strided_slice %240 {offsets = [0, 0], sizes = [2, 32], strides = [1, 1]} : vector<2x96xf32> to vector<2x32xf32>
    %243 = arith.addf %241, %242 : vector<2x32xf32>
    %244 = arith.negf %243 : vector<2x32xf32>
    %245 = math.exp %244 : vector<2x32xf32>
    %cst_44 = arith.constant 1.000000e+00 : f32
    %246 = vector.broadcast %cst_44 : f32 to vector<2x32xf32>
    %247 = arith.addf %246, %245 : vector<2x32xf32>
    %248 = arith.divf %246, %247 : vector<2x32xf32>
    %249 = vector.extract_strided_slice %237 {offsets = [0, 32], sizes = [2, 32], strides = [1, 1]} : vector<2x96xf32> to vector<2x32xf32>
    %250 = vector.extract_strided_slice %240 {offsets = [0, 32], sizes = [2, 32], strides = [1, 1]} : vector<2x96xf32> to vector<2x32xf32>
    %251 = arith.addf %249, %250 : vector<2x32xf32>
    %252 = arith.negf %251 : vector<2x32xf32>
    %253 = math.exp %252 : vector<2x32xf32>
    %cst_45 = arith.constant 1.000000e+00 : f32
    %254 = vector.broadcast %cst_45 : f32 to vector<2x32xf32>
    %255 = arith.addf %254, %253 : vector<2x32xf32>
    %256 = arith.divf %254, %255 : vector<2x32xf32>
    %257 = vector.extract_strided_slice %237 {offsets = [0, 64], sizes = [2, 32], strides = [1, 1]} : vector<2x96xf32> to vector<2x32xf32>
    %258 = vector.extract_strided_slice %240 {offsets = [0, 64], sizes = [2, 32], strides = [1, 1]} : vector<2x96xf32> to vector<2x32xf32>
    %259 = arith.mulf %248, %258 : vector<2x32xf32>
    %260 = arith.addf %257, %259 : vector<2x32xf32>
    %261 = math.tanh %260 : vector<2x32xf32>
    %cst_46 = arith.constant 1.000000e+00 : f32
    %262 = vector.broadcast %cst_46 : f32 to vector<2x32xf32>
    %263 = arith.subf %262, %256 : vector<2x32xf32>
    %264 = arith.mulf %263, %261 : vector<2x32xf32>
    %265 = arith.mulf %256, %226 : vector<2x32xf32>
    %266 = arith.addf %264, %265 : vector<2x32xf32>
    %c5_i32 = arith.constant 5 : i32
    %267 = vector.broadcast %c5_i32 : i32 to vector<2x1xi32>
    %268 = arith.cmpi sgt, %0, %267 : vector<2x1xi32>
    %269 = vector.shape_cast %268 : vector<2x1xi1> to vector<2x1xi1>
    %270 = vector.broadcast %269 : vector<2x1xi1> to vector<2x32xi1>
    %271 = arith.select %270, %266, %226 : vector<2x32xi1>, vector<2x32xf32>
    %cst_47 = arith.constant 0.000000e+00 : f32
    %272 = vector.shape_cast %268 : vector<2x1xi1> to vector<2x1xi1>
    %273 = vector.broadcast %272 : vector<2x1xi1> to vector<2x32xi1>
    %274 = vector.broadcast %cst_47 : f32 to vector<2x32xf32>
    %275 = arith.select %273, %266, %274 : vector<2x32xi1>, vector<2x32xf32>
    %c5_i32_48 = arith.constant 5 : i32
    %276 = vector.broadcast %c5_i32_48 : i32 to vector<2x8x32xi32>
    %277 = arith.cmpi eq, %9, %276 : vector<2x8x32xi32>
    %278 = vector.shape_cast %275 : vector<2x32xf32> to vector<2x1x32xf32>
    %279 = vector.shape_cast %278 : vector<2x1x32xf32> to vector<2x1x32xf32>
    %280 = vector.broadcast %279 : vector<2x1x32xf32> to vector<2x8x32xf32>
    %281 = arith.select %277, %280, %236 : vector<2x8x32xi1>, vector<2x8x32xf32>
    %282 = vector.extract_strided_slice %8 {offsets = [12, 0], sizes = [2, 96], strides = [1, 1]} : vector<16x96xf32> to vector<2x96xf32>
    %cst_49 = arith.constant dense<0.000000e+00> : vector<2x96xf32>
    %283 = tpu.matmul %271, %1, %cst_49 {dimension_numbers = #tpu.dot_dimension_numbers<[1], [0], [0], [1], [0, 0, 1, 1], [], []>} : vector<2x32xf32>, vector<32x96xf32>, vector<2x96xf32> -> vector<2x96xf32>
    %284 = vector.broadcast %2 : vector<1x96xf32> to vector<2x96xf32>
    %285 = arith.addf %283, %284 : vector<2x96xf32>
    %286 = vector.extract_strided_slice %282 {offsets = [0, 0], sizes = [2, 32], strides = [1, 1]} : vector<2x96xf32> to vector<2x32xf32>
    %287 = vector.extract_strided_slice %285 {offsets = [0, 0], sizes = [2, 32], strides = [1, 1]} : vector<2x96xf32> to vector<2x32xf32>
    %288 = arith.addf %286, %287 : vector<2x32xf32>
    %289 = arith.negf %288 : vector<2x32xf32>
    %290 = math.exp %289 : vector<2x32xf32>
    %cst_50 = arith.constant 1.000000e+00 : f32
    %291 = vector.broadcast %cst_50 : f32 to vector<2x32xf32>
    %292 = arith.addf %291, %290 : vector<2x32xf32>
    %293 = arith.divf %291, %292 : vector<2x32xf32>
    %294 = vector.extract_strided_slice %282 {offsets = [0, 32], sizes = [2, 32], strides = [1, 1]} : vector<2x96xf32> to vector<2x32xf32>
    %295 = vector.extract_strided_slice %285 {offsets = [0, 32], sizes = [2, 32], strides = [1, 1]} : vector<2x96xf32> to vector<2x32xf32>
    %296 = arith.addf %294, %295 : vector<2x32xf32>
    %297 = arith.negf %296 : vector<2x32xf32>
    %298 = math.exp %297 : vector<2x32xf32>
    %cst_51 = arith.constant 1.000000e+00 : f32
    %299 = vector.broadcast %cst_51 : f32 to vector<2x32xf32>
    %300 = arith.addf %299, %298 : vector<2x32xf32>
    %301 = arith.divf %299, %300 : vector<2x32xf32>
    %302 = vector.extract_strided_slice %282 {offsets = [0, 64], sizes = [2, 32], strides = [1, 1]} : vector<2x96xf32> to vector<2x32xf32>
    %303 = vector.extract_strided_slice %285 {offsets = [0, 64], sizes = [2, 32], strides = [1, 1]} : vector<2x96xf32> to vector<2x32xf32>
    %304 = arith.mulf %293, %303 : vector<2x32xf32>
    %305 = arith.addf %302, %304 : vector<2x32xf32>
    %306 = math.tanh %305 : vector<2x32xf32>
    %cst_52 = arith.constant 1.000000e+00 : f32
    %307 = vector.broadcast %cst_52 : f32 to vector<2x32xf32>
    %308 = arith.subf %307, %301 : vector<2x32xf32>
    %309 = arith.mulf %308, %306 : vector<2x32xf32>
    %310 = arith.mulf %301, %271 : vector<2x32xf32>
    %311 = arith.addf %309, %310 : vector<2x32xf32>
    %c6_i32 = arith.constant 6 : i32
    %312 = vector.broadcast %c6_i32 : i32 to vector<2x1xi32>
    %313 = arith.cmpi sgt, %0, %312 : vector<2x1xi32>
    %314 = vector.shape_cast %313 : vector<2x1xi1> to vector<2x1xi1>
    %315 = vector.broadcast %314 : vector<2x1xi1> to vector<2x32xi1>
    %316 = arith.select %315, %311, %271 : vector<2x32xi1>, vector<2x32xf32>
    %cst_53 = arith.constant 0.000000e+00 : f32
    %317 = vector.shape_cast %313 : vector<2x1xi1> to vector<2x1xi1>
    %318 = vector.broadcast %317 : vector<2x1xi1> to vector<2x32xi1>
    %319 = vector.broadcast %cst_53 : f32 to vector<2x32xf32>
    %320 = arith.select %318, %311, %319 : vector<2x32xi1>, vector<2x32xf32>
    %c6_i32_54 = arith.constant 6 : i32
    %321 = vector.broadcast %c6_i32_54 : i32 to vector<2x8x32xi32>
    %322 = arith.cmpi eq, %9, %321 : vector<2x8x32xi32>
    %323 = vector.shape_cast %320 : vector<2x32xf32> to vector<2x1x32xf32>
    %324 = vector.shape_cast %323 : vector<2x1x32xf32> to vector<2x1x32xf32>
    %325 = vector.broadcast %324 : vector<2x1x32xf32> to vector<2x8x32xf32>
    %326 = arith.select %322, %325, %281 : vector<2x8x32xi1>, vector<2x8x32xf32>
    %327 = vector.extract_strided_slice %8 {offsets = [14, 0], sizes = [2, 96], strides = [1, 1]} : vector<16x96xf32> to vector<2x96xf32>
    %cst_55 = arith.constant dense<0.000000e+00> : vector<2x96xf32>
    %328 = tpu.matmul %316, %1, %cst_55 {dimension_numbers = #tpu.dot_dimension_numbers<[1], [0], [0], [1], [0, 0, 1, 1], [], []>} : vector<2x32xf32>, vector<32x96xf32>, vector<2x96xf32> -> vector<2x96xf32>
    %329 = vector.broadcast %2 : vector<1x96xf32> to vector<2x96xf32>
    %330 = arith.addf %328, %329 : vector<2x96xf32>
    %331 = vector.extract_strided_slice %327 {offsets = [0, 0], sizes = [2, 32], strides = [1, 1]} : vector<2x96xf32> to vector<2x32xf32>
    %332 = vector.extract_strided_slice %330 {offsets = [0, 0], sizes = [2, 32], strides = [1, 1]} : vector<2x96xf32> to vector<2x32xf32>
    %333 = arith.addf %331, %332 : vector<2x32xf32>
    %334 = arith.negf %333 : vector<2x32xf32>
    %335 = math.exp %334 : vector<2x32xf32>
    %cst_56 = arith.constant 1.000000e+00 : f32
    %336 = vector.broadcast %cst_56 : f32 to vector<2x32xf32>
    %337 = arith.addf %336, %335 : vector<2x32xf32>
    %338 = arith.divf %336, %337 : vector<2x32xf32>
    %339 = vector.extract_strided_slice %327 {offsets = [0, 32], sizes = [2, 32], strides = [1, 1]} : vector<2x96xf32> to vector<2x32xf32>
    %340 = vector.extract_strided_slice %330 {offsets = [0, 32], sizes = [2, 32], strides = [1, 1]} : vector<2x96xf32> to vector<2x32xf32>
    %341 = arith.addf %339, %340 : vector<2x32xf32>
    %342 = arith.negf %341 : vector<2x32xf32>
    %343 = math.exp %342 : vector<2x32xf32>
    %cst_57 = arith.constant 1.000000e+00 : f32
    %344 = vector.broadcast %cst_57 : f32 to vector<2x32xf32>
    %345 = arith.addf %344, %343 : vector<2x32xf32>
    %346 = arith.divf %344, %345 : vector<2x32xf32>
    %347 = vector.extract_strided_slice %327 {offsets = [0, 64], sizes = [2, 32], strides = [1, 1]} : vector<2x96xf32> to vector<2x32xf32>
    %348 = vector.extract_strided_slice %330 {offsets = [0, 64], sizes = [2, 32], strides = [1, 1]} : vector<2x96xf32> to vector<2x32xf32>
    %349 = arith.mulf %338, %348 : vector<2x32xf32>
    %350 = arith.addf %347, %349 : vector<2x32xf32>
    %351 = math.tanh %350 : vector<2x32xf32>
    %cst_58 = arith.constant 1.000000e+00 : f32
    %352 = vector.broadcast %cst_58 : f32 to vector<2x32xf32>
    %353 = arith.subf %352, %346 : vector<2x32xf32>
    %354 = arith.mulf %353, %351 : vector<2x32xf32>
    %355 = arith.mulf %346, %316 : vector<2x32xf32>
    %356 = arith.addf %354, %355 : vector<2x32xf32>
    %c7_i32 = arith.constant 7 : i32
    %357 = vector.broadcast %c7_i32 : i32 to vector<2x1xi32>
    %358 = arith.cmpi sgt, %0, %357 : vector<2x1xi32>
    %359 = vector.shape_cast %358 : vector<2x1xi1> to vector<2x1xi1>
    %360 = vector.broadcast %359 : vector<2x1xi1> to vector<2x32xi1>
    %361 = arith.select %360, %356, %316 : vector<2x32xi1>, vector<2x32xf32>
    %cst_59 = arith.constant 0.000000e+00 : f32
    %362 = vector.shape_cast %358 : vector<2x1xi1> to vector<2x1xi1>
    %363 = vector.broadcast %362 : vector<2x1xi1> to vector<2x32xi1>
    %364 = vector.broadcast %cst_59 : f32 to vector<2x32xf32>
    %365 = arith.select %363, %356, %364 : vector<2x32xi1>, vector<2x32xf32>
    %c7_i32_60 = arith.constant 7 : i32
    %366 = vector.broadcast %c7_i32_60 : i32 to vector<2x8x32xi32>
    %367 = arith.cmpi eq, %9, %366 : vector<2x8x32xi32>
    %368 = vector.shape_cast %365 : vector<2x32xf32> to vector<2x1x32xf32>
    %369 = vector.shape_cast %368 : vector<2x1x32xf32> to vector<2x1x32xf32>
    %370 = vector.broadcast %369 : vector<2x1x32xf32> to vector<2x8x32xf32>
    %371 = arith.select %367, %370, %326 : vector<2x8x32xi1>, vector<2x8x32xf32>
    %c0_61 = arith.constant 0 : index
    %c0_62 = arith.constant 0 : index
    %372 = vector.load %arg6[%c0_61, %c0_62] : memref<32x96xf32, #tpu.memory_space<vmem>>, vector<32x96xf32>
    %c0_63 = arith.constant 0 : index
    %c0_64 = arith.constant 0 : index
    %373 = vector.load %arg7[%c0_63, %c0_64] : memref<32x96xf32, #tpu.memory_space<vmem>>, vector<32x96xf32>
    %c0_65 = arith.constant 0 : index
    %c0_66 = arith.constant 0 : index
    %374 = vector.load %arg8[%c0_65, %c0_66] : memref<1x96xf32, #tpu.memory_space<vmem>>, vector<1x96xf32>
    %c0_67 = arith.constant 0 : index
    %c0_68 = arith.constant 0 : index
    %375 = vector.load %arg9[%c0_67, %c0_68] : memref<1x96xf32, #tpu.memory_space<vmem>>, vector<1x96xf32>
    %c0_69 = arith.constant 0 : index
    %c0_70 = arith.constant 0 : index
    %376 = vector.load %arg10[%c0_69, %c0_70] : memref<32x32xf32, #tpu.memory_space<vmem>>, vector<32x32xf32>
    %c0_71 = arith.constant 0 : index
    %c0_72 = arith.constant 0 : index
    %377 = vector.load %arg11[%c0_71, %c0_72] : memref<32x32xf32, #tpu.memory_space<vmem>>, vector<32x32xf32>
    %c0_73 = arith.constant 0 : index
    %c0_74 = arith.constant 0 : index
    %378 = vector.load %arg12[%c0_73, %c0_74] : memref<1x32xf32, #tpu.memory_space<vmem>>, vector<1x32xf32>
    %c0_75 = arith.constant 0 : index
    %c0_76 = arith.constant 0 : index
    %379 = vector.load %arg13[%c0_75, %c0_76] : memref<32x128xf32, #tpu.memory_space<vmem>>, vector<32x128xf32>
    %c0_77 = arith.constant 0 : index
    %c0_78 = arith.constant 0 : index
    %380 = vector.load %arg14[%c0_77, %c0_78] : memref<1x128xf32, #tpu.memory_space<vmem>>, vector<1x128xf32>
    %381 = tpu.iota {dimensions = array<i32: 1>} : vector<2x32xi32>
    %382 = tpu.iota {dimensions = array<i32: 1>} : vector<2x128xi32>
    %383 = tpu.iota {dimensions = array<i32: 1>} : vector<2x8xi32>
    %c1_i32_79 = arith.constant 1 : i32
    %384 = vector.broadcast %c1_i32_79 : i32 to vector<2x1xi32>
    %c0_i32_80 = arith.constant 0 : i32
    %385 = vector.broadcast %c0_i32_80 : i32 to vector<2x8xi32>
    %386 = vector.broadcast %384 : vector<2x1xi32> to vector<2x32xi32>
    %387 = arith.cmpi eq, %386, %381 : vector<2x32xi32>
    %388 = arith.extui %387 : vector<2x32xi1> to vector<2x32xi32>
    %389 = arith.sitofp %388 : vector<2x32xi32> to vector<2x32xf32>
    %cst_81 = arith.constant dense<0.000000e+00> : vector<2x96xf32>
    %390 = tpu.matmul %389, %372, %cst_81 {dimension_numbers = #tpu.dot_dimension_numbers<[1], [0], [0], [1], [0, 0, 1, 1], [], []>} : vector<2x32xf32>, vector<32x96xf32>, vector<2x96xf32> -> vector<2x96xf32>
    %391 = vector.broadcast %374 : vector<1x96xf32> to vector<2x96xf32>
    %392 = arith.addf %390, %391 : vector<2x96xf32>
    %cst_82 = arith.constant dense<0.000000e+00> : vector<2x96xf32>
    %393 = tpu.matmul %361, %373, %cst_82 {dimension_numbers = #tpu.dot_dimension_numbers<[1], [0], [0], [1], [0, 0, 1, 1], [], []>} : vector<2x32xf32>, vector<32x96xf32>, vector<2x96xf32> -> vector<2x96xf32>
    %394 = vector.broadcast %375 : vector<1x96xf32> to vector<2x96xf32>
    %395 = arith.addf %393, %394 : vector<2x96xf32>
    %396 = vector.extract_strided_slice %392 {offsets = [0, 0], sizes = [2, 32], strides = [1, 1]} : vector<2x96xf32> to vector<2x32xf32>
    %397 = vector.extract_strided_slice %395 {offsets = [0, 0], sizes = [2, 32], strides = [1, 1]} : vector<2x96xf32> to vector<2x32xf32>
    %398 = arith.addf %396, %397 : vector<2x32xf32>
    %399 = arith.negf %398 : vector<2x32xf32>
    %400 = math.exp %399 : vector<2x32xf32>
    %cst_83 = arith.constant 1.000000e+00 : f32
    %401 = vector.broadcast %cst_83 : f32 to vector<2x32xf32>
    %402 = arith.addf %401, %400 : vector<2x32xf32>
    %403 = arith.divf %401, %402 : vector<2x32xf32>
    %404 = vector.extract_strided_slice %392 {offsets = [0, 32], sizes = [2, 32], strides = [1, 1]} : vector<2x96xf32> to vector<2x32xf32>
    %405 = vector.extract_strided_slice %395 {offsets = [0, 32], sizes = [2, 32], strides = [1, 1]} : vector<2x96xf32> to vector<2x32xf32>
    %406 = arith.addf %404, %405 : vector<2x32xf32>
    %407 = arith.negf %406 : vector<2x32xf32>
    %408 = math.exp %407 : vector<2x32xf32>
    %cst_84 = arith.constant 1.000000e+00 : f32
    %409 = vector.broadcast %cst_84 : f32 to vector<2x32xf32>
    %410 = arith.addf %409, %408 : vector<2x32xf32>
    %411 = arith.divf %409, %410 : vector<2x32xf32>
    %412 = vector.extract_strided_slice %392 {offsets = [0, 64], sizes = [2, 32], strides = [1, 1]} : vector<2x96xf32> to vector<2x32xf32>
    %413 = vector.extract_strided_slice %395 {offsets = [0, 64], sizes = [2, 32], strides = [1, 1]} : vector<2x96xf32> to vector<2x32xf32>
    %414 = arith.mulf %403, %413 : vector<2x32xf32>
    %415 = arith.addf %412, %414 : vector<2x32xf32>
    %416 = math.tanh %415 : vector<2x32xf32>
    %cst_85 = arith.constant 1.000000e+00 : f32
    %417 = vector.broadcast %cst_85 : f32 to vector<2x32xf32>
    %418 = arith.subf %417, %411 : vector<2x32xf32>
    %419 = arith.mulf %418, %416 : vector<2x32xf32>
    %420 = arith.mulf %411, %361 : vector<2x32xf32>
    %421 = arith.addf %419, %420 : vector<2x32xf32>
    %422 = vector.shape_cast %421 : vector<2x32xf32> to vector<2x1x32xf32>
    %423 = vector.broadcast %422 : vector<2x1x32xf32> to vector<2x8x32xf32>
    %424 = arith.mulf %371, %423 : vector<2x8x32xf32>
    %cst_86 = arith.constant dense<0.000000e+00> : vector<2x8xf32>
    %425 = vector.multi_reduction <add>, %424, %cst_86 [2] : vector<2x8x32xf32> to vector<2x8xf32>
    %cst_87 = arith.constant dense<0xFF800000> : vector<2xf32>
    %426 = vector.multi_reduction <maximumf>, %425, %cst_87 [1] : vector<2x8xf32> to vector<2xf32>
    %427 = vector.shape_cast %426 : vector<2xf32> to vector<2x1xf32>
    %428 = vector.broadcast %427 : vector<2x1xf32> to vector<2x8xf32>
    %429 = arith.subf %425, %428 : vector<2x8xf32>
    %430 = math.exp %429 : vector<2x8xf32>
    %cst_88 = arith.constant dense<0.000000e+00> : vector<2xf32>
    %431 = vector.multi_reduction <add>, %430, %cst_88 [1] : vector<2x8xf32> to vector<2xf32>
    %432 = vector.shape_cast %431 : vector<2xf32> to vector<2x1xf32>
    %433 = tpu.reciprocal %432 {approx = true} : vector<2x1xf32> -> vector<2x1xf32>
    %434 = vector.broadcast %433 : vector<2x1xf32> to vector<2x8xf32>
    %435 = arith.mulf %430, %434 : vector<2x8xf32>
    %436 = vector.shape_cast %435 : vector<2x8xf32> to vector<2x8x1xf32>
    %437 = vector.broadcast %436 : vector<2x8x1xf32> to vector<2x8x32xf32>
    %438 = arith.mulf %437, %371 : vector<2x8x32xf32>
    %cst_89 = arith.constant dense<0.000000e+00> : vector<2x32xf32>
    %439 = vector.multi_reduction <add>, %438, %cst_89 [1] : vector<2x8x32xf32> to vector<2x32xf32>
    %cst_90 = arith.constant dense<0.000000e+00> : vector<2x32xf32>
    %440 = tpu.matmul %439, %376, %cst_90 {dimension_numbers = #tpu.dot_dimension_numbers<[1], [0], [0], [1], [0, 0, 1, 1], [], []>} : vector<2x32xf32>, vector<32x32xf32>, vector<2x32xf32> -> vector<2x32xf32>
    %cst_91 = arith.constant dense<0.000000e+00> : vector<2x32xf32>
    %441 = tpu.matmul %421, %377, %cst_91 {dimension_numbers = #tpu.dot_dimension_numbers<[1], [0], [0], [1], [0, 0, 1, 1], [], []>} : vector<2x32xf32>, vector<32x32xf32>, vector<2x32xf32> -> vector<2x32xf32>
    %442 = arith.addf %440, %441 : vector<2x32xf32>
    %443 = vector.broadcast %378 : vector<1x32xf32> to vector<2x32xf32>
    %444 = arith.addf %442, %443 : vector<2x32xf32>
    %445 = math.tanh %444 : vector<2x32xf32>
    %cst_92 = arith.constant dense<0.000000e+00> : vector<2x128xf32>
    %446 = tpu.matmul %445, %379, %cst_92 {dimension_numbers = #tpu.dot_dimension_numbers<[1], [0], [0], [1], [0, 0, 1, 1], [], []>} : vector<2x32xf32>, vector<32x128xf32>, vector<2x128xf32> -> vector<2x128xf32>
    %447 = vector.broadcast %380 : vector<1x128xf32> to vector<2x128xf32>
    %448 = arith.addf %446, %447 : vector<2x128xf32>
    %cst_93 = arith.constant dense<0xFF800000> : vector<2xf32>
    %449 = vector.multi_reduction <maximumf>, %448, %cst_93 [1] : vector<2x128xf32> to vector<2xf32>
    %450 = vector.shape_cast %449 : vector<2xf32> to vector<2x1xf32>
    %451 = vector.broadcast %450 : vector<2x1xf32> to vector<2x128xf32>
    %452 = arith.subf %448, %451 : vector<2x128xf32>
    %453 = math.exp %452 : vector<2x128xf32>
    %cst_94 = arith.constant dense<0.000000e+00> : vector<2xf32>
    %454 = vector.multi_reduction <add>, %453, %cst_94 [1] : vector<2x128xf32> to vector<2xf32>
    %455 = vector.shape_cast %454 : vector<2xf32> to vector<2x1xf32>
    %456 = math.log %455 : vector<2x1xf32>
    %457 = arith.addf %456, %450 : vector<2x1xf32>
    %458 = vector.broadcast %457 : vector<2x1xf32> to vector<2x128xf32>
    %459 = arith.subf %448, %458 : vector<2x128xf32>
    %c0_95 = arith.constant 0 : index
    %c0_96 = arith.constant 0 : index
    %c0_97 = arith.constant 0 : index
    %460 = vector.load %arg15[%c0_95, %c0_96, %c0_97] : memref<8x2x128xf32, #tpu.memory_space<vmem>>, vector<1x2x128xf32>
    %461 = vector.shape_cast %460 : vector<1x2x128xf32> to vector<2x128xf32>
    %462 = vector.shape_cast %459 : vector<2x128xf32> to vector<1x2x128xf32>
    tpu.vector_store %arg15[%c0_95, %c0_96, %c0_97], %462 {strides = array<i32>} : memref<8x2x128xf32, #tpu.memory_space<vmem>>, vector<1x2x128xf32>,
    %cst_98 = arith.constant dense<0xFF800000> : vector<2xf32>
    %463 = vector.multi_reduction <maximumf>, %459, %cst_98 [1] : vector<2x128xf32> to vector<2xf32>
    %464 = vector.shape_cast %463 : vector<2xf32> to vector<2x1xf32>
    %465 = vector.broadcast %464 : vector<2x1xf32> to vector<2x128xf32>
    %466 = arith.cmpf oge, %459, %465 : vector<2x128xf32>
    %c128_i32 = arith.constant 128 : i32
    %467 = vector.broadcast %c128_i32 : i32 to vector<2x128xi32>
    %468 = arith.select %466, %382, %467 : vector<2x128xi1>, vector<2x128xi32>
    %cst_99 = arith.constant dense<2147483647> : vector<2xi32>
    %469 = vector.multi_reduction <minsi>, %468, %cst_99 [1] : vector<2x128xi32> to vector<2xi32>
    %470 = vector.shape_cast %469 : vector<2xi32> to vector<2x1xi32>
    %c0_i32_100 = arith.constant 0 : i32
    %471 = vector.broadcast %c0_i32_100 : i32 to vector<2x8xi32>
    %472 = arith.cmpi eq, %383, %471 : vector<2x8xi32>
    %473 = vector.shape_cast %470 : vector<2x1xi32> to vector<2x1xi32>
    %474 = vector.broadcast %473 : vector<2x1xi32> to vector<2x8xi32>
    %475 = arith.select %472, %474, %385 : vector<2x8xi1>, vector<2x8xi32>
    %476 = vector.broadcast %470 : vector<2x1xi32> to vector<2x32xi32>
    %477 = arith.cmpi eq, %476, %381 : vector<2x32xi32>
    %478 = arith.extui %477 : vector<2x32xi1> to vector<2x32xi32>
    %479 = arith.sitofp %478 : vector<2x32xi32> to vector<2x32xf32>
    %cst_101 = arith.constant dense<0.000000e+00> : vector<2x96xf32>
    %480 = tpu.matmul %479, %372, %cst_101 {dimension_numbers = #tpu.dot_dimension_numbers<[1], [0], [0], [1], [0, 0, 1, 1], [], []>} : vector<2x32xf32>, vector<32x96xf32>, vector<2x96xf32> -> vector<2x96xf32>
    %481 = vector.broadcast %374 : vector<1x96xf32> to vector<2x96xf32>
    %482 = arith.addf %480, %481 : vector<2x96xf32>
    %cst_102 = arith.constant dense<0.000000e+00> : vector<2x96xf32>
    %483 = tpu.matmul %421, %373, %cst_102 {dimension_numbers = #tpu.dot_dimension_numbers<[1], [0], [0], [1], [0, 0, 1, 1], [], []>} : vector<2x32xf32>, vector<32x96xf32>, vector<2x96xf32> -> vector<2x96xf32>
    %484 = vector.broadcast %375 : vector<1x96xf32> to vector<2x96xf32>
    %485 = arith.addf %483, %484 : vector<2x96xf32>
    %486 = vector.extract_strided_slice %482 {offsets = [0, 0], sizes = [2, 32], strides = [1, 1]} : vector<2x96xf32> to vector<2x32xf32>
    %487 = vector.extract_strided_slice %485 {offsets = [0, 0], sizes = [2, 32], strides = [1, 1]} : vector<2x96xf32> to vector<2x32xf32>
    %488 = arith.addf %486, %487 : vector<2x32xf32>
    %489 = arith.negf %488 : vector<2x32xf32>
    %490 = math.exp %489 : vector<2x32xf32>
    %cst_103 = arith.constant 1.000000e+00 : f32
    %491 = vector.broadcast %cst_103 : f32 to vector<2x32xf32>
    %492 = arith.addf %491, %490 : vector<2x32xf32>
    %493 = arith.divf %491, %492 : vector<2x32xf32>
    %494 = vector.extract_strided_slice %482 {offsets = [0, 32], sizes = [2, 32], strides = [1, 1]} : vector<2x96xf32> to vector<2x32xf32>
    %495 = vector.extract_strided_slice %485 {offsets = [0, 32], sizes = [2, 32], strides = [1, 1]} : vector<2x96xf32> to vector<2x32xf32>
    %496 = arith.addf %494, %495 : vector<2x32xf32>
    %497 = arith.negf %496 : vector<2x32xf32>
    %498 = math.exp %497 : vector<2x32xf32>
    %cst_104 = arith.constant 1.000000e+00 : f32
    %499 = vector.broadcast %cst_104 : f32 to vector<2x32xf32>
    %500 = arith.addf %499, %498 : vector<2x32xf32>
    %501 = arith.divf %499, %500 : vector<2x32xf32>
    %502 = vector.extract_strided_slice %482 {offsets = [0, 64], sizes = [2, 32], strides = [1, 1]} : vector<2x96xf32> to vector<2x32xf32>
    %503 = vector.extract_strided_slice %485 {offsets = [0, 64], sizes = [2, 32], strides = [1, 1]} : vector<2x96xf32> to vector<2x32xf32>
    %504 = arith.mulf %493, %503 : vector<2x32xf32>
    %505 = arith.addf %502, %504 : vector<2x32xf32>
    %506 = math.tanh %505 : vector<2x32xf32>
    %cst_105 = arith.constant 1.000000e+00 : f32
    %507 = vector.broadcast %cst_105 : f32 to vector<2x32xf32>
    %508 = arith.subf %507, %501 : vector<2x32xf32>
    %509 = arith.mulf %508, %506 : vector<2x32xf32>
    %510 = arith.mulf %501, %421 : vector<2x32xf32>
    %511 = arith.addf %509, %510 : vector<2x32xf32>
    %512 = vector.shape_cast %511 : vector<2x32xf32> to vector<2x1x32xf32>
    %513 = vector.broadcast %512 : vector<2x1x32xf32> to vector<2x8x32xf32>
    %514 = arith.mulf %371, %513 : vector<2x8x32xf32>
    %cst_106 = arith.constant dense<0.000000e+00> : vector<2x8xf32>
    %515 = vector.multi_reduction <add>, %514, %cst_106 [2] : vector<2x8x32xf32> to vector<2x8xf32>
    %cst_107 = arith.constant dense<0xFF800000> : vector<2xf32>
    %516 = vector.multi_reduction <maximumf>, %515, %cst_107 [1] : vector<2x8xf32> to vector<2xf32>
    %517 = vector.shape_cast %516 : vector<2xf32> to vector<2x1xf32>
    %518 = vector.broadcast %517 : vector<2x1xf32> to vector<2x8xf32>
    %519 = arith.subf %515, %518 : vector<2x8xf32>
    %520 = math.exp %519 : vector<2x8xf32>
    %cst_108 = arith.constant dense<0.000000e+00> : vector<2xf32>
    %521 = vector.multi_reduction <add>, %520, %cst_108 [1] : vector<2x8xf32> to vector<2xf32>
    %522 = vector.shape_cast %521 : vector<2xf32> to vector<2x1xf32>
    %523 = tpu.reciprocal %522 {approx = true} : vector<2x1xf32> -> vector<2x1xf32>
    %524 = vector.broadcast %523 : vector<2x1xf32> to vector<2x8xf32>
    %525 = arith.mulf %520, %524 : vector<2x8xf32>
    %526 = vector.shape_cast %525 : vector<2x8xf32> to vector<2x8x1xf32>
    %527 = vector.broadcast %526 : vector<2x8x1xf32> to vector<2x8x32xf32>
    %528 = arith.mulf %527, %371 : vector<2x8x32xf32>
    %cst_109 = arith.constant dense<0.000000e+00> : vector<2x32xf32>
    %529 = vector.multi_reduction <add>, %528, %cst_109 [1] : vector<2x8x32xf32> to vector<2x32xf32>
    %cst_110 = arith.constant dense<0.000000e+00> : vector<2x32xf32>
    %530 = tpu.matmul %529, %376, %cst_110 {dimension_numbers = #tpu.dot_dimension_numbers<[1], [0], [0], [1], [0, 0, 1, 1], [], []>} : vector<2x32xf32>, vector<32x32xf32>, vector<2x32xf32> -> vector<2x32xf32>
    %cst_111 = arith.constant dense<0.000000e+00> : vector<2x32xf32>
    %531 = tpu.matmul %511, %377, %cst_111 {dimension_numbers = #tpu.dot_dimension_numbers<[1], [0], [0], [1], [0, 0, 1, 1], [], []>} : vector<2x32xf32>, vector<32x32xf32>, vector<2x32xf32> -> vector<2x32xf32>
    %532 = arith.addf %530, %531 : vector<2x32xf32>
    %533 = vector.broadcast %378 : vector<1x32xf32> to vector<2x32xf32>
    %534 = arith.addf %532, %533 : vector<2x32xf32>
    %535 = math.tanh %534 : vector<2x32xf32>
    %cst_112 = arith.constant dense<0.000000e+00> : vector<2x128xf32>
    %536 = tpu.matmul %535, %379, %cst_112 {dimension_numbers = #tpu.dot_dimension_numbers<[1], [0], [0], [1], [0, 0, 1, 1], [], []>} : vector<2x32xf32>, vector<32x128xf32>, vector<2x128xf32> -> vector<2x128xf32>
    %537 = vector.broadcast %380 : vector<1x128xf32> to vector<2x128xf32>
    %538 = arith.addf %536, %537 : vector<2x128xf32>
    %cst_113 = arith.constant dense<0xFF800000> : vector<2xf32>
    %539 = vector.multi_reduction <maximumf>, %538, %cst_113 [1] : vector<2x128xf32> to vector<2xf32>
    %540 = vector.shape_cast %539 : vector<2xf32> to vector<2x1xf32>
    %541 = vector.broadcast %540 : vector<2x1xf32> to vector<2x128xf32>
    %542 = arith.subf %538, %541 : vector<2x128xf32>
    %543 = math.exp %542 : vector<2x128xf32>
    %cst_114 = arith.constant dense<0.000000e+00> : vector<2xf32>
    %544 = vector.multi_reduction <add>, %543, %cst_114 [1] : vector<2x128xf32> to vector<2xf32>
    %545 = vector.shape_cast %544 : vector<2xf32> to vector<2x1xf32>
    %546 = math.log %545 : vector<2x1xf32>
    %547 = arith.addf %546, %540 : vector<2x1xf32>
    %548 = vector.broadcast %547 : vector<2x1xf32> to vector<2x128xf32>
    %549 = arith.subf %538, %548 : vector<2x128xf32>
    %c1 = arith.constant 1 : index
    %c0_115 = arith.constant 0 : index
    %c0_116 = arith.constant 0 : index
    %550 = vector.load %arg15[%c1, %c0_115, %c0_116] : memref<8x2x128xf32, #tpu.memory_space<vmem>>, vector<1x2x128xf32>
    %551 = vector.shape_cast %550 : vector<1x2x128xf32> to vector<2x128xf32>
    %552 = vector.shape_cast %549 : vector<2x128xf32> to vector<1x2x128xf32>
    tpu.vector_store %arg15[%c1, %c0_115, %c0_116], %552 {strides = array<i32>} : memref<8x2x128xf32, #tpu.memory_space<vmem>>, vector<1x2x128xf32>,
    %cst_117 = arith.constant dense<0xFF800000> : vector<2xf32>
    %553 = vector.multi_reduction <maximumf>, %549, %cst_117 [1] : vector<2x128xf32> to vector<2xf32>
    %554 = vector.shape_cast %553 : vector<2xf32> to vector<2x1xf32>
    %555 = vector.broadcast %554 : vector<2x1xf32> to vector<2x128xf32>
    %556 = arith.cmpf oge, %549, %555 : vector<2x128xf32>
    %c128_i32_118 = arith.constant 128 : i32
    %557 = vector.broadcast %c128_i32_118 : i32 to vector<2x128xi32>
    %558 = arith.select %556, %382, %557 : vector<2x128xi1>, vector<2x128xi32>
    %cst_119 = arith.constant dense<2147483647> : vector<2xi32>
    %559 = vector.multi_reduction <minsi>, %558, %cst_119 [1] : vector<2x128xi32> to vector<2xi32>
    %560 = vector.shape_cast %559 : vector<2xi32> to vector<2x1xi32>
    %c1_i32_120 = arith.constant 1 : i32
    %561 = vector.broadcast %c1_i32_120 : i32 to vector<2x8xi32>
    %562 = arith.cmpi eq, %383, %561 : vector<2x8xi32>
    %563 = vector.shape_cast %560 : vector<2x1xi32> to vector<2x1xi32>
    %564 = vector.broadcast %563 : vector<2x1xi32> to vector<2x8xi32>
    %565 = arith.select %562, %564, %475 : vector<2x8xi1>, vector<2x8xi32>
    %566 = vector.broadcast %560 : vector<2x1xi32> to vector<2x32xi32>
    %567 = arith.cmpi eq, %566, %381 : vector<2x32xi32>
    %568 = arith.extui %567 : vector<2x32xi1> to vector<2x32xi32>
    %569 = arith.sitofp %568 : vector<2x32xi32> to vector<2x32xf32>
    %cst_121 = arith.constant dense<0.000000e+00> : vector<2x96xf32>
    %570 = tpu.matmul %569, %372, %cst_121 {dimension_numbers = #tpu.dot_dimension_numbers<[1], [0], [0], [1], [0, 0, 1, 1], [], []>} : vector<2x32xf32>, vector<32x96xf32>, vector<2x96xf32> -> vector<2x96xf32>
    %571 = vector.broadcast %374 : vector<1x96xf32> to vector<2x96xf32>
    %572 = arith.addf %570, %571 : vector<2x96xf32>
    %cst_122 = arith.constant dense<0.000000e+00> : vector<2x96xf32>
    %573 = tpu.matmul %511, %373, %cst_122 {dimension_numbers = #tpu.dot_dimension_numbers<[1], [0], [0], [1], [0, 0, 1, 1], [], []>} : vector<2x32xf32>, vector<32x96xf32>, vector<2x96xf32> -> vector<2x96xf32>
    %574 = vector.broadcast %375 : vector<1x96xf32> to vector<2x96xf32>
    %575 = arith.addf %573, %574 : vector<2x96xf32>
    %576 = vector.extract_strided_slice %572 {offsets = [0, 0], sizes = [2, 32], strides = [1, 1]} : vector<2x96xf32> to vector<2x32xf32>
    %577 = vector.extract_strided_slice %575 {offsets = [0, 0], sizes = [2, 32], strides = [1, 1]} : vector<2x96xf32> to vector<2x32xf32>
    %578 = arith.addf %576, %577 : vector<2x32xf32>
    %579 = arith.negf %578 : vector<2x32xf32>
    %580 = math.exp %579 : vector<2x32xf32>
    %cst_123 = arith.constant 1.000000e+00 : f32
    %581 = vector.broadcast %cst_123 : f32 to vector<2x32xf32>
    %582 = arith.addf %581, %580 : vector<2x32xf32>
    %583 = arith.divf %581, %582 : vector<2x32xf32>
    %584 = vector.extract_strided_slice %572 {offsets = [0, 32], sizes = [2, 32], strides = [1, 1]} : vector<2x96xf32> to vector<2x32xf32>
    %585 = vector.extract_strided_slice %575 {offsets = [0, 32], sizes = [2, 32], strides = [1, 1]} : vector<2x96xf32> to vector<2x32xf32>
    %586 = arith.addf %584, %585 : vector<2x32xf32>
    %587 = arith.negf %586 : vector<2x32xf32>
    %588 = math.exp %587 : vector<2x32xf32>
    %cst_124 = arith.constant 1.000000e+00 : f32
    %589 = vector.broadcast %cst_124 : f32 to vector<2x32xf32>
    %590 = arith.addf %589, %588 : vector<2x32xf32>
    %591 = arith.divf %589, %590 : vector<2x32xf32>
    %592 = vector.extract_strided_slice %572 {offsets = [0, 64], sizes = [2, 32], strides = [1, 1]} : vector<2x96xf32> to vector<2x32xf32>
    %593 = vector.extract_strided_slice %575 {offsets = [0, 64], sizes = [2, 32], strides = [1, 1]} : vector<2x96xf32> to vector<2x32xf32>
    %594 = arith.mulf %583, %593 : vector<2x32xf32>
    %595 = arith.addf %592, %594 : vector<2x32xf32>
    %596 = math.tanh %595 : vector<2x32xf32>
    %cst_125 = arith.constant 1.000000e+00 : f32
    %597 = vector.broadcast %cst_125 : f32 to vector<2x32xf32>
    %598 = arith.subf %597, %591 : vector<2x32xf32>
    %599 = arith.mulf %598, %596 : vector<2x32xf32>
    %600 = arith.mulf %591, %511 : vector<2x32xf32>
    %601 = arith.addf %599, %600 : vector<2x32xf32>
    %602 = vector.shape_cast %601 : vector<2x32xf32> to vector<2x1x32xf32>
    %603 = vector.broadcast %602 : vector<2x1x32xf32> to vector<2x8x32xf32>
    %604 = arith.mulf %371, %603 : vector<2x8x32xf32>
    %cst_126 = arith.constant dense<0.000000e+00> : vector<2x8xf32>
    %605 = vector.multi_reduction <add>, %604, %cst_126 [2] : vector<2x8x32xf32> to vector<2x8xf32>
    %cst_127 = arith.constant dense<0xFF800000> : vector<2xf32>
    %606 = vector.multi_reduction <maximumf>, %605, %cst_127 [1] : vector<2x8xf32> to vector<2xf32>
    %607 = vector.shape_cast %606 : vector<2xf32> to vector<2x1xf32>
    %608 = vector.broadcast %607 : vector<2x1xf32> to vector<2x8xf32>
    %609 = arith.subf %605, %608 : vector<2x8xf32>
    %610 = math.exp %609 : vector<2x8xf32>
    %cst_128 = arith.constant dense<0.000000e+00> : vector<2xf32>
    %611 = vector.multi_reduction <add>, %610, %cst_128 [1] : vector<2x8xf32> to vector<2xf32>
    %612 = vector.shape_cast %611 : vector<2xf32> to vector<2x1xf32>
    %613 = tpu.reciprocal %612 {approx = true} : vector<2x1xf32> -> vector<2x1xf32>
    %614 = vector.broadcast %613 : vector<2x1xf32> to vector<2x8xf32>
    %615 = arith.mulf %610, %614 : vector<2x8xf32>
    %616 = vector.shape_cast %615 : vector<2x8xf32> to vector<2x8x1xf32>
    %617 = vector.broadcast %616 : vector<2x8x1xf32> to vector<2x8x32xf32>
    %618 = arith.mulf %617, %371 : vector<2x8x32xf32>
    %cst_129 = arith.constant dense<0.000000e+00> : vector<2x32xf32>
    %619 = vector.multi_reduction <add>, %618, %cst_129 [1] : vector<2x8x32xf32> to vector<2x32xf32>
    %cst_130 = arith.constant dense<0.000000e+00> : vector<2x32xf32>
    %620 = tpu.matmul %619, %376, %cst_130 {dimension_numbers = #tpu.dot_dimension_numbers<[1], [0], [0], [1], [0, 0, 1, 1], [], []>} : vector<2x32xf32>, vector<32x32xf32>, vector<2x32xf32> -> vector<2x32xf32>
    %cst_131 = arith.constant dense<0.000000e+00> : vector<2x32xf32>
    %621 = tpu.matmul %601, %377, %cst_131 {dimension_numbers = #tpu.dot_dimension_numbers<[1], [0], [0], [1], [0, 0, 1, 1], [], []>} : vector<2x32xf32>, vector<32x32xf32>, vector<2x32xf32> -> vector<2x32xf32>
    %622 = arith.addf %620, %621 : vector<2x32xf32>
    %623 = vector.broadcast %378 : vector<1x32xf32> to vector<2x32xf32>
    %624 = arith.addf %622, %623 : vector<2x32xf32>
    %625 = math.tanh %624 : vector<2x32xf32>
    %cst_132 = arith.constant dense<0.000000e+00> : vector<2x128xf32>
    %626 = tpu.matmul %625, %379, %cst_132 {dimension_numbers = #tpu.dot_dimension_numbers<[1], [0], [0], [1], [0, 0, 1, 1], [], []>} : vector<2x32xf32>, vector<32x128xf32>, vector<2x128xf32> -> vector<2x128xf32>
    %627 = vector.broadcast %380 : vector<1x128xf32> to vector<2x128xf32>
    %628 = arith.addf %626, %627 : vector<2x128xf32>
    %cst_133 = arith.constant dense<0xFF800000> : vector<2xf32>
    %629 = vector.multi_reduction <maximumf>, %628, %cst_133 [1] : vector<2x128xf32> to vector<2xf32>
    %630 = vector.shape_cast %629 : vector<2xf32> to vector<2x1xf32>
    %631 = vector.broadcast %630 : vector<2x1xf32> to vector<2x128xf32>
    %632 = arith.subf %628, %631 : vector<2x128xf32>
    %633 = math.exp %632 : vector<2x128xf32>
    %cst_134 = arith.constant dense<0.000000e+00> : vector<2xf32>
    %634 = vector.multi_reduction <add>, %633, %cst_134 [1] : vector<2x128xf32> to vector<2xf32>
    %635 = vector.shape_cast %634 : vector<2xf32> to vector<2x1xf32>
    %636 = math.log %635 : vector<2x1xf32>
    %637 = arith.addf %636, %630 : vector<2x1xf32>
    %638 = vector.broadcast %637 : vector<2x1xf32> to vector<2x128xf32>
    %639 = arith.subf %628, %638 : vector<2x128xf32>
    %c2 = arith.constant 2 : index
    %c0_135 = arith.constant 0 : index
    %c0_136 = arith.constant 0 : index
    %640 = vector.load %arg15[%c2, %c0_135, %c0_136] : memref<8x2x128xf32, #tpu.memory_space<vmem>>, vector<1x2x128xf32>
    %641 = vector.shape_cast %640 : vector<1x2x128xf32> to vector<2x128xf32>
    %642 = vector.shape_cast %639 : vector<2x128xf32> to vector<1x2x128xf32>
    tpu.vector_store %arg15[%c2, %c0_135, %c0_136], %642 {strides = array<i32>} : memref<8x2x128xf32, #tpu.memory_space<vmem>>, vector<1x2x128xf32>,
    %cst_137 = arith.constant dense<0xFF800000> : vector<2xf32>
    %643 = vector.multi_reduction <maximumf>, %639, %cst_137 [1] : vector<2x128xf32> to vector<2xf32>
    %644 = vector.shape_cast %643 : vector<2xf32> to vector<2x1xf32>
    %645 = vector.broadcast %644 : vector<2x1xf32> to vector<2x128xf32>
    %646 = arith.cmpf oge, %639, %645 : vector<2x128xf32>
    %c128_i32_138 = arith.constant 128 : i32
    %647 = vector.broadcast %c128_i32_138 : i32 to vector<2x128xi32>
    %648 = arith.select %646, %382, %647 : vector<2x128xi1>, vector<2x128xi32>
    %cst_139 = arith.constant dense<2147483647> : vector<2xi32>
    %649 = vector.multi_reduction <minsi>, %648, %cst_139 [1] : vector<2x128xi32> to vector<2xi32>
    %650 = vector.shape_cast %649 : vector<2xi32> to vector<2x1xi32>
    %c2_i32_140 = arith.constant 2 : i32
    %651 = vector.broadcast %c2_i32_140 : i32 to vector<2x8xi32>
    %652 = arith.cmpi eq, %383, %651 : vector<2x8xi32>
    %653 = vector.shape_cast %650 : vector<2x1xi32> to vector<2x1xi32>
    %654 = vector.broadcast %653 : vector<2x1xi32> to vector<2x8xi32>
    %655 = arith.select %652, %654, %565 : vector<2x8xi1>, vector<2x8xi32>
    %656 = vector.broadcast %650 : vector<2x1xi32> to vector<2x32xi32>
    %657 = arith.cmpi eq, %656, %381 : vector<2x32xi32>
    %658 = arith.extui %657 : vector<2x32xi1> to vector<2x32xi32>
    %659 = arith.sitofp %658 : vector<2x32xi32> to vector<2x32xf32>
    %cst_141 = arith.constant dense<0.000000e+00> : vector<2x96xf32>
    %660 = tpu.matmul %659, %372, %cst_141 {dimension_numbers = #tpu.dot_dimension_numbers<[1], [0], [0], [1], [0, 0, 1, 1], [], []>} : vector<2x32xf32>, vector<32x96xf32>, vector<2x96xf32> -> vector<2x96xf32>
    %661 = vector.broadcast %374 : vector<1x96xf32> to vector<2x96xf32>
    %662 = arith.addf %660, %661 : vector<2x96xf32>
    %cst_142 = arith.constant dense<0.000000e+00> : vector<2x96xf32>
    %663 = tpu.matmul %601, %373, %cst_142 {dimension_numbers = #tpu.dot_dimension_numbers<[1], [0], [0], [1], [0, 0, 1, 1], [], []>} : vector<2x32xf32>, vector<32x96xf32>, vector<2x96xf32> -> vector<2x96xf32>
    %664 = vector.broadcast %375 : vector<1x96xf32> to vector<2x96xf32>
    %665 = arith.addf %663, %664 : vector<2x96xf32>
    %666 = vector.extract_strided_slice %662 {offsets = [0, 0], sizes = [2, 32], strides = [1, 1]} : vector<2x96xf32> to vector<2x32xf32>
    %667 = vector.extract_strided_slice %665 {offsets = [0, 0], sizes = [2, 32], strides = [1, 1]} : vector<2x96xf32> to vector<2x32xf32>
    %668 = arith.addf %666, %667 : vector<2x32xf32>
    %669 = arith.negf %668 : vector<2x32xf32>
    %670 = math.exp %669 : vector<2x32xf32>
    %cst_143 = arith.constant 1.000000e+00 : f32
    %671 = vector.broadcast %cst_143 : f32 to vector<2x32xf32>
    %672 = arith.addf %671, %670 : vector<2x32xf32>
    %673 = arith.divf %671, %672 : vector<2x32xf32>
    %674 = vector.extract_strided_slice %662 {offsets = [0, 32], sizes = [2, 32], strides = [1, 1]} : vector<2x96xf32> to vector<2x32xf32>
    %675 = vector.extract_strided_slice %665 {offsets = [0, 32], sizes = [2, 32], strides = [1, 1]} : vector<2x96xf32> to vector<2x32xf32>
    %676 = arith.addf %674, %675 : vector<2x32xf32>
    %677 = arith.negf %676 : vector<2x32xf32>
    %678 = math.exp %677 : vector<2x32xf32>
    %cst_144 = arith.constant 1.000000e+00 : f32
    %679 = vector.broadcast %cst_144 : f32 to vector<2x32xf32>
    %680 = arith.addf %679, %678 : vector<2x32xf32>
    %681 = arith.divf %679, %680 : vector<2x32xf32>
    %682 = vector.extract_strided_slice %662 {offsets = [0, 64], sizes = [2, 32], strides = [1, 1]} : vector<2x96xf32> to vector<2x32xf32>
    %683 = vector.extract_strided_slice %665 {offsets = [0, 64], sizes = [2, 32], strides = [1, 1]} : vector<2x96xf32> to vector<2x32xf32>
    %684 = arith.mulf %673, %683 : vector<2x32xf32>
    %685 = arith.addf %682, %684 : vector<2x32xf32>
    %686 = math.tanh %685 : vector<2x32xf32>
    %cst_145 = arith.constant 1.000000e+00 : f32
    %687 = vector.broadcast %cst_145 : f32 to vector<2x32xf32>
    %688 = arith.subf %687, %681 : vector<2x32xf32>
    %689 = arith.mulf %688, %686 : vector<2x32xf32>
    %690 = arith.mulf %681, %601 : vector<2x32xf32>
    %691 = arith.addf %689, %690 : vector<2x32xf32>
    %692 = vector.shape_cast %691 : vector<2x32xf32> to vector<2x1x32xf32>
    %693 = vector.broadcast %692 : vector<2x1x32xf32> to vector<2x8x32xf32>
    %694 = arith.mulf %371, %693 : vector<2x8x32xf32>
    %cst_146 = arith.constant dense<0.000000e+00> : vector<2x8xf32>
    %695 = vector.multi_reduction <add>, %694, %cst_146 [2] : vector<2x8x32xf32> to vector<2x8xf32>
    %cst_147 = arith.constant dense<0xFF800000> : vector<2xf32>
    %696 = vector.multi_reduction <maximumf>, %695, %cst_147 [1] : vector<2x8xf32> to vector<2xf32>
    %697 = vector.shape_cast %696 : vector<2xf32> to vector<2x1xf32>
    %698 = vector.broadcast %697 : vector<2x1xf32> to vector<2x8xf32>
    %699 = arith.subf %695, %698 : vector<2x8xf32>
    %700 = math.exp %699 : vector<2x8xf32>
    %cst_148 = arith.constant dense<0.000000e+00> : vector<2xf32>
    %701 = vector.multi_reduction <add>, %700, %cst_148 [1] : vector<2x8xf32> to vector<2xf32>
    %702 = vector.shape_cast %701 : vector<2xf32> to vector<2x1xf32>
    %703 = tpu.reciprocal %702 {approx = true} : vector<2x1xf32> -> vector<2x1xf32>
    %704 = vector.broadcast %703 : vector<2x1xf32> to vector<2x8xf32>
    %705 = arith.mulf %700, %704 : vector<2x8xf32>
    %706 = vector.shape_cast %705 : vector<2x8xf32> to vector<2x8x1xf32>
    %707 = vector.broadcast %706 : vector<2x8x1xf32> to vector<2x8x32xf32>
    %708 = arith.mulf %707, %371 : vector<2x8x32xf32>
    %cst_149 = arith.constant dense<0.000000e+00> : vector<2x32xf32>
    %709 = vector.multi_reduction <add>, %708, %cst_149 [1] : vector<2x8x32xf32> to vector<2x32xf32>
    %cst_150 = arith.constant dense<0.000000e+00> : vector<2x32xf32>
    %710 = tpu.matmul %709, %376, %cst_150 {dimension_numbers = #tpu.dot_dimension_numbers<[1], [0], [0], [1], [0, 0, 1, 1], [], []>} : vector<2x32xf32>, vector<32x32xf32>, vector<2x32xf32> -> vector<2x32xf32>
    %cst_151 = arith.constant dense<0.000000e+00> : vector<2x32xf32>
    %711 = tpu.matmul %691, %377, %cst_151 {dimension_numbers = #tpu.dot_dimension_numbers<[1], [0], [0], [1], [0, 0, 1, 1], [], []>} : vector<2x32xf32>, vector<32x32xf32>, vector<2x32xf32> -> vector<2x32xf32>
    %712 = arith.addf %710, %711 : vector<2x32xf32>
    %713 = vector.broadcast %378 : vector<1x32xf32> to vector<2x32xf32>
    %714 = arith.addf %712, %713 : vector<2x32xf32>
    %715 = math.tanh %714 : vector<2x32xf32>
    %cst_152 = arith.constant dense<0.000000e+00> : vector<2x128xf32>
    %716 = tpu.matmul %715, %379, %cst_152 {dimension_numbers = #tpu.dot_dimension_numbers<[1], [0], [0], [1], [0, 0, 1, 1], [], []>} : vector<2x32xf32>, vector<32x128xf32>, vector<2x128xf32> -> vector<2x128xf32>
    %717 = vector.broadcast %380 : vector<1x128xf32> to vector<2x128xf32>
    %718 = arith.addf %716, %717 : vector<2x128xf32>
    %cst_153 = arith.constant dense<0xFF800000> : vector<2xf32>
    %719 = vector.multi_reduction <maximumf>, %718, %cst_153 [1] : vector<2x128xf32> to vector<2xf32>
    %720 = vector.shape_cast %719 : vector<2xf32> to vector<2x1xf32>
    %721 = vector.broadcast %720 : vector<2x1xf32> to vector<2x128xf32>
    %722 = arith.subf %718, %721 : vector<2x128xf32>
    %723 = math.exp %722 : vector<2x128xf32>
    %cst_154 = arith.constant dense<0.000000e+00> : vector<2xf32>
    %724 = vector.multi_reduction <add>, %723, %cst_154 [1] : vector<2x128xf32> to vector<2xf32>
    %725 = vector.shape_cast %724 : vector<2xf32> to vector<2x1xf32>
    %726 = math.log %725 : vector<2x1xf32>
    %727 = arith.addf %726, %720 : vector<2x1xf32>
    %728 = vector.broadcast %727 : vector<2x1xf32> to vector<2x128xf32>
    %729 = arith.subf %718, %728 : vector<2x128xf32>
    %c3 = arith.constant 3 : index
    %c0_155 = arith.constant 0 : index
    %c0_156 = arith.constant 0 : index
    %730 = vector.load %arg15[%c3, %c0_155, %c0_156] : memref<8x2x128xf32, #tpu.memory_space<vmem>>, vector<1x2x128xf32>
    %731 = vector.shape_cast %730 : vector<1x2x128xf32> to vector<2x128xf32>
    %732 = vector.shape_cast %729 : vector<2x128xf32> to vector<1x2x128xf32>
    tpu.vector_store %arg15[%c3, %c0_155, %c0_156], %732 {strides = array<i32>} : memref<8x2x128xf32, #tpu.memory_space<vmem>>, vector<1x2x128xf32>,
    %cst_157 = arith.constant dense<0xFF800000> : vector<2xf32>
    %733 = vector.multi_reduction <maximumf>, %729, %cst_157 [1] : vector<2x128xf32> to vector<2xf32>
    %734 = vector.shape_cast %733 : vector<2xf32> to vector<2x1xf32>
    %735 = vector.broadcast %734 : vector<2x1xf32> to vector<2x128xf32>
    %736 = arith.cmpf oge, %729, %735 : vector<2x128xf32>
    %c128_i32_158 = arith.constant 128 : i32
    %737 = vector.broadcast %c128_i32_158 : i32 to vector<2x128xi32>
    %738 = arith.select %736, %382, %737 : vector<2x128xi1>, vector<2x128xi32>
    %cst_159 = arith.constant dense<2147483647> : vector<2xi32>
    %739 = vector.multi_reduction <minsi>, %738, %cst_159 [1] : vector<2x128xi32> to vector<2xi32>
    %740 = vector.shape_cast %739 : vector<2xi32> to vector<2x1xi32>
    %c3_i32_160 = arith.constant 3 : i32
    %741 = vector.broadcast %c3_i32_160 : i32 to vector<2x8xi32>
    %742 = arith.cmpi eq, %383, %741 : vector<2x8xi32>
    %743 = vector.shape_cast %740 : vector<2x1xi32> to vector<2x1xi32>
    %744 = vector.broadcast %743 : vector<2x1xi32> to vector<2x8xi32>
    %745 = arith.select %742, %744, %655 : vector<2x8xi1>, vector<2x8xi32>
    %746 = vector.broadcast %740 : vector<2x1xi32> to vector<2x32xi32>
    %747 = arith.cmpi eq, %746, %381 : vector<2x32xi32>
    %748 = arith.extui %747 : vector<2x32xi1> to vector<2x32xi32>
    %749 = arith.sitofp %748 : vector<2x32xi32> to vector<2x32xf32>
    %cst_161 = arith.constant dense<0.000000e+00> : vector<2x96xf32>
    %750 = tpu.matmul %749, %372, %cst_161 {dimension_numbers = #tpu.dot_dimension_numbers<[1], [0], [0], [1], [0, 0, 1, 1], [], []>} : vector<2x32xf32>, vector<32x96xf32>, vector<2x96xf32> -> vector<2x96xf32>
    %751 = vector.broadcast %374 : vector<1x96xf32> to vector<2x96xf32>
    %752 = arith.addf %750, %751 : vector<2x96xf32>
    %cst_162 = arith.constant dense<0.000000e+00> : vector<2x96xf32>
    %753 = tpu.matmul %691, %373, %cst_162 {dimension_numbers = #tpu.dot_dimension_numbers<[1], [0], [0], [1], [0, 0, 1, 1], [], []>} : vector<2x32xf32>, vector<32x96xf32>, vector<2x96xf32> -> vector<2x96xf32>
    %754 = vector.broadcast %375 : vector<1x96xf32> to vector<2x96xf32>
    %755 = arith.addf %753, %754 : vector<2x96xf32>
    %756 = vector.extract_strided_slice %752 {offsets = [0, 0], sizes = [2, 32], strides = [1, 1]} : vector<2x96xf32> to vector<2x32xf32>
    %757 = vector.extract_strided_slice %755 {offsets = [0, 0], sizes = [2, 32], strides = [1, 1]} : vector<2x96xf32> to vector<2x32xf32>
    %758 = arith.addf %756, %757 : vector<2x32xf32>
    %759 = arith.negf %758 : vector<2x32xf32>
    %760 = math.exp %759 : vector<2x32xf32>
    %cst_163 = arith.constant 1.000000e+00 : f32
    %761 = vector.broadcast %cst_163 : f32 to vector<2x32xf32>
    %762 = arith.addf %761, %760 : vector<2x32xf32>
    %763 = arith.divf %761, %762 : vector<2x32xf32>
    %764 = vector.extract_strided_slice %752 {offsets = [0, 32], sizes = [2, 32], strides = [1, 1]} : vector<2x96xf32> to vector<2x32xf32>
    %765 = vector.extract_strided_slice %755 {offsets = [0, 32], sizes = [2, 32], strides = [1, 1]} : vector<2x96xf32> to vector<2x32xf32>
    %766 = arith.addf %764, %765 : vector<2x32xf32>
    %767 = arith.negf %766 : vector<2x32xf32>
    %768 = math.exp %767 : vector<2x32xf32>
    %cst_164 = arith.constant 1.000000e+00 : f32
    %769 = vector.broadcast %cst_164 : f32 to vector<2x32xf32>
    %770 = arith.addf %769, %768 : vector<2x32xf32>
    %771 = arith.divf %769, %770 : vector<2x32xf32>
    %772 = vector.extract_strided_slice %752 {offsets = [0, 64], sizes = [2, 32], strides = [1, 1]} : vector<2x96xf32> to vector<2x32xf32>
    %773 = vector.extract_strided_slice %755 {offsets = [0, 64], sizes = [2, 32], strides = [1, 1]} : vector<2x96xf32> to vector<2x32xf32>
    %774 = arith.mulf %763, %773 : vector<2x32xf32>
    %775 = arith.addf %772, %774 : vector<2x32xf32>
    %776 = math.tanh %775 : vector<2x32xf32>
    %cst_165 = arith.constant 1.000000e+00 : f32
    %777 = vector.broadcast %cst_165 : f32 to vector<2x32xf32>
    %778 = arith.subf %777, %771 : vector<2x32xf32>
    %779 = arith.mulf %778, %776 : vector<2x32xf32>
    %780 = arith.mulf %771, %691 : vector<2x32xf32>
    %781 = arith.addf %779, %780 : vector<2x32xf32>
    %782 = vector.shape_cast %781 : vector<2x32xf32> to vector<2x1x32xf32>
    %783 = vector.broadcast %782 : vector<2x1x32xf32> to vector<2x8x32xf32>
    %784 = arith.mulf %371, %783 : vector<2x8x32xf32>
    %cst_166 = arith.constant dense<0.000000e+00> : vector<2x8xf32>
    %785 = vector.multi_reduction <add>, %784, %cst_166 [2] : vector<2x8x32xf32> to vector<2x8xf32>
    %cst_167 = arith.constant dense<0xFF800000> : vector<2xf32>
    %786 = vector.multi_reduction <maximumf>, %785, %cst_167 [1] : vector<2x8xf32> to vector<2xf32>
    %787 = vector.shape_cast %786 : vector<2xf32> to vector<2x1xf32>
    %788 = vector.broadcast %787 : vector<2x1xf32> to vector<2x8xf32>
    %789 = arith.subf %785, %788 : vector<2x8xf32>
    %790 = math.exp %789 : vector<2x8xf32>
    %cst_168 = arith.constant dense<0.000000e+00> : vector<2xf32>
    %791 = vector.multi_reduction <add>, %790, %cst_168 [1] : vector<2x8xf32> to vector<2xf32>
    %792 = vector.shape_cast %791 : vector<2xf32> to vector<2x1xf32>
    %793 = tpu.reciprocal %792 {approx = true} : vector<2x1xf32> -> vector<2x1xf32>
    %794 = vector.broadcast %793 : vector<2x1xf32> to vector<2x8xf32>
    %795 = arith.mulf %790, %794 : vector<2x8xf32>
    %796 = vector.shape_cast %795 : vector<2x8xf32> to vector<2x8x1xf32>
    %797 = vector.broadcast %796 : vector<2x8x1xf32> to vector<2x8x32xf32>
    %798 = arith.mulf %797, %371 : vector<2x8x32xf32>
    %cst_169 = arith.constant dense<0.000000e+00> : vector<2x32xf32>
    %799 = vector.multi_reduction <add>, %798, %cst_169 [1] : vector<2x8x32xf32> to vector<2x32xf32>
    %cst_170 = arith.constant dense<0.000000e+00> : vector<2x32xf32>
    %800 = tpu.matmul %799, %376, %cst_170 {dimension_numbers = #tpu.dot_dimension_numbers<[1], [0], [0], [1], [0, 0, 1, 1], [], []>} : vector<2x32xf32>, vector<32x32xf32>, vector<2x32xf32> -> vector<2x32xf32>
    %cst_171 = arith.constant dense<0.000000e+00> : vector<2x32xf32>
    %801 = tpu.matmul %781, %377, %cst_171 {dimension_numbers = #tpu.dot_dimension_numbers<[1], [0], [0], [1], [0, 0, 1, 1], [], []>} : vector<2x32xf32>, vector<32x32xf32>, vector<2x32xf32> -> vector<2x32xf32>
    %802 = arith.addf %800, %801 : vector<2x32xf32>
    %803 = vector.broadcast %378 : vector<1x32xf32> to vector<2x32xf32>
    %804 = arith.addf %802, %803 : vector<2x32xf32>
    %805 = math.tanh %804 : vector<2x32xf32>
    %cst_172 = arith.constant dense<0.000000e+00> : vector<2x128xf32>
    %806 = tpu.matmul %805, %379, %cst_172 {dimension_numbers = #tpu.dot_dimension_numbers<[1], [0], [0], [1], [0, 0, 1, 1], [], []>} : vector<2x32xf32>, vector<32x128xf32>, vector<2x128xf32> -> vector<2x128xf32>
    %807 = vector.broadcast %380 : vector<1x128xf32> to vector<2x128xf32>
    %808 = arith.addf %806, %807 : vector<2x128xf32>
    %cst_173 = arith.constant dense<0xFF800000> : vector<2xf32>
    %809 = vector.multi_reduction <maximumf>, %808, %cst_173 [1] : vector<2x128xf32> to vector<2xf32>
    %810 = vector.shape_cast %809 : vector<2xf32> to vector<2x1xf32>
    %811 = vector.broadcast %810 : vector<2x1xf32> to vector<2x128xf32>
    %812 = arith.subf %808, %811 : vector<2x128xf32>
    %813 = math.exp %812 : vector<2x128xf32>
    %cst_174 = arith.constant dense<0.000000e+00> : vector<2xf32>
    %814 = vector.multi_reduction <add>, %813, %cst_174 [1] : vector<2x128xf32> to vector<2xf32>
    %815 = vector.shape_cast %814 : vector<2xf32> to vector<2x1xf32>
    %816 = math.log %815 : vector<2x1xf32>
    %817 = arith.addf %816, %810 : vector<2x1xf32>
    %818 = vector.broadcast %817 : vector<2x1xf32> to vector<2x128xf32>
    %819 = arith.subf %808, %818 : vector<2x128xf32>
    %c4 = arith.constant 4 : index
    %c0_175 = arith.constant 0 : index
    %c0_176 = arith.constant 0 : index
    %820 = vector.load %arg15[%c4, %c0_175, %c0_176] : memref<8x2x128xf32, #tpu.memory_space<vmem>>, vector<1x2x128xf32>
    %821 = vector.shape_cast %820 : vector<1x2x128xf32> to vector<2x128xf32>
    %822 = vector.shape_cast %819 : vector<2x128xf32> to vector<1x2x128xf32>
    tpu.vector_store %arg15[%c4, %c0_175, %c0_176], %822 {strides = array<i32>} : memref<8x2x128xf32, #tpu.memory_space<vmem>>, vector<1x2x128xf32>,
    %cst_177 = arith.constant dense<0xFF800000> : vector<2xf32>
    %823 = vector.multi_reduction <maximumf>, %819, %cst_177 [1] : vector<2x128xf32> to vector<2xf32>
    %824 = vector.shape_cast %823 : vector<2xf32> to vector<2x1xf32>
    %825 = vector.broadcast %824 : vector<2x1xf32> to vector<2x128xf32>
    %826 = arith.cmpf oge, %819, %825 : vector<2x128xf32>
    %c128_i32_178 = arith.constant 128 : i32
    %827 = vector.broadcast %c128_i32_178 : i32 to vector<2x128xi32>
    %828 = arith.select %826, %382, %827 : vector<2x128xi1>, vector<2x128xi32>
    %cst_179 = arith.constant dense<2147483647> : vector<2xi32>
    %829 = vector.multi_reduction <minsi>, %828, %cst_179 [1] : vector<2x128xi32> to vector<2xi32>
    %830 = vector.shape_cast %829 : vector<2xi32> to vector<2x1xi32>
    %c4_i32_180 = arith.constant 4 : i32
    %831 = vector.broadcast %c4_i32_180 : i32 to vector<2x8xi32>
    %832 = arith.cmpi eq, %383, %831 : vector<2x8xi32>
    %833 = vector.shape_cast %830 : vector<2x1xi32> to vector<2x1xi32>
    %834 = vector.broadcast %833 : vector<2x1xi32> to vector<2x8xi32>
    %835 = arith.select %832, %834, %745 : vector<2x8xi1>, vector<2x8xi32>
    %836 = vector.broadcast %830 : vector<2x1xi32> to vector<2x32xi32>
    %837 = arith.cmpi eq, %836, %381 : vector<2x32xi32>
    %838 = arith.extui %837 : vector<2x32xi1> to vector<2x32xi32>
    %839 = arith.sitofp %838 : vector<2x32xi32> to vector<2x32xf32>
    %cst_181 = arith.constant dense<0.000000e+00> : vector<2x96xf32>
    %840 = tpu.matmul %839, %372, %cst_181 {dimension_numbers = #tpu.dot_dimension_numbers<[1], [0], [0], [1], [0, 0, 1, 1], [], []>} : vector<2x32xf32>, vector<32x96xf32>, vector<2x96xf32> -> vector<2x96xf32>
    %841 = vector.broadcast %374 : vector<1x96xf32> to vector<2x96xf32>
    %842 = arith.addf %840, %841 : vector<2x96xf32>
    %cst_182 = arith.constant dense<0.000000e+00> : vector<2x96xf32>
    %843 = tpu.matmul %781, %373, %cst_182 {dimension_numbers = #tpu.dot_dimension_numbers<[1], [0], [0], [1], [0, 0, 1, 1], [], []>} : vector<2x32xf32>, vector<32x96xf32>, vector<2x96xf32> -> vector<2x96xf32>
    %844 = vector.broadcast %375 : vector<1x96xf32> to vector<2x96xf32>
    %845 = arith.addf %843, %844 : vector<2x96xf32>
    %846 = vector.extract_strided_slice %842 {offsets = [0, 0], sizes = [2, 32], strides = [1, 1]} : vector<2x96xf32> to vector<2x32xf32>
    %847 = vector.extract_strided_slice %845 {offsets = [0, 0], sizes = [2, 32], strides = [1, 1]} : vector<2x96xf32> to vector<2x32xf32>
    %848 = arith.addf %846, %847 : vector<2x32xf32>
    %849 = arith.negf %848 : vector<2x32xf32>
    %850 = math.exp %849 : vector<2x32xf32>
    %cst_183 = arith.constant 1.000000e+00 : f32
    %851 = vector.broadcast %cst_183 : f32 to vector<2x32xf32>
    %852 = arith.addf %851, %850 : vector<2x32xf32>
    %853 = arith.divf %851, %852 : vector<2x32xf32>
    %854 = vector.extract_strided_slice %842 {offsets = [0, 32], sizes = [2, 32], strides = [1, 1]} : vector<2x96xf32> to vector<2x32xf32>
    %855 = vector.extract_strided_slice %845 {offsets = [0, 32], sizes = [2, 32], strides = [1, 1]} : vector<2x96xf32> to vector<2x32xf32>
    %856 = arith.addf %854, %855 : vector<2x32xf32>
    %857 = arith.negf %856 : vector<2x32xf32>
    %858 = math.exp %857 : vector<2x32xf32>
    %cst_184 = arith.constant 1.000000e+00 : f32
    %859 = vector.broadcast %cst_184 : f32 to vector<2x32xf32>
    %860 = arith.addf %859, %858 : vector<2x32xf32>
    %861 = arith.divf %859, %860 : vector<2x32xf32>
    %862 = vector.extract_strided_slice %842 {offsets = [0, 64], sizes = [2, 32], strides = [1, 1]} : vector<2x96xf32> to vector<2x32xf32>
    %863 = vector.extract_strided_slice %845 {offsets = [0, 64], sizes = [2, 32], strides = [1, 1]} : vector<2x96xf32> to vector<2x32xf32>
    %864 = arith.mulf %853, %863 : vector<2x32xf32>
    %865 = arith.addf %862, %864 : vector<2x32xf32>
    %866 = math.tanh %865 : vector<2x32xf32>
    %cst_185 = arith.constant 1.000000e+00 : f32
    %867 = vector.broadcast %cst_185 : f32 to vector<2x32xf32>
    %868 = arith.subf %867, %861 : vector<2x32xf32>
    %869 = arith.mulf %868, %866 : vector<2x32xf32>
    %870 = arith.mulf %861, %781 : vector<2x32xf32>
    %871 = arith.addf %869, %870 : vector<2x32xf32>
    %872 = vector.shape_cast %871 : vector<2x32xf32> to vector<2x1x32xf32>
    %873 = vector.broadcast %872 : vector<2x1x32xf32> to vector<2x8x32xf32>
    %874 = arith.mulf %371, %873 : vector<2x8x32xf32>
    %cst_186 = arith.constant dense<0.000000e+00> : vector<2x8xf32>
    %875 = vector.multi_reduction <add>, %874, %cst_186 [2] : vector<2x8x32xf32> to vector<2x8xf32>
    %cst_187 = arith.constant dense<0xFF800000> : vector<2xf32>
    %876 = vector.multi_reduction <maximumf>, %875, %cst_187 [1] : vector<2x8xf32> to vector<2xf32>
    %877 = vector.shape_cast %876 : vector<2xf32> to vector<2x1xf32>
    %878 = vector.broadcast %877 : vector<2x1xf32> to vector<2x8xf32>
    %879 = arith.subf %875, %878 : vector<2x8xf32>
    %880 = math.exp %879 : vector<2x8xf32>
    %cst_188 = arith.constant dense<0.000000e+00> : vector<2xf32>
    %881 = vector.multi_reduction <add>, %880, %cst_188 [1] : vector<2x8xf32> to vector<2xf32>
    %882 = vector.shape_cast %881 : vector<2xf32> to vector<2x1xf32>
    %883 = tpu.reciprocal %882 {approx = true} : vector<2x1xf32> -> vector<2x1xf32>
    %884 = vector.broadcast %883 : vector<2x1xf32> to vector<2x8xf32>
    %885 = arith.mulf %880, %884 : vector<2x8xf32>
    %886 = vector.shape_cast %885 : vector<2x8xf32> to vector<2x8x1xf32>
    %887 = vector.broadcast %886 : vector<2x8x1xf32> to vector<2x8x32xf32>
    %888 = arith.mulf %887, %371 : vector<2x8x32xf32>
    %cst_189 = arith.constant dense<0.000000e+00> : vector<2x32xf32>
    %889 = vector.multi_reduction <add>, %888, %cst_189 [1] : vector<2x8x32xf32> to vector<2x32xf32>
    %cst_190 = arith.constant dense<0.000000e+00> : vector<2x32xf32>
    %890 = tpu.matmul %889, %376, %cst_190 {dimension_numbers = #tpu.dot_dimension_numbers<[1], [0], [0], [1], [0, 0, 1, 1], [], []>} : vector<2x32xf32>, vector<32x32xf32>, vector<2x32xf32> -> vector<2x32xf32>
    %cst_191 = arith.constant dense<0.000000e+00> : vector<2x32xf32>
    %891 = tpu.matmul %871, %377, %cst_191 {dimension_numbers = #tpu.dot_dimension_numbers<[1], [0], [0], [1], [0, 0, 1, 1], [], []>} : vector<2x32xf32>, vector<32x32xf32>, vector<2x32xf32> -> vector<2x32xf32>
    %892 = arith.addf %890, %891 : vector<2x32xf32>
    %893 = vector.broadcast %378 : vector<1x32xf32> to vector<2x32xf32>
    %894 = arith.addf %892, %893 : vector<2x32xf32>
    %895 = math.tanh %894 : vector<2x32xf32>
    %cst_192 = arith.constant dense<0.000000e+00> : vector<2x128xf32>
    %896 = tpu.matmul %895, %379, %cst_192 {dimension_numbers = #tpu.dot_dimension_numbers<[1], [0], [0], [1], [0, 0, 1, 1], [], []>} : vector<2x32xf32>, vector<32x128xf32>, vector<2x128xf32> -> vector<2x128xf32>
    %897 = vector.broadcast %380 : vector<1x128xf32> to vector<2x128xf32>
    %898 = arith.addf %896, %897 : vector<2x128xf32>
    %cst_193 = arith.constant dense<0xFF800000> : vector<2xf32>
    %899 = vector.multi_reduction <maximumf>, %898, %cst_193 [1] : vector<2x128xf32> to vector<2xf32>
    %900 = vector.shape_cast %899 : vector<2xf32> to vector<2x1xf32>
    %901 = vector.broadcast %900 : vector<2x1xf32> to vector<2x128xf32>
    %902 = arith.subf %898, %901 : vector<2x128xf32>
    %903 = math.exp %902 : vector<2x128xf32>
    %cst_194 = arith.constant dense<0.000000e+00> : vector<2xf32>
    %904 = vector.multi_reduction <add>, %903, %cst_194 [1] : vector<2x128xf32> to vector<2xf32>
    %905 = vector.shape_cast %904 : vector<2xf32> to vector<2x1xf32>
    %906 = math.log %905 : vector<2x1xf32>
    %907 = arith.addf %906, %900 : vector<2x1xf32>
    %908 = vector.broadcast %907 : vector<2x1xf32> to vector<2x128xf32>
    %909 = arith.subf %898, %908 : vector<2x128xf32>
    %c5 = arith.constant 5 : index
    %c0_195 = arith.constant 0 : index
    %c0_196 = arith.constant 0 : index
    %910 = vector.load %arg15[%c5, %c0_195, %c0_196] : memref<8x2x128xf32, #tpu.memory_space<vmem>>, vector<1x2x128xf32>
    %911 = vector.shape_cast %910 : vector<1x2x128xf32> to vector<2x128xf32>
    %912 = vector.shape_cast %909 : vector<2x128xf32> to vector<1x2x128xf32>
    tpu.vector_store %arg15[%c5, %c0_195, %c0_196], %912 {strides = array<i32>} : memref<8x2x128xf32, #tpu.memory_space<vmem>>, vector<1x2x128xf32>,
    %cst_197 = arith.constant dense<0xFF800000> : vector<2xf32>
    %913 = vector.multi_reduction <maximumf>, %909, %cst_197 [1] : vector<2x128xf32> to vector<2xf32>
    %914 = vector.shape_cast %913 : vector<2xf32> to vector<2x1xf32>
    %915 = vector.broadcast %914 : vector<2x1xf32> to vector<2x128xf32>
    %916 = arith.cmpf oge, %909, %915 : vector<2x128xf32>
    %c128_i32_198 = arith.constant 128 : i32
    %917 = vector.broadcast %c128_i32_198 : i32 to vector<2x128xi32>
    %918 = arith.select %916, %382, %917 : vector<2x128xi1>, vector<2x128xi32>
    %cst_199 = arith.constant dense<2147483647> : vector<2xi32>
    %919 = vector.multi_reduction <minsi>, %918, %cst_199 [1] : vector<2x128xi32> to vector<2xi32>
    %920 = vector.shape_cast %919 : vector<2xi32> to vector<2x1xi32>
    %c5_i32_200 = arith.constant 5 : i32
    %921 = vector.broadcast %c5_i32_200 : i32 to vector<2x8xi32>
    %922 = arith.cmpi eq, %383, %921 : vector<2x8xi32>
    %923 = vector.shape_cast %920 : vector<2x1xi32> to vector<2x1xi32>
    %924 = vector.broadcast %923 : vector<2x1xi32> to vector<2x8xi32>
    %925 = arith.select %922, %924, %835 : vector<2x8xi1>, vector<2x8xi32>
    %926 = vector.broadcast %920 : vector<2x1xi32> to vector<2x32xi32>
    %927 = arith.cmpi eq, %926, %381 : vector<2x32xi32>
    %928 = arith.extui %927 : vector<2x32xi1> to vector<2x32xi32>
    %929 = arith.sitofp %928 : vector<2x32xi32> to vector<2x32xf32>
    %cst_201 = arith.constant dense<0.000000e+00> : vector<2x96xf32>
    %930 = tpu.matmul %929, %372, %cst_201 {dimension_numbers = #tpu.dot_dimension_numbers<[1], [0], [0], [1], [0, 0, 1, 1], [], []>} : vector<2x32xf32>, vector<32x96xf32>, vector<2x96xf32> -> vector<2x96xf32>
    %931 = vector.broadcast %374 : vector<1x96xf32> to vector<2x96xf32>
    %932 = arith.addf %930, %931 : vector<2x96xf32>
    %cst_202 = arith.constant dense<0.000000e+00> : vector<2x96xf32>
    %933 = tpu.matmul %871, %373, %cst_202 {dimension_numbers = #tpu.dot_dimension_numbers<[1], [0], [0], [1], [0, 0, 1, 1], [], []>} : vector<2x32xf32>, vector<32x96xf32>, vector<2x96xf32> -> vector<2x96xf32>
    %934 = vector.broadcast %375 : vector<1x96xf32> to vector<2x96xf32>
    %935 = arith.addf %933, %934 : vector<2x96xf32>
    %936 = vector.extract_strided_slice %932 {offsets = [0, 0], sizes = [2, 32], strides = [1, 1]} : vector<2x96xf32> to vector<2x32xf32>
    %937 = vector.extract_strided_slice %935 {offsets = [0, 0], sizes = [2, 32], strides = [1, 1]} : vector<2x96xf32> to vector<2x32xf32>
    %938 = arith.addf %936, %937 : vector<2x32xf32>
    %939 = arith.negf %938 : vector<2x32xf32>
    %940 = math.exp %939 : vector<2x32xf32>
    %cst_203 = arith.constant 1.000000e+00 : f32
    %941 = vector.broadcast %cst_203 : f32 to vector<2x32xf32>
    %942 = arith.addf %941, %940 : vector<2x32xf32>
    %943 = arith.divf %941, %942 : vector<2x32xf32>
    %944 = vector.extract_strided_slice %932 {offsets = [0, 32], sizes = [2, 32], strides = [1, 1]} : vector<2x96xf32> to vector<2x32xf32>
    %945 = vector.extract_strided_slice %935 {offsets = [0, 32], sizes = [2, 32], strides = [1, 1]} : vector<2x96xf32> to vector<2x32xf32>
    %946 = arith.addf %944, %945 : vector<2x32xf32>
    %947 = arith.negf %946 : vector<2x32xf32>
    %948 = math.exp %947 : vector<2x32xf32>
    %cst_204 = arith.constant 1.000000e+00 : f32
    %949 = vector.broadcast %cst_204 : f32 to vector<2x32xf32>
    %950 = arith.addf %949, %948 : vector<2x32xf32>
    %951 = arith.divf %949, %950 : vector<2x32xf32>
    %952 = vector.extract_strided_slice %932 {offsets = [0, 64], sizes = [2, 32], strides = [1, 1]} : vector<2x96xf32> to vector<2x32xf32>
    %953 = vector.extract_strided_slice %935 {offsets = [0, 64], sizes = [2, 32], strides = [1, 1]} : vector<2x96xf32> to vector<2x32xf32>
    %954 = arith.mulf %943, %953 : vector<2x32xf32>
    %955 = arith.addf %952, %954 : vector<2x32xf32>
    %956 = math.tanh %955 : vector<2x32xf32>
    %cst_205 = arith.constant 1.000000e+00 : f32
    %957 = vector.broadcast %cst_205 : f32 to vector<2x32xf32>
    %958 = arith.subf %957, %951 : vector<2x32xf32>
    %959 = arith.mulf %958, %956 : vector<2x32xf32>
    %960 = arith.mulf %951, %871 : vector<2x32xf32>
    %961 = arith.addf %959, %960 : vector<2x32xf32>
    %962 = vector.shape_cast %961 : vector<2x32xf32> to vector<2x1x32xf32>
    %963 = vector.broadcast %962 : vector<2x1x32xf32> to vector<2x8x32xf32>
    %964 = arith.mulf %371, %963 : vector<2x8x32xf32>
    %cst_206 = arith.constant dense<0.000000e+00> : vector<2x8xf32>
    %965 = vector.multi_reduction <add>, %964, %cst_206 [2] : vector<2x8x32xf32> to vector<2x8xf32>
    %cst_207 = arith.constant dense<0xFF800000> : vector<2xf32>
    %966 = vector.multi_reduction <maximumf>, %965, %cst_207 [1] : vector<2x8xf32> to vector<2xf32>
    %967 = vector.shape_cast %966 : vector<2xf32> to vector<2x1xf32>
    %968 = vector.broadcast %967 : vector<2x1xf32> to vector<2x8xf32>
    %969 = arith.subf %965, %968 : vector<2x8xf32>
    %970 = math.exp %969 : vector<2x8xf32>
    %cst_208 = arith.constant dense<0.000000e+00> : vector<2xf32>
    %971 = vector.multi_reduction <add>, %970, %cst_208 [1] : vector<2x8xf32> to vector<2xf32>
    %972 = vector.shape_cast %971 : vector<2xf32> to vector<2x1xf32>
    %973 = tpu.reciprocal %972 {approx = true} : vector<2x1xf32> -> vector<2x1xf32>
    %974 = vector.broadcast %973 : vector<2x1xf32> to vector<2x8xf32>
    %975 = arith.mulf %970, %974 : vector<2x8xf32>
    %976 = vector.shape_cast %975 : vector<2x8xf32> to vector<2x8x1xf32>
    %977 = vector.broadcast %976 : vector<2x8x1xf32> to vector<2x8x32xf32>
    %978 = arith.mulf %977, %371 : vector<2x8x32xf32>
    %cst_209 = arith.constant dense<0.000000e+00> : vector<2x32xf32>
    %979 = vector.multi_reduction <add>, %978, %cst_209 [1] : vector<2x8x32xf32> to vector<2x32xf32>
    %cst_210 = arith.constant dense<0.000000e+00> : vector<2x32xf32>
    %980 = tpu.matmul %979, %376, %cst_210 {dimension_numbers = #tpu.dot_dimension_numbers<[1], [0], [0], [1], [0, 0, 1, 1], [], []>} : vector<2x32xf32>, vector<32x32xf32>, vector<2x32xf32> -> vector<2x32xf32>
    %cst_211 = arith.constant dense<0.000000e+00> : vector<2x32xf32>
    %981 = tpu.matmul %961, %377, %cst_211 {dimension_numbers = #tpu.dot_dimension_numbers<[1], [0], [0], [1], [0, 0, 1, 1], [], []>} : vector<2x32xf32>, vector<32x32xf32>, vector<2x32xf32> -> vector<2x32xf32>
    %982 = arith.addf %980, %981 : vector<2x32xf32>
    %983 = vector.broadcast %378 : vector<1x32xf32> to vector<2x32xf32>
    %984 = arith.addf %982, %983 : vector<2x32xf32>
    %985 = math.tanh %984 : vector<2x32xf32>
    %cst_212 = arith.constant dense<0.000000e+00> : vector<2x128xf32>
    %986 = tpu.matmul %985, %379, %cst_212 {dimension_numbers = #tpu.dot_dimension_numbers<[1], [0], [0], [1], [0, 0, 1, 1], [], []>} : vector<2x32xf32>, vector<32x128xf32>, vector<2x128xf32> -> vector<2x128xf32>
    %987 = vector.broadcast %380 : vector<1x128xf32> to vector<2x128xf32>
    %988 = arith.addf %986, %987 : vector<2x128xf32>
    %cst_213 = arith.constant dense<0xFF800000> : vector<2xf32>
    %989 = vector.multi_reduction <maximumf>, %988, %cst_213 [1] : vector<2x128xf32> to vector<2xf32>
    %990 = vector.shape_cast %989 : vector<2xf32> to vector<2x1xf32>
    %991 = vector.broadcast %990 : vector<2x1xf32> to vector<2x128xf32>
    %992 = arith.subf %988, %991 : vector<2x128xf32>
    %993 = math.exp %992 : vector<2x128xf32>
    %cst_214 = arith.constant dense<0.000000e+00> : vector<2xf32>
    %994 = vector.multi_reduction <add>, %993, %cst_214 [1] : vector<2x128xf32> to vector<2xf32>
    %995 = vector.shape_cast %994 : vector<2xf32> to vector<2x1xf32>
    %996 = math.log %995 : vector<2x1xf32>
    %997 = arith.addf %996, %990 : vector<2x1xf32>
    %998 = vector.broadcast %997 : vector<2x1xf32> to vector<2x128xf32>
    %999 = arith.subf %988, %998 : vector<2x128xf32>
    %c6 = arith.constant 6 : index
    %c0_215 = arith.constant 0 : index
    %c0_216 = arith.constant 0 : index
    %1000 = vector.load %arg15[%c6, %c0_215, %c0_216] : memref<8x2x128xf32, #tpu.memory_space<vmem>>, vector<1x2x128xf32>
    %1001 = vector.shape_cast %1000 : vector<1x2x128xf32> to vector<2x128xf32>
    %1002 = vector.shape_cast %999 : vector<2x128xf32> to vector<1x2x128xf32>
    tpu.vector_store %arg15[%c6, %c0_215, %c0_216], %1002 {strides = array<i32>} : memref<8x2x128xf32, #tpu.memory_space<vmem>>, vector<1x2x128xf32>,
    %cst_217 = arith.constant dense<0xFF800000> : vector<2xf32>
    %1003 = vector.multi_reduction <maximumf>, %999, %cst_217 [1] : vector<2x128xf32> to vector<2xf32>
    %1004 = vector.shape_cast %1003 : vector<2xf32> to vector<2x1xf32>
    %1005 = vector.broadcast %1004 : vector<2x1xf32> to vector<2x128xf32>
    %1006 = arith.cmpf oge, %999, %1005 : vector<2x128xf32>
    %c128_i32_218 = arith.constant 128 : i32
    %1007 = vector.broadcast %c128_i32_218 : i32 to vector<2x128xi32>
    %1008 = arith.select %1006, %382, %1007 : vector<2x128xi1>, vector<2x128xi32>
    %cst_219 = arith.constant dense<2147483647> : vector<2xi32>
    %1009 = vector.multi_reduction <minsi>, %1008, %cst_219 [1] : vector<2x128xi32> to vector<2xi32>
    %1010 = vector.shape_cast %1009 : vector<2xi32> to vector<2x1xi32>
    %c6_i32_220 = arith.constant 6 : i32
    %1011 = vector.broadcast %c6_i32_220 : i32 to vector<2x8xi32>
    %1012 = arith.cmpi eq, %383, %1011 : vector<2x8xi32>
    %1013 = vector.shape_cast %1010 : vector<2x1xi32> to vector<2x1xi32>
    %1014 = vector.broadcast %1013 : vector<2x1xi32> to vector<2x8xi32>
    %1015 = arith.select %1012, %1014, %925 : vector<2x8xi1>, vector<2x8xi32>
    %1016 = vector.broadcast %1010 : vector<2x1xi32> to vector<2x32xi32>
    %1017 = arith.cmpi eq, %1016, %381 : vector<2x32xi32>
    %1018 = arith.extui %1017 : vector<2x32xi1> to vector<2x32xi32>
    %1019 = arith.sitofp %1018 : vector<2x32xi32> to vector<2x32xf32>
    %cst_221 = arith.constant dense<0.000000e+00> : vector<2x96xf32>
    %1020 = tpu.matmul %1019, %372, %cst_221 {dimension_numbers = #tpu.dot_dimension_numbers<[1], [0], [0], [1], [0, 0, 1, 1], [], []>} : vector<2x32xf32>, vector<32x96xf32>, vector<2x96xf32> -> vector<2x96xf32>
    %1021 = vector.broadcast %374 : vector<1x96xf32> to vector<2x96xf32>
    %1022 = arith.addf %1020, %1021 : vector<2x96xf32>
    %cst_222 = arith.constant dense<0.000000e+00> : vector<2x96xf32>
    %1023 = tpu.matmul %961, %373, %cst_222 {dimension_numbers = #tpu.dot_dimension_numbers<[1], [0], [0], [1], [0, 0, 1, 1], [], []>} : vector<2x32xf32>, vector<32x96xf32>, vector<2x96xf32> -> vector<2x96xf32>
    %1024 = vector.broadcast %375 : vector<1x96xf32> to vector<2x96xf32>
    %1025 = arith.addf %1023, %1024 : vector<2x96xf32>
    %1026 = vector.extract_strided_slice %1022 {offsets = [0, 0], sizes = [2, 32], strides = [1, 1]} : vector<2x96xf32> to vector<2x32xf32>
    %1027 = vector.extract_strided_slice %1025 {offsets = [0, 0], sizes = [2, 32], strides = [1, 1]} : vector<2x96xf32> to vector<2x32xf32>
    %1028 = arith.addf %1026, %1027 : vector<2x32xf32>
    %1029 = arith.negf %1028 : vector<2x32xf32>
    %1030 = math.exp %1029 : vector<2x32xf32>
    %cst_223 = arith.constant 1.000000e+00 : f32
    %1031 = vector.broadcast %cst_223 : f32 to vector<2x32xf32>
    %1032 = arith.addf %1031, %1030 : vector<2x32xf32>
    %1033 = arith.divf %1031, %1032 : vector<2x32xf32>
    %1034 = vector.extract_strided_slice %1022 {offsets = [0, 32], sizes = [2, 32], strides = [1, 1]} : vector<2x96xf32> to vector<2x32xf32>
    %1035 = vector.extract_strided_slice %1025 {offsets = [0, 32], sizes = [2, 32], strides = [1, 1]} : vector<2x96xf32> to vector<2x32xf32>
    %1036 = arith.addf %1034, %1035 : vector<2x32xf32>
    %1037 = arith.negf %1036 : vector<2x32xf32>
    %1038 = math.exp %1037 : vector<2x32xf32>
    %cst_224 = arith.constant 1.000000e+00 : f32
    %1039 = vector.broadcast %cst_224 : f32 to vector<2x32xf32>
    %1040 = arith.addf %1039, %1038 : vector<2x32xf32>
    %1041 = arith.divf %1039, %1040 : vector<2x32xf32>
    %1042 = vector.extract_strided_slice %1022 {offsets = [0, 64], sizes = [2, 32], strides = [1, 1]} : vector<2x96xf32> to vector<2x32xf32>
    %1043 = vector.extract_strided_slice %1025 {offsets = [0, 64], sizes = [2, 32], strides = [1, 1]} : vector<2x96xf32> to vector<2x32xf32>
    %1044 = arith.mulf %1033, %1043 : vector<2x32xf32>
    %1045 = arith.addf %1042, %1044 : vector<2x32xf32>
    %1046 = math.tanh %1045 : vector<2x32xf32>
    %cst_225 = arith.constant 1.000000e+00 : f32
    %1047 = vector.broadcast %cst_225 : f32 to vector<2x32xf32>
    %1048 = arith.subf %1047, %1041 : vector<2x32xf32>
    %1049 = arith.mulf %1048, %1046 : vector<2x32xf32>
    %1050 = arith.mulf %1041, %961 : vector<2x32xf32>
    %1051 = arith.addf %1049, %1050 : vector<2x32xf32>
    %1052 = vector.shape_cast %1051 : vector<2x32xf32> to vector<2x1x32xf32>
    %1053 = vector.broadcast %1052 : vector<2x1x32xf32> to vector<2x8x32xf32>
    %1054 = arith.mulf %371, %1053 : vector<2x8x32xf32>
    %cst_226 = arith.constant dense<0.000000e+00> : vector<2x8xf32>
    %1055 = vector.multi_reduction <add>, %1054, %cst_226 [2] : vector<2x8x32xf32> to vector<2x8xf32>
    %cst_227 = arith.constant dense<0xFF800000> : vector<2xf32>
    %1056 = vector.multi_reduction <maximumf>, %1055, %cst_227 [1] : vector<2x8xf32> to vector<2xf32>
    %1057 = vector.shape_cast %1056 : vector<2xf32> to vector<2x1xf32>
    %1058 = vector.broadcast %1057 : vector<2x1xf32> to vector<2x8xf32>
    %1059 = arith.subf %1055, %1058 : vector<2x8xf32>
    %1060 = math.exp %1059 : vector<2x8xf32>
    %cst_228 = arith.constant dense<0.000000e+00> : vector<2xf32>
    %1061 = vector.multi_reduction <add>, %1060, %cst_228 [1] : vector<2x8xf32> to vector<2xf32>
    %1062 = vector.shape_cast %1061 : vector<2xf32> to vector<2x1xf32>
    %1063 = tpu.reciprocal %1062 {approx = true} : vector<2x1xf32> -> vector<2x1xf32>
    %1064 = vector.broadcast %1063 : vector<2x1xf32> to vector<2x8xf32>
    %1065 = arith.mulf %1060, %1064 : vector<2x8xf32>
    %1066 = vector.shape_cast %1065 : vector<2x8xf32> to vector<2x8x1xf32>
    %1067 = vector.broadcast %1066 : vector<2x8x1xf32> to vector<2x8x32xf32>
    %1068 = arith.mulf %1067, %371 : vector<2x8x32xf32>
    %cst_229 = arith.constant dense<0.000000e+00> : vector<2x32xf32>
    %1069 = vector.multi_reduction <add>, %1068, %cst_229 [1] : vector<2x8x32xf32> to vector<2x32xf32>
    %cst_230 = arith.constant dense<0.000000e+00> : vector<2x32xf32>
    %1070 = tpu.matmul %1069, %376, %cst_230 {dimension_numbers = #tpu.dot_dimension_numbers<[1], [0], [0], [1], [0, 0, 1, 1], [], []>} : vector<2x32xf32>, vector<32x32xf32>, vector<2x32xf32> -> vector<2x32xf32>
    %cst_231 = arith.constant dense<0.000000e+00> : vector<2x32xf32>
    %1071 = tpu.matmul %1051, %377, %cst_231 {dimension_numbers = #tpu.dot_dimension_numbers<[1], [0], [0], [1], [0, 0, 1, 1], [], []>} : vector<2x32xf32>, vector<32x32xf32>, vector<2x32xf32> -> vector<2x32xf32>
    %1072 = arith.addf %1070, %1071 : vector<2x32xf32>
    %1073 = vector.broadcast %378 : vector<1x32xf32> to vector<2x32xf32>
    %1074 = arith.addf %1072, %1073 : vector<2x32xf32>
    %1075 = math.tanh %1074 : vector<2x32xf32>
    %cst_232 = arith.constant dense<0.000000e+00> : vector<2x128xf32>
    %1076 = tpu.matmul %1075, %379, %cst_232 {dimension_numbers = #tpu.dot_dimension_numbers<[1], [0], [0], [1], [0, 0, 1, 1], [], []>} : vector<2x32xf32>, vector<32x128xf32>, vector<2x128xf32> -> vector<2x128xf32>
    %1077 = vector.broadcast %380 : vector<1x128xf32> to vector<2x128xf32>
    %1078 = arith.addf %1076, %1077 : vector<2x128xf32>
    %cst_233 = arith.constant dense<0xFF800000> : vector<2xf32>
    %1079 = vector.multi_reduction <maximumf>, %1078, %cst_233 [1] : vector<2x128xf32> to vector<2xf32>
    %1080 = vector.shape_cast %1079 : vector<2xf32> to vector<2x1xf32>
    %1081 = vector.broadcast %1080 : vector<2x1xf32> to vector<2x128xf32>
    %1082 = arith.subf %1078, %1081 : vector<2x128xf32>
    %1083 = math.exp %1082 : vector<2x128xf32>
    %cst_234 = arith.constant dense<0.000000e+00> : vector<2xf32>
    %1084 = vector.multi_reduction <add>, %1083, %cst_234 [1] : vector<2x128xf32> to vector<2xf32>
    %1085 = vector.shape_cast %1084 : vector<2xf32> to vector<2x1xf32>
    %1086 = math.log %1085 : vector<2x1xf32>
    %1087 = arith.addf %1086, %1080 : vector<2x1xf32>
    %1088 = vector.broadcast %1087 : vector<2x1xf32> to vector<2x128xf32>
    %1089 = arith.subf %1078, %1088 : vector<2x128xf32>
    %c7 = arith.constant 7 : index
    %c0_235 = arith.constant 0 : index
    %c0_236 = arith.constant 0 : index
    %1090 = vector.load %arg15[%c7, %c0_235, %c0_236] : memref<8x2x128xf32, #tpu.memory_space<vmem>>, vector<1x2x128xf32>
    %1091 = vector.shape_cast %1090 : vector<1x2x128xf32> to vector<2x128xf32>
    %1092 = vector.shape_cast %1089 : vector<2x128xf32> to vector<1x2x128xf32>
    tpu.vector_store %arg15[%c7, %c0_235, %c0_236], %1092 {strides = array<i32>} : memref<8x2x128xf32, #tpu.memory_space<vmem>>, vector<1x2x128xf32>,
    %cst_237 = arith.constant dense<0xFF800000> : vector<2xf32>
    %1093 = vector.multi_reduction <maximumf>, %1089, %cst_237 [1] : vector<2x128xf32> to vector<2xf32>
    %1094 = vector.shape_cast %1093 : vector<2xf32> to vector<2x1xf32>
    %1095 = vector.broadcast %1094 : vector<2x1xf32> to vector<2x128xf32>
    %1096 = arith.cmpf oge, %1089, %1095 : vector<2x128xf32>
    %c128_i32_238 = arith.constant 128 : i32
    %1097 = vector.broadcast %c128_i32_238 : i32 to vector<2x128xi32>
    %1098 = arith.select %1096, %382, %1097 : vector<2x128xi1>, vector<2x128xi32>
    %cst_239 = arith.constant dense<2147483647> : vector<2xi32>
    %1099 = vector.multi_reduction <minsi>, %1098, %cst_239 [1] : vector<2x128xi32> to vector<2xi32>
    %1100 = vector.shape_cast %1099 : vector<2xi32> to vector<2x1xi32>
    %c7_i32_240 = arith.constant 7 : i32
    %1101 = vector.broadcast %c7_i32_240 : i32 to vector<2x8xi32>
    %1102 = arith.cmpi eq, %383, %1101 : vector<2x8xi32>
    %1103 = vector.shape_cast %1100 : vector<2x1xi32> to vector<2x1xi32>
    %1104 = vector.broadcast %1103 : vector<2x1xi32> to vector<2x8xi32>
    %1105 = arith.select %1102, %1104, %1015 : vector<2x8xi1>, vector<2x8xi32>
    %c0_241 = arith.constant 0 : index
    %c0_242 = arith.constant 0 : index
    %1106 = vector.load %arg16[%c0_241, %c0_242] : memref<2x8xi32, #tpu.memory_space<vmem>>, vector<2x8xi32>
    tpu.vector_store %arg16[%c0_241, %c0_242], %1105 {strides = array<i32>} : memref<2x8xi32, #tpu.memory_space<vmem>>, vector<2x8xi32>,
    return
  }
}

</mosaic_0001>

<bundles_post_ra>
// kernel: tpu_custom_call.1
= control target key start
LH: loop header
LB: loop body
LE: loop exit
PB: predicated region body
PF: predicated region fallthrough
CT: control target
= control target key end

     0   :  { %s9131_s0 = inlined_call_operand.hbm [shape: f32[16,32], index: 0, kind: input, shape index: {}]   ;;  %s9132_s1 = inlined_call_operand.vmem [shape: s32[2,1], index: 1, kind: input, shape index: {}]   ;;  %s9133_s2 = inlined_call_operand.hbm [shape: f32[32,96], index: 2, kind: input, shape index: {}]   ;;  %s9134_s3 = inlined_call_operand.hbm [shape: f32[32,96], index: 3, kind: input, shape index: {}]   ;;  %s9135_s4 = inlined_call_operand.vmem [shape: f32[1,96], index: 4, kind: input, shape index: {}]   ;;  %s9136_s5 = inlined_call_operand.vmem [shape: f32[1,96], index: 5, kind: input, shape index: {}]   ;;  %s9137_s6 = inlined_call_operand.hbm [shape: f32[32,96], index: 6, kind: input, shape index: {}]   ;;  %s9138_s7 = inlined_call_operand.hbm [shape: f32[32,96], index: 7, kind: input, shape index: {}]   ;;  %s9139_s8 = inlined_call_operand.vmem [shape: f32[1,96], index: 8, kind: input, shape index: {}]   ;;  %s9140_s9 = inlined_call_operand.vmem [shape: f32[1,96], index: 9, kind: input, shape index: {}]   ;;  %s9141_s10 = inlined_call_operand.vmem [shape: f32[32,32], index: 10, kind: input, shape index: {}]   ;;  %s9142_s11 = inlined_call_operand.hbm [shape: f32[32,32], index: 11, kind: input, shape index: {}]   ;;  %s9143_s12 = inlined_call_operand.vmem [shape: f32[1,32], index: 12, kind: input, shape index: {}]   ;;  %s9144_s13 = inlined_call_operand.hbm [shape: f32[32,128], index: 13, kind: input, shape index: {}]   ;;  %s9145_s14 = inlined_call_operand.vmem [shape: f32[1,128], index: 14, kind: input, shape index: {}]   ;;  %s9146_s15 = inlined_call_operand.hbm [shape: f32[8,2,128], index: 15, kind: output, shape index: {0}]   ;;  %s9147_s16 = inlined_call_operand.hbm [shape: s32[2,8], index: 16, kind: output, shape index: {1}]  }
   0x1   :  { %9149 = sst [smem:[#allocation23_spill]] %s9131_s0 }
   0x2   :  { %22 = vsyncpa [#allocation3], 0 }
   0x3   :  { %23 = vsyncpa [#allocation6], 0 }
   0x4   :  { %24 = vsyncpa [#allocation9], 0 }
   0x5   :  { %25 = vsyncpa [#allocation12], 0 }
   0x6   :  { %26 = vsyncpa [#allocation4], 0 }
   0x7   :  { %27 = vsyncpa [#allocation16], 0  ;;  %s7747_s21 = smov [#allocation5]   ;;  %s7748_s23 = smov [#allocation8]  }
   0x8   :  { %s47_s22 = sshll.u32 %s7747_s21, 4  ;;  %s75_s24 = sshll.u32 %s7748_s23, 4  ;;  %s48_s22 = int_to_ptr.vmem [resolvable:$true] %s47_s22  ;;  %s7852_s24 = int_to_ptr.vmem [resolvable:$true] %s75_s24 }
   0x9   :  { %s7537_s27 = scalar_lea.hbm %s9133_s2, 512 }
   0xa   :  { %p7538_p0 = scmp.ne.s32.totalorder %s9133_s2, %s7537_s27  ;;  %p7541_p1 = scmp.lt.u32.totalorder %s7537_s27, %s9133_s2 }
   0xc   :  { %p7543_p2 = pnand %p7541_p1, %p7538_p0 }
   0xe   :  { %7546 = shalt.err (!%p7543_p2)
}
   0xf   :  { %s7547_s17 = scalar_lea.vmem %s48_s22, 512  ;;  %p7552_p4 = scmp.lt.s32.totalorder %s48_s22, %s48_s22 }
  0x10   :  { %p7548_p3 = scmp.ne.s32.totalorder %s48_s22, %s7547_s17  ;;  %p7553_p5 = scmp.lt.s32.totalorder %s7547_s17, %s7547_s17 }
  0x12   :  { %p7554_p6 = por %p7553_p5, %p7552_p4 }
  0x14   :  { %p7555_p7 = pnand %p7554_p6, %p7548_p3 }
  0x16   :  { %7558 = shalt.err (!%p7555_p7)
}
  0x17   :  { %s7749_s18 = smov 128   ;;  %s7750_s19 = smov 8  }
  0x18   :  { %53 = dma.hbm_to_vmem [thread:$0]  %s9133_s2, 512, %s48_s22, [#allocation6], %s7749_s18, %s7749_s18, %s7750_s19  }
  0x19   :  { %s7559_s26 = scalar_lea.hbm %s9137_s6, 512 }
  0x1a   :  { %p7560_p8 = scmp.ne.s32.totalorder %s9137_s6, %s7559_s26  ;;  %p7563_p9 = scmp.lt.u32.totalorder %s7559_s26, %s9137_s6 }
  0x1c   :  { %p7565_p10 = pnand %p7563_p9, %p7560_p8 }
  0x1e   :  { %7568 = shalt.err (!%p7565_p10)
}
  0x1f   :  { %s7569_s0 = scalar_lea.vmem %s7852_s24, 512  ;;  %p7574_p12 = scmp.lt.s32.totalorder %s7852_s24, %s7852_s24 }
  0x20   :  { %p7570_p11 = scmp.ne.s32.totalorder %s7852_s24, %s7569_s0  ;;  %p7575_p13 = scmp.lt.s32.totalorder %s7569_s0, %s7569_s0 }
  0x22   :  { %p7576_p0 = por %p7575_p13, %p7574_p12 }
  0x24   :  { %p7577_p1 = pnand %p7576_p0, %p7570_p11 }
  0x26   :  { %7580 = shalt.err (!%p7577_p1)
}
  0x27   :  { %81 = dma.hbm_to_vmem [thread:$0]  %s9137_s6, 512, %s7852_s24, [#allocation9], %s7749_s18, %s7749_s18, %s7750_s19  }
  0x28   :  { %s7751_s17 = smov [#allocation11]   ;;  %s7752_s21 = smov [#allocation2]  }
  0x29   :  { %s105_s20 = sshll.u32 %s7751_s17, 4  ;;  %s33_s23 = sshll.u32 %s7752_s21, 4  ;;  %s106_s20 = int_to_ptr.vmem [resolvable:$true] %s105_s20  ;;  %s7889_s23 = int_to_ptr.vmem [resolvable:$true] %s33_s23 }
  0x2a   :  { %s7581_s27 = scalar_lea.hbm %s9142_s11, 512 }
  0x2b   :  { %p7582_p2 = scmp.ne.s32.totalorder %s9142_s11, %s7581_s27  ;;  %p7585_p3 = scmp.lt.u32.totalorder %s7581_s27, %s9142_s11 }
  0x2d   :  { %p7587_p4 = pnand %p7585_p3, %p7582_p2 }
  0x2f   :  { %7590 = shalt.err (!%p7587_p4)
}
  0x30   :  { %s7591_s6 = scalar_lea.vmem %s106_s20, 512  ;;  %p7596_p6 = scmp.lt.s32.totalorder %s106_s20, %s106_s20 }
  0x31   :  { %p7592_p5 = scmp.ne.s32.totalorder %s106_s20, %s7591_s6  ;;  %p7597_p7 = scmp.lt.s32.totalorder %s7591_s6, %s7591_s6 }
  0x33   :  { %p7598_p8 = por %p7597_p7, %p7596_p6 }
  0x35   :  { %p7599_p9 = pnand %p7598_p8, %p7592_p5 }
  0x37   :  { %7602 = shalt.err (!%p7599_p9)
}
  0x38   :  { %111 = dma.hbm_to_vmem [thread:$0]  %s9142_s11, 512, %s106_s20, [#allocation12], %s7749_s18, %s7749_s18, %s7750_s19  }
  0x39   :  { %s9150_s21 = sld [smem:[#allocation23_spill]] }
  0x3f   :  { %s7603_s25 = scalar_lea.hbm %s9150_s21, 256 }
  0x40   :  { %p7604_p10 = scmp.ne.s32.totalorder %s9150_s21, %s7603_s25  ;;  %p7607_p11 = scmp.lt.u32.totalorder %s7603_s25, %s9150_s21 }
  0x42   :  { %p7609_p12 = pnand %p7607_p11, %p7604_p10 }
  0x44   :  { %7612 = shalt.err (!%p7609_p12)
}
  0x45   :  { %s7613_s30 = scalar_lea.vmem %s7889_s23, 256  ;;  %p7618_p0 = scmp.lt.s32.totalorder %s7889_s23, %s7889_s23 }
  0x46   :  { %p7614_p13 = scmp.ne.s32.totalorder %s7889_s23, %s7613_s30  ;;  %p7619_p1 = scmp.lt.s32.totalorder %s7613_s30, %s7613_s30 }
  0x48   :  { %p7620_p2 = por %p7619_p1, %p7618_p0 }
  0x4a   :  { %p7621_p3 = pnand %p7620_p2, %p7614_p13 }
  0x4c   :  { %7624 = shalt.err (!%p7621_p3)
}
  0x4d   :  { %39 = dma.hbm_to_vmem [thread:$0]  %s9150_s21, 256, %s7889_s23, [#allocation3], %s7749_s18, %s7749_s18, %s7750_s19  }
  0x4e   :  { %s7753_s0 = smov [#allocation7]   ;;  %s7754_s24 = smov [#allocation10]  }
  0x4f   :  { %s59_s6 = sshll.u32 %s7753_s0, 4  ;;  %s87_s2 = sshll.u32 %s7754_s24, 4  ;;  %s60_s6 = int_to_ptr.vmem [resolvable:$true] %s59_s6  ;;  %s7926_s2 = int_to_ptr.vmem [resolvable:$true] %s87_s2 }
  0x50   :  { %s7625_s25 = scalar_lea.hbm %s9134_s3, 512 }
  0x51   :  { %p7626_p4 = scmp.ne.s32.totalorder %s9134_s3, %s7625_s25  ;;  %p7629_p5 = scmp.lt.u32.totalorder %s7625_s25, %s9134_s3 }
  0x53   :  { %p7631_p6 = pnand %p7629_p5, %p7626_p4 }
  0x55   :  { %7634 = shalt.err (!%p7631_p6)
}
  0x56   :  { %s7635_s23 = scalar_lea.vmem %s60_s6, 512  ;;  %p7640_p8 = scmp.lt.s32.totalorder %s60_s6, %s60_s6 }
  0x57   :  { %p7636_p7 = scmp.ne.s32.totalorder %s60_s6, %s7635_s23  ;;  %p7641_p9 = scmp.lt.s32.totalorder %s7635_s23, %s7635_s23 }
  0x59   :  { %p7642_p10 = por %p7641_p9, %p7640_p8 }
  0x5b   :  { %p7643_p11 = pnand %p7642_p10, %p7636_p7 }
  0x5d   :  { %7646 = shalt.err (!%p7643_p11)
}
  0x5e   :  { %65 = dma.hbm_to_vmem [thread:$0]  %s9134_s3, 512, %s60_s6, [#allocation6], %s7749_s18, %s7749_s18, %s7750_s19  }
  0x5f   :  { %s7647_s0 = scalar_lea.hbm %s9138_s7, 512 }
  0x60   :  { %p7648_p12 = scmp.ne.s32.totalorder %s9138_s7, %s7647_s0  ;;  %p7651_p13 = scmp.lt.u32.totalorder %s7647_s0, %s9138_s7 }
  0x62   :  { %p7653_p0 = pnand %p7651_p13, %p7648_p12 }
  0x64   :  { %7656 = shalt.err (!%p7653_p0)
}
  0x65   :  { %s7657_s26 = scalar_lea.vmem %s7926_s2, 512  ;;  %p7662_p2 = scmp.lt.s32.totalorder %s7926_s2, %s7926_s2 }
  0x66   :  { %p7658_p1 = scmp.ne.s32.totalorder %s7926_s2, %s7657_s26  ;;  %p7663_p3 = scmp.lt.s32.totalorder %s7657_s26, %s7657_s26 }
  0x68   :  { %p7664_p4 = por %p7663_p3, %p7662_p2 }
  0x6a   :  { %p7665_p5 = pnand %p7664_p4, %p7658_p1 }
  0x6c   :  { %7668 = shalt.err (!%p7665_p5)
}
  0x6d   :  { %93 = dma.hbm_to_vmem [thread:$0]  %s9138_s7, 512, %s7926_s2, [#allocation9], %s7749_s18, %s7749_s18, %s7750_s19  }
  0x6e   :  { %s7755_s27 = smov [#allocation13]   ;;  %s7669_s21 = scalar_lea.hbm %s9144_s13, 512 }
  0x6f   :  { %s119_s28 = sshll.u32 %s7755_s27, 4  ;;  %p7670_p6 = scmp.ne.s32.totalorder %s9144_s13, %s7669_s21  ;;  %s120_s28 = int_to_ptr.vmem [resolvable:$true] %s119_s28 }
  0x70   :  { %p7673_p7 = scmp.lt.u32.totalorder %s7669_s21, %s9144_s13 }
  0x72   :  { %p7675_p8 = pnand %p7673_p7, %p7670_p6 }
  0x74   :  { %7678 = shalt.err (!%p7675_p8)
}
  0x75   :  { %s7679_s24 = scalar_lea.vmem %s120_s28, 512  ;;  %p7684_p10 = scmp.lt.s32.totalorder %s120_s28, %s120_s28 }
  0x76   :  { %p7680_p9 = scmp.ne.s32.totalorder %s120_s28, %s7679_s24  ;;  %p7685_p11 = scmp.lt.s32.totalorder %s7679_s24, %s7679_s24 }
  0x78   :  { %p7686_p12 = por %p7685_p11, %p7684_p10 }
  0x7a   :  { %p7687_p13 = pnand %p7686_p12, %p7680_p9 }
  0x7c   :  { %7690 = shalt.err (!%p7687_p13)
}
  0x7d   :  { %125 = dma.hbm_to_vmem [thread:$0]  %s9144_s13, 512, %s120_s28, [#allocation12], %s7749_s18, %s7749_s18, %s7750_s19  }
  0x7e   :  { %7735 = dma.done.wait [#allocation3], 256  }
  0x7f   :  { %7736 = vsyncadd [#allocation3], 4294967040 }
  0x80   :  { %7737 = dma.done.wait [#allocation6], 1024  }
  0x81   :  { %7738 = vsyncadd [#allocation6], 4294966272 }
  0x82   :  { %7739 = dma.done.wait [#allocation9], 1024  }
  0x83   :  { %7740 = vsyncadd [#allocation9], 4294966272 }
  0x84   :  { %7741 = dma.done.wait [#allocation12], 1024  }
  0x85   :  { %7742 = vsyncadd [#allocation12], 4294966272  ;;  %v7756_v0 = vmov 0.0|0.0   ;;  %vm7757_vm0 = vmmov 0   ;;  %v7758_v1 = vmov 0.0   ;;  %v157_v2 = vld [vmem:[#allocation5] sm:$0xff]  ;;  %v250_v39 = vlaneseq }
  0x86   :  { %7027 = vmatprep.subr.bf16.mxu1 %v7756_v0  ;;  %6499 = vmatprep.mubr.msk.f32.mxu1 %vm7757_vm0, %v7758_v1  ;;  %v158_v3 = vld [vmem:[#allocation5 + $0x8] sm:$0xff]  ;;  %v150_v4 = vld [vmem:[#allocation7] sm:$0xff]  ;;  %vm168_vm1 = vcmask 261120   ;;  %v159_v7 = vld [vmem:[#allocation5 + $0x10] sm:$0xff]  ;;  %v7759_v17 = vmov 0   ;;  %s7760_s25 = smov 64  }
  0x87   :  { %v7019_v5 = vpack.c.bf16 %v158_v3, %v157_v2  ;;  %v151_v6 = vld [vmem:[#allocation7 + $0x8] sm:$0xff]  ;;  %v160_v8 = vld [vmem:[#allocation5 + $0x18] sm:$0xff]  ;;  %v152_v11 = vld [vmem:[#allocation7 + $0x10] sm:$0xff]  ;;  %7335 = vset.pattern.permute.xlu1 %v7759_v17  ;;  %7336 = vset.pattern.permute.xlu0 %v7759_v17  ;;  %v7762_v40 = vmov 1966171168   ;;  %v8033_v42 = vshrl.u32 %v250_v39, 7 }
  0x88   :  { %v7981_v9 = vpack.c.bf16 %v151_v6, %v150_v4  ;;  %v7023_v10 = vpack.c.bf16 %v160_v8, %v159_v7  ;;  %v153_v12 = vld [vmem:[#allocation7 + $0x18] sm:$0xff]  ;;  %v155_v13 = vld [vmem:[#allocation2] sm:$0xff]  ;;  %v367_v41 = vunpack.c.l.s4 %v7762_v40 }
  0x89   :  { %7020 = vmatprep.subr.bf16.mxu0 %v7019_v5  ;;  %6488 = vmatprep.mubr.msk.f32.mxu0 %vm168_vm1, %v155_v13  ;;  %v7985_v14 = vpack.c.bf16 %v153_v12, %v152_v11  ;;  %v156_v15 = vld [vmem:[#allocation2 + $0x8] sm:$0xff]  ;;  %v8008_v16 = vld [vmem:[%s9132_s1] sm:$0x3]  ;;  %v8045_v53 = vsub.s32 0, %v8033_v42  ;;  %vm364_vm4 = vcmp.eq.s32.totalorder %v8033_v42, 0 }
  0x8a   :  { %7029 = vmatpush3.bf16.msra.mxu1 %v7981_v9  ;;  %7022 = vmatpush3.bf16.msra.mxu0 %v7019_v5  ;;  %vm357_vm2 = vcmp.gt.s32.totalorder %v8008_v16, 0  ;;  %v8017_v19 = vld [vmem:[%s9136_s5] ss:$0 sm:$0xff]  ;;  %v368_v43 = vunpack.c.0.s8 %v367_v41  ;;  %vm504_vm5 = vcmp.gt.s32.totalorder %v8008_v16, 1  ;;  %s7763_s5 = smov 32   ;;  %vm667_vm7 = vcmp.gt.s32.totalorder %v8008_v16, 2 }
  0x8b   :  { %7030 = vmatprep.subr.bf16.mxu1 %v7756_v0  ;;  %7024 = vmatprep.subr.bf16.mxu0 %v7023_v10  ;;  %v358_v18 = vsel %vm357_vm2, 1, %v7759_v17  ;;  %v6155_v22 = vld [vmem:[%s9135_s4] ss:$0 sm:$0xff]  ;;  %s7761_s4 = smov 96   ;;  %v505_v7 = vsel %vm504_vm5, 1, %v7759_v17  ;;  %vm821_vm9 = vcmp.gt.s32.totalorder %v8008_v16, 3 }
  0x8c   :  { %360 = vperm.xlu1 %7335, %v358_v18   ;;  %v8036_v48 = vsub.s32 %v368_v43, %v8033_v42  ;;  %vm972_vm11 = vcmp.gt.s32.totalorder %v8008_v16, 4  ;;  %vm1129_vm13 = vcmp.gt.s32.totalorder %v8008_v16, 5  ;;  %vm1292_vm15 = vcmp.gt.s32.totalorder %v8008_v16, 6 }
  0x8e   :  { %7032 = vmatpush3.bf16.msra.mxu1 %v7985_v14  ;;  %7026 = vmatpush3.bf16.msra.mxu0 %v7023_v10 }
  0x8f   :  { %7033 = vmatprep.subr.bf16.mxu0 %v7756_v0  ;;  %7039 = vmatprep.subr.bf16.mxu1 %v7756_v0 }
  0x91   :  { %6500 = vmatmul.mubr.f32.vlgmr.msra.gmra.mrb[0].mxu1 %v7758_v1  ;;  %6489 = vmatmul.mubr.msk.f32.vlgmr.msra.gmra.mrb[0].mxu0 %vm168_vm1, %v156_v15 }
  0x92   :  { %7035 = vmatpush3.bf16.msra.mxu0 %v7981_v9  ;;  %6510 = vmatprep.mubr.msk.f32.mxu0 %vm7757_vm0, %v7758_v1 }
  0x93   :  { %7036 = vmatprep.subr.bf16.mxu0 %v7756_v0  ;;  %7041 = vmatpush3.bf16.msra.mxu1 %v7981_v9 }
  0x94   :  { %7042 = vmatprep.subr.bf16.mxu1 %v7756_v0  ;;  %6521 = vmatprep.mubr.msk.f32.mxu1 %vm7757_vm0, %v7758_v1 }
  0x96   :  { %7038 = vmatpush3.bf16.msra.mxu0 %v7985_v14 }
  0x97   :  { %7044 = vmatpush3.bf16.msra.mxu1 %v7985_v14  ;;  %7045 = vmatprep.subr.bf16.mxu0 %v7756_v0 }
  0x98   :  { %7051 = vmatprep.subr.bf16.mxu1 %v7756_v0 }
 0x10b   :  { %v361_v38 = vpop.permute.xlu1 %360 }
 0x10c   :  { %vm362_vm3 = vcmp.eq.s32.totalorder %v361_v38, 1 }
 0x164   :  { %v327_v20 = vpop.f32.mrb[0].mxu1  ;;  %v6490_v21 = vpop.f32.mrb[0].mxu0 }
 0x165   :  { %v328_v23 = vadd.f32 %v8017_v19, %v327_v20  ;;  %v8023_v24 = vadd.f32 %v6490_v21, %v6155_v22  ;;  %v6501_v25 = vpop.f32.mrb[1].mxu1  ;;  %v241_v26 = vpop.f32.mrb[1].mxu0 }
 0x166   :  { %v8026_v27 = vadd.f32 %v6155_v22, %v241_v26 }
 0x167   :  { %339 = vrot.lane.b32.xlu0 %v328_v23, %s7760_s25 }
 0x168   :  { %v331_v28 = vadd.f32 %v328_v23, %v8026_v27 }
 0x16a   :  { %v6159_v29 = vmul.f32 -1.442695, %v331_v28 }
 0x16c   :  { %7337 = vpow2.f32 %v6159_v29 }
 0x176   :  { %v7338_v30 = vpop.eup %7337 }
 0x177   :  { %v335_v31 = vadd.f32 1.0, %v7338_v30 }
 0x179   :  { %7339 = vrcp.f32 %v335_v31 }
 0x183   :  { %v7340_v32 = vpop.eup %7339 }
 0x184   :  { %v349_v44 = vsub.f32 1.0, %v7340_v32  ;;  %v355_v47 = vmul.f32 0.0, %v7340_v32 }
 0x1d9   :  { %v340_v33 = vpop.permute.xlu0 %339 }
 0x1da   :  { %v342_v34 = vmul.f32 %v7340_v32, %v340_v33 }
 0x1dc   :  { %344 = vrot.lane.b32.xlu0 %v342_v34, %s7760_s25 }
 0x24e   :  { %v345_v35 = vpop.permute.xlu0 %344 }
 0x24f   :  { %v347_v36 = vadd.f32 %v345_v35, %v8026_v27 }
 0x251   :  { %7341 = vtanh.f32 %v347_v36 }
 0x25b   :  { %v7342_v37 = vpop.eup %7341 }
 0x25c   :  { %351 = vrot.lane.b32.xlu1 %v7342_v37, %s7761_s4 }
 0x2ce   :  { %v352_v45 = vpop.permute.xlu1 %351 }
 0x2cf   :  { %v354_v46 = vmul.f32 %v352_v45, %v349_v44  ;;  %v668_v45 = vsel %vm667_vm7, 1, %v7759_v17 }
 0x2d1   :  { %v356_v49 = vadd.f32 %v355_v47, %v354_v46 }
 0x2d3   :  { %v363_v50 = vsel %vm362_vm3, %v356_v49, 0.0  ;;  %vm1446_vm3 = vcmp.gt.s32.totalorder %v8008_v16, 7 }
 0x2d4   :  { %400 = vrot.lane.b32.xlu0 %v363_v50, %s7761_s4  ;;  %v8040_v51 = vrot.slane %v363_v50, %v8036_v48  ;;  %v500_v12 = vrot.slane %v363_v50, 6 }
 0x2d6   :  { %v373_v52 = vcombine.high %v8040_v51, %v8040_v51 }
 0x2d8   :  { %v387_v54 = vrot.slane %v373_v52, %v8036_v48 }
 0x2da   :  { %v395_v55 = vrot.slane %v387_v54, %v8045_v53 }
 0x2dc   :  { %v8052_v56 = vsel %vm364_vm4, %v395_v55, 0.0 }
 0x346   :  { %v401_v57 = vpop.permute.xlu0 %400 }
 0x347   :  { %6511 = vmatmul.mubr.msk.f32.vlgmr.msra.gmra.mrb[2].mxu0 %vm168_vm1, %v401_v57 }
 0x348   :  { %7047 = vmatpush3.bf16.msra.mxu0 %v7981_v9  ;;  %6532 = vmatprep.mubr.msk.f32.mxu0 %vm7757_vm0, %v7758_v1 }
 0x349   :  { %7048 = vmatprep.subr.bf16.mxu0 %v7756_v0 }
 0x34c   :  { %7050 = vmatpush3.bf16.msra.mxu0 %v7985_v14 }
 0x34d   :  { %7057 = vmatprep.subr.bf16.mxu0 %v7756_v0 }
 0x41a   :  { %v470_v58 = vpop.f32.mrb[2].mxu0 }
 0x41b   :  { %v471_v59 = vadd.f32 %v8017_v19, %v470_v58  ;;  %v6512_v60 = vpop.f32.mrb[3].mxu0 }
 0x41d   :  { %v475_v61 = vrot.slane %v471_v59, 6 }
 0x41f   :  { %484 = vrot.lane.b32.xlu1 %v475_v61, %s7760_s25  ;;  %v477_v62 = vadd.f32 %v475_v61, %v8026_v27 }
 0x421   :  { %v6161_v63 = vmul.f32 -1.442695, %v477_v62 }
 0x423   :  { %7343 = vpow2.f32 %v6161_v63 }
 0x42d   :  { %v7344_v2 = vpop.eup %7343 }
 0x42e   :  { %v481_v3 = vadd.f32 1.0, %v7344_v2 }
 0x430   :  { %7345 = vrcp.f32 %v481_v3 }
 0x43a   :  { %v7346_v4 = vpop.eup %7345 }
 0x43b   :  { %v494_v13 = vsub.f32 1.0, %v7346_v4  ;;  %v502_v20 = vmul.f32 %v7346_v4, %v500_v12 }
 0x491   :  { %v485_v5 = vpop.permute.xlu1 %484 }
 0x492   :  { %v487_v6 = vmul.f32 %v7346_v4, %v485_v5 }
 0x494   :  { %489 = vrot.lane.b32.xlu0 %v487_v6, %s7760_s25 }
 0x498   :  { %507 = vperm.xlu0 %7336, %v505_v7  }
 0x506   :  { %v490_v8 = vpop.permute.xlu0 %489 }
 0x507   :  { %v492_v10 = vadd.f32 %v490_v8, %v8026_v27 }
 0x509   :  { %7347 = vtanh.f32 %v492_v10 }
 0x513   :  { %v7348_v11 = vpop.eup %7347 }
 0x514   :  { %496 = vrot.lane.b32.xlu1 %v7348_v11, %s7761_s4 }
 0x517   :  { %v8070_v23 = vpop.permute.xlu0 %507 }
 0x518   :  { %vm509_vm6 = vcmp.eq.s32.totalorder %v8070_v23, 1 }
 0x586   :  { %v497_v15 = vpop.permute.xlu1 %496 }
 0x587   :  { %v499_v18 = vmul.f32 %v497_v15, %v494_v13  ;;  %v822_v15 = vsel %vm821_vm9, 1, %v7759_v17  ;;  %vm980_vm9 = vcmp.eq.s32.totalorder %v8033_v42, 4 }
 0x589   :  { %v503_v21 = vadd.f32 %v502_v20, %v499_v18 }
 0x58b   :  { %v511_v22 = vrot.slane %v503_v21, 2 }
 0x58d   :  { %512 = vrot.lane.b32.xlu1 %v511_v22, %s7761_s4 }
 0x5ff   :  { %v8073_v25 = vpop.permute.xlu1 %512 }
 0x600   :  { %v516_v26 = vsel %vm509_vm6, %v8073_v25, %v401_v57 }
 0x601   :  { %6522 = vmatmul.mubr.msk.f32.vlgmr.msra.gmra.mrb[2].mxu1 %vm168_vm1, %v516_v26  ;;  %v661_v40 = vrot.slane %v516_v26, 4 }
 0x602   :  { %7053 = vmatpush3.bf16.msra.mxu1 %v7981_v9  ;;  %6543 = vmatprep.mubr.msk.f32.mxu1 %vm7757_vm0, %v7758_v1 }
 0x603   :  { %7054 = vmatprep.subr.bf16.mxu1 %v7756_v0 }
 0x606   :  { %7056 = vmatpush3.bf16.msra.mxu1 %v7985_v14 }
 0x607   :  { %7063 = vmatprep.subr.bf16.mxu1 %v7756_v0 }
 0x6d4   :  { %v631_v28 = vpop.f32.mrb[2].mxu1 }
 0x6d5   :  { %v632_v29 = vadd.f32 %v8017_v19, %v631_v28  ;;  %v6523_v30 = vpop.f32.mrb[3].mxu1 }
 0x6d7   :  { %v636_v31 = vrot.slane %v632_v29, 4 }
 0x6d9   :  { %645 = vrot.lane.b32.xlu1 %v636_v31, %s7760_s25  ;;  %v638_v32 = vadd.f32 %v636_v31, %v8026_v27 }
 0x6db   :  { %v6163_v33 = vmul.f32 -1.442695, %v638_v32 }
 0x6dd   :  { %7349 = vpow2.f32 %v6163_v33 }
 0x6e7   :  { %v7350_v34 = vpop.eup %7349 }
 0x6e8   :  { %v642_v35 = vadd.f32 1.0, %v7350_v34 }
 0x6ea   :  { %7351 = vrcp.f32 %v642_v35  ;;  %v973_v35 = vsel %vm972_vm11, 1, %v7759_v17  ;;  %vm1305_vm11 = vcmp.eq.s32.totalorder %v8033_v42, 6 }
 0x6f4   :  { %v7352_v36 = vpop.eup %7351 }
 0x6f5   :  { %v655_v47 = vsub.f32 1.0, %v7352_v36 }
 0x74b   :  { %v646_v37 = vpop.permute.xlu1 %645 }
 0x74c   :  { %v648_v38 = vmul.f32 %v7352_v36, %v646_v37 }
 0x74e   :  { %650 = vrot.lane.b32.xlu0 %v648_v38, %s7760_s25 }
 0x752   :  { %662 = vrot.lane.b32.xlu0 %v661_v40, %s7763_s5 }
 0x7c0   :  { %v651_v41 = vpop.permute.xlu0 %650 }
 0x7c1   :  { %v653_v43 = vadd.f32 %v651_v41, %v8026_v27 }
 0x7c3   :  { %7353 = vtanh.f32 %v653_v43 }
 0x7c4   :  { %v663_v46 = vpop.permute.xlu0 %662 }
 0x7c5   :  { %v665_v50 = vmul.f32 %v7352_v36, %v663_v46 }
 0x7cd   :  { %v7354_v44 = vpop.eup %7353 }
 0x7ce   :  { %657 = vrot.lane.b32.xlu1 %v7354_v44, %s7761_s4 }
 0x7d2   :  { %670 = vperm.xlu1 %7335, %v668_v45  }
 0x840   :  { %v658_v49 = vpop.permute.xlu1 %657 }
 0x841   :  { %v660_v52 = vmul.f32 %v658_v49, %v655_v47 }
 0x843   :  { %v666_v54 = vadd.f32 %v665_v50, %v660_v52 }
 0x845   :  { %v674_v55 = vrot.slane %v666_v54, 4 }
 0x847   :  { %675 = vrot.lane.b32.xlu0 %v674_v55, %s7761_s4 }
 0x851   :  { %v8095_v57 = vpop.permute.xlu1 %670 }
 0x852   :  { %vm672_vm8 = vcmp.eq.s32.totalorder %v8095_v57, 1 }
 0x8b9   :  { %v8098_v58 = vpop.permute.xlu0 %675 }
 0x8ba   :  { %v678_v59 = vsel %vm672_vm8, %v8098_v58, %v516_v26 }
 0x8bb   :  { %6533 = vmatmul.mubr.msk.f32.vlgmr.msra.gmra.mrb[4].mxu0 %vm168_vm1, %v678_v59  ;;  %v815_v10 = vrot.slane %v678_v59, 2 }
 0x8bc   :  { %7059 = vmatpush3.bf16.msra.mxu0 %v7981_v9  ;;  %6554 = vmatprep.mubr.msk.f32.mxu0 %vm7757_vm0, %v7758_v1 }
 0x8bd   :  { %7060 = vmatprep.subr.bf16.mxu0 %v7756_v0 }
 0x8c0   :  { %7062 = vmatpush3.bf16.msra.mxu0 %v7985_v14 }
 0x8c1   :  { %7069 = vmatprep.subr.bf16.mxu0 %v7756_v0 }
 0x98e   :  { %v785_v60 = vpop.f32.mrb[4].mxu0 }
 0x98f   :  { %v786_v61 = vadd.f32 %v8017_v19, %v785_v60  ;;  %v6534_v62 = vpop.f32.mrb[5].mxu0 }
 0x991   :  { %v790_v63 = vrot.slane %v786_v61, 2 }
 0x993   :  { %799 = vrot.lane.b32.xlu1 %v790_v63, %s7760_s25  ;;  %v792_v2 = vadd.f32 %v790_v63, %v8026_v27 }
 0x995   :  { %v6165_v3 = vmul.f32 -1.442695, %v792_v2 }
 0x997   :  { %7355 = vpow2.f32 %v6165_v3 }
 0x9a1   :  { %v7356_v4 = vpop.eup %7355 }
 0x9a2   :  { %v796_v5 = vadd.f32 1.0, %v7356_v4 }
 0x9a4   :  { %7357 = vrcp.f32 %v796_v5 }
 0x9ae   :  { %v7358_v6 = vpop.eup %7357 }
 0x9af   :  { %v809_v20 = vsub.f32 1.0, %v7358_v6 }
 0xa05   :  { %v800_v7 = vpop.permute.xlu1 %799 }
 0xa06   :  { %v802_v8 = vmul.f32 %v7358_v6, %v800_v7 }
 0xa08   :  { %804 = vrot.lane.b32.xlu0 %v802_v8, %s7760_s25 }
 0xa0c   :  { %816 = vrot.lane.b32.xlu0 %v815_v10, %s7763_s5 }
 0xa7a   :  { %v805_v11 = vpop.permute.xlu0 %804 }
 0xa7b   :  { %v807_v12 = vadd.f32 %v805_v11, %v8026_v27 }
 0xa7d   :  { %7359 = vtanh.f32 %v807_v12 }
 0xa7e   :  { %v817_v18 = vpop.permute.xlu0 %816 }
 0xa7f   :  { %v819_v22 = vmul.f32 %v7358_v6, %v817_v18 }
 0xa87   :  { %v7360_v13 = vpop.eup %7359 }
 0xa88   :  { %811 = vrot.lane.b32.xlu1 %v7360_v13, %s7761_s4 }
 0xa8c   :  { %824 = vperm.xlu1 %7335, %v822_v15  }
 0xafa   :  { %v812_v21 = vpop.permute.xlu1 %811 }
 0xafb   :  { %v814_v26 = vmul.f32 %v812_v21, %v809_v20 }
 0xafd   :  { %v820_v28 = vadd.f32 %v819_v22, %v814_v26 }
 0xaff   :  { %v828_v29 = vrot.slane %v820_v28, 6 }
 0xb01   :  { %829 = vrot.lane.b32.xlu0 %v828_v29, %s7761_s4 }
 0xb0b   :  { %v8120_v30 = vpop.permute.xlu1 %824 }
 0xb0c   :  { %vm826_vm10 = vcmp.eq.s32.totalorder %v8120_v30, 1 }
 0xb73   :  { %v8123_v27 = vpop.permute.xlu0 %829 }
 0xb74   :  { %v832_v31 = vsel %vm826_vm10, %v8123_v27, %v678_v59 }
 0xb75   :  { %6544 = vmatmul.mubr.msk.f32.vlgmr.msra.gmra.mrb[4].mxu1 %vm168_vm1, %v832_v31 }
 0xb76   :  { %7065 = vmatpush3.bf16.msra.mxu1 %v7981_v9  ;;  %6565 = vmatprep.mubr.msk.f32.mxu1 %vm7757_vm0, %v7758_v1 }
 0xb77   :  { %7066 = vmatprep.subr.bf16.mxu1 %v7756_v0 }
 0xb7a   :  { %7068 = vmatpush3.bf16.msra.mxu1 %v7985_v14 }
 0xb7b   :  { %7075 = vmatprep.subr.bf16.mxu1 %v7756_v0 }
 0xc48   :  { %v939_v32 = vpop.f32.mrb[4].mxu1 }
 0xc49   :  { %v940_v33 = vadd.f32 %v8017_v19, %v939_v32  ;;  %v6545_v34 = vpop.f32.mrb[5].mxu1 }
 0xc4b   :  { %951 = vrot.lane.b32.xlu1 %v940_v33, %s7760_s25  ;;  %v943_v36 = vadd.f32 %v940_v33, %v8023_v24 }
 0xc4d   :  { %v6167_v37 = vmul.f32 -1.442695, %v943_v36 }
 0xc4f   :  { %975 = vperm.xlu1 %7335, %v973_v35   ;;  %7361 = vpow2.f32 %v6167_v37 }
 0xc53   :  { %967 = vrot.lane.b32.xlu1 %v832_v31, %s7763_s5 }
 0xc59   :  { %v7362_v38 = vpop.eup %7361 }
 0xc5a   :  { %v947_v40 = vadd.f32 1.0, %v7362_v38 }
 0xc5c   :  { %7363 = vrcp.f32 %v947_v40 }
 0xc66   :  { %v7364_v41 = vpop.eup %7363 }
 0xc67   :  { %v961_v52 = vsub.f32 1.0, %v7364_v41 }
 0xcbd   :  { %v952_v43 = vpop.permute.xlu1 %951 }
 0xcbe   :  { %v954_v44 = vmul.f32 %v7364_v41, %v952_v43 }
 0xcc0   :  { %956 = vrot.lane.b32.xlu0 %v954_v44, %s7760_s25 }
 0xcce   :  { %v976_v49 = vpop.permute.xlu1 %975 }
 0xccf   :  { %vm977_vm12 = vcmp.eq.s32.totalorder %v976_v49, 1 }
 0xcd2   :  { %v968_v50 = vpop.permute.xlu1 %967 }
 0xcd3   :  { %v970_v55 = vmul.f32 %v7364_v41, %v968_v50 }
 0xd32   :  { %v957_v45 = vpop.permute.xlu0 %956 }
 0xd33   :  { %v959_v46 = vadd.f32 %v957_v45, %v8023_v24 }
 0xd35   :  { %7365 = vtanh.f32 %v959_v46 }
 0xd3f   :  { %v7366_v47 = vpop.eup %7365 }
 0xd40   :  { %963 = vrot.lane.b32.xlu0 %v7366_v47, %s7761_s4 }
 0xdb2   :  { %v964_v54 = vpop.permute.xlu0 %963 }
 0xdb3   :  { %v966_v59 = vmul.f32 %v964_v54, %v961_v52 }
 0xdb5   :  { %v971_v60 = vadd.f32 %v970_v55, %v966_v59  ;;  %v1293_v55 = vsel %vm1292_vm15, 1, %v7759_v17  ;;  %vm2087_vm15 = vcmask 1041408  }
 0xdb7   :  { %v8144_v61 = vsel %vm977_vm12, %v971_v60, 0.0  ;;  %v978_v62 = vsel %vm977_vm12, %v971_v60, %v968_v50  ;;  %vm1459_vm12 = vcmp.eq.s32.totalorder %v8033_v42, 7 }
 0xdb8   :  { %1025 = vrot.lane.b32.xlu0 %v978_v62, %s7761_s4  ;;  %v1125_v20 = vrot.slane %v978_v62, 6 }
 0xe2a   :  { %v1026_v63 = vpop.permute.xlu0 %1025 }
 0xe2b   :  { %6555 = vmatmul.mubr.msk.f32.vlgmr.msra.gmra.mrb[6].mxu0 %vm168_vm1, %v1026_v63 }
 0xe2c   :  { %7071 = vmatpush3.bf16.msra.mxu0 %v7981_v9  ;;  %6576 = vmatprep.mubr.msk.f32.mxu0 %vm7757_vm0, %v7758_v1 }
 0xe2d   :  { %7072 = vmatprep.subr.bf16.mxu0 %v7756_v0 }
 0xe30   :  { %7074 = vmatpush3.bf16.msra.mxu0 %v7985_v14  ;;  %v1130_v14 = vsel %vm1129_vm13, 1, %v7759_v17  ;;  %vm1766_vm13 = vcmask 1041409  }
 0xe31   :  { %7081 = vmatprep.subr.bf16.mxu0 %v7756_v0 }
 0xefe   :  { %v1095_v2 = vpop.f32.mrb[6].mxu0 }
 0xeff   :  { %v1096_v3 = vadd.f32 %v8017_v19, %v1095_v2  ;;  %v6556_v4 = vpop.f32.mrb[7].mxu0 }
 0xf01   :  { %v1100_v5 = vrot.slane %v1096_v3, 6 }
 0xf03   :  { %1109 = vrot.lane.b32.xlu1 %v1100_v5, %s7760_s25  ;;  %v1102_v6 = vadd.f32 %v1100_v5, %v8023_v24 }
 0xf05   :  { %v6169_v7 = vmul.f32 -1.442695, %v1102_v6 }
 0xf07   :  { %7367 = vpow2.f32 %v6169_v7 }
 0xf11   :  { %v7368_v9 = vpop.eup %7367 }
 0xf12   :  { %v1106_v8 = vadd.f32 1.0, %v7368_v9 }
 0xf14   :  { %7369 = vrcp.f32 %v1106_v8 }
 0xf1e   :  { %v7370_v10 = vpop.eup %7369 }
 0xf1f   :  { %v1119_v21 = vsub.f32 1.0, %v7370_v10  ;;  %v1127_v28 = vmul.f32 %v7370_v10, %v1125_v20 }
 0xf75   :  { %v1110_v11 = vpop.permute.xlu1 %1109 }
 0xf76   :  { %v1112_v12 = vmul.f32 %v7370_v10, %v1110_v11 }
 0xf78   :  { %1114 = vrot.lane.b32.xlu0 %v1112_v12, %s7760_s25 }
 0xf7c   :  { %1132 = vperm.xlu0 %7336, %v1130_v14  }
 0xfea   :  { %v1115_v13 = vpop.permute.xlu0 %1114 }
 0xfeb   :  { %v1117_v15 = vadd.f32 %v1115_v13, %v8023_v24 }
 0xfed   :  { %7371 = vtanh.f32 %v1117_v15 }
 0xff7   :  { %v7372_v18 = vpop.eup %7371 }
 0xff8   :  { %1121 = vrot.lane.b32.xlu1 %v7372_v18, %s7761_s4 }
 0xffb   :  { %v8163_v32 = vpop.permute.xlu0 %1132 }
 0xffc   :  { %vm1134_vm14 = vcmp.eq.s32.totalorder %v8163_v32, 1 }
0x106a   :  { %v1122_v22 = vpop.permute.xlu1 %1121 }
0x106b   :  { %v1124_v26 = vmul.f32 %v1122_v22, %v1119_v21 }
0x106d   :  { %v1128_v29 = vadd.f32 %v1127_v28, %v1124_v26 }
0x106f   :  { %v1136_v31 = vrot.slane %v1128_v29, 2  ;;  %v1447_v29 = vsel %vm1446_vm3, 1, %v7759_v17 }
0x1071   :  { %1137 = vrot.lane.b32.xlu1 %v1136_v31, %s7761_s4  ;;  %v1495_v31 = vld [vmem:[#allocation8] sm:$0xff] }
0x10e3   :  { %v8166_v33 = vpop.permute.xlu1 %1137 }
0x10e4   :  { %v1141_v34 = vsel %vm1134_vm14, %v8166_v33, %v1026_v63 }
0x10e5   :  { %6566 = vmatmul.mubr.msk.f32.vlgmr.msra.gmra.mrb[6].mxu1 %vm168_vm1, %v1141_v34  ;;  %v1286_v49 = vrot.slane %v1141_v34, 4 }
0x10e6   :  { %6587 = vmatprep.mubr.msk.f32.mxu1 %vm7757_vm0, %v7758_v1 }
0x11b8   :  { %v1256_v35 = vpop.f32.mrb[6].mxu1 }
0x11b9   :  { %v1257_v36 = vadd.f32 %v8017_v19, %v1256_v35  ;;  %v6567_v37 = vpop.f32.mrb[7].mxu1  ;;  %v1499_v35 = vld [vmem:[#allocation10] sm:$0xff] }
0x11ba   :  { %v1500_v37 = vld [vmem:[#allocation10 + $0x8] sm:$0xff] }
0x11bb   :  { %v1261_v38 = vrot.slane %v1257_v36, 4 }
0x11bd   :  { %1270 = vrot.lane.b32.xlu0 %v1261_v38, %s7760_s25  ;;  %v1263_v40 = vadd.f32 %v1261_v38, %v8023_v24  ;;  %v1497_v38 = vld [vmem:[#allocation8 + $0x10] sm:$0xff] }
0x11bf   :  { %v6171_v41 = vmul.f32 -1.442695, %v1263_v40  ;;  %v1498_v40 = vld [vmem:[#allocation8 + $0x18] sm:$0xff] }
0x11c0   :  { %v8213_v16 = vpack.c.bf16 %v1498_v40, %v1497_v38 }
0x11c1   :  { %7373 = vpow2.f32 %v6171_v41  ;;  %v8210_v41 = vpack.c.bf16 %v1500_v37, %v1499_v35 }
0x11cb   :  { %v7374_v43 = vpop.eup %7373 }
0x11cc   :  { %v1267_v44 = vadd.f32 1.0, %v7374_v43  ;;  %v1502_v43 = vld [vmem:[#allocation10 + $0x18] sm:$0xff] }
0x11ce   :  { %7375 = vrcp.f32 %v1267_v44  ;;  %v8225_v44 = vand.u32 127, %v250_v39 }
0x11d0   :  { %vm1521_vm5 = vcmp.eq.s32.totalorder %v8225_v44, 1 }
0x11d8   :  { %v7376_v45 = vpop.eup %7375 }
0x11d9   :  { %v1280_v60 = vsub.f32 1.0, %v7376_v45 }
0x122f   :  { %v1271_v46 = vpop.permute.xlu0 %1270 }
0x1230   :  { %v1273_v47 = vmul.f32 %v7376_v45, %v1271_v46 }
0x1232   :  { %1275 = vrot.lane.b32.xlu1 %v1273_v47, %s7760_s25 }
0x1236   :  { %1287 = vrot.lane.b32.xlu1 %v1286_v49, %s7763_s5 }
0x12a4   :  { %v1276_v50 = vpop.permute.xlu1 %1275 }
0x12a5   :  { %v1278_v52 = vadd.f32 %v1276_v50, %v8023_v24 }
0x12a7   :  { %7377 = vtanh.f32 %v1278_v52 }
0x12a8   :  { %v1288_v59 = vpop.permute.xlu1 %1287 }
0x12a9   :  { %v1290_v63 = vmul.f32 %v7376_v45, %v1288_v59  ;;  %v6174_v45 = vsel %vm1521_vm5, 1.0, %v7758_v1 }
0x12b1   :  { %v7378_v54 = vpop.eup %7377 }
0x12b2   :  { %1282 = vrot.lane.b32.xlu0 %v7378_v54, %s7761_s4 }
0x12b6   :  { %1295 = vperm.xlu0 %7336, %v1293_v55  }
0x1324   :  { %v1283_v62 = vpop.permute.xlu0 %1282 }
0x1325   :  { %v1285_v2 = vmul.f32 %v1283_v62, %v1280_v60 }
0x1327   :  { %v1291_v3 = vadd.f32 %v1290_v63, %v1285_v2  ;;  %v8250_v2 = vld [vmem:[%s9140_s9] ss:$0 sm:$0xff] }
0x1329   :  { %v1299_v4 = vrot.slane %v1291_v3, 4  ;;  %v380_v3 = vrot.slane %v8040_v51, %v8036_v48 }
0x132b   :  { %1300 = vrot.lane.b32.xlu1 %v1299_v4, %s7761_s4 }
0x1335   :  { %v8184_v5 = vpop.permute.xlu0 %1295 }
0x1336   :  { %vm1297_vm2 = vcmp.eq.s32.totalorder %v8184_v5, 1 }
0x139d   :  { %v8187_v6 = vpop.permute.xlu1 %1300 }
0x139e   :  { %v8192_v7 = vsel %vm1297_vm2, %v8187_v6, %v1141_v34  ;;  %v1496_v34 = vld [vmem:[#allocation8 + $0x8] sm:$0xff] }
0x139f   :  { %6577 = vmatmul.mubr.msk.f32.vlgmr.msra.gmra.mrb[8].mxu0 %vm168_vm1, %v8192_v7  ;;  %v1440_v22 = vrot.slane %v8192_v7, 2  ;;  %v8208_v36 = vpack.c.bf16 %v1496_v34, %v1495_v31 }
0x13a0   :  { %6598 = vmatprep.mubr.msk.f32.mxu0 %vm7757_vm0, %v7758_v1  ;;  %7083 = vmatpush3.bf16.msra.mxu0 %v8210_v41 }
0x13a1   :  { %7077 = vmatpush3.bf16.msra.mxu1 %v8208_v36  ;;  %7084 = vmatprep.subr.bf16.mxu0 %v7756_v0 }
0x13a2   :  { %7078 = vmatprep.subr.bf16.mxu1 %v7756_v0 }
0x13a5   :  { %7080 = vmatpush3.bf16.msra.mxu1 %v8213_v16 }
0x13a6   :  { %7087 = vmatprep.subr.bf16.mxu1 %v7756_v0 }
0x13a8   :  { %6588 = vmatmul.mubr.msk.f32.vlgmr.msra.gmra.mrb[8].mxu1 %vm168_vm1, %v6174_v45 }
0x13a9   :  { %6609 = vmatprep.mubr.msk.f32.mxu1 %vm7757_vm0, %v7758_v1 }
0x1472   :  { %v1410_v9 = vpop.f32.mrb[8].mxu0 }
0x1473   :  { %v1411_v8 = vadd.f32 %v8017_v19, %v1410_v9  ;;  %v6578_v10 = vpop.f32.mrb[9].mxu0 }
0x1475   :  { %v1415_v11 = vrot.slane %v1411_v8, 2 }
0x1477   :  { %1424 = vrot.lane.b32.xlu0 %v1415_v11, %s7760_s25  ;;  %v1417_v12 = vadd.f32 %v1415_v11, %v8023_v24  ;;  %v8263_v11 = vld [vmem:[%s9139_s8] ss:$0 sm:$0xff] }
0x1479   :  { %v6173_v14 = vmul.f32 -1.442695, %v1417_v12 }
0x147b   :  { %7379 = vpow2.f32 %v6173_v14  ;;  %v1599_v62 = vpop.f32.mrb[8].mxu1 }
0x147c   :  { %v6589_v63 = vpop.f32.mrb[9].mxu1  ;;  %v1600_v51 = vadd.f32 %v8263_v11, %v1599_v62 }
0x1485   :  { %v7380_v13 = vpop.eup %7379 }
0x1486   :  { %v1421_v15 = vadd.f32 1.0, %v7380_v13 }
0x1488   :  { %7381 = vrcp.f32 %v1421_v15 }
0x1492   :  { %v7382_v18 = vpop.eup %7381 }
0x1493   :  { %v1434_v47 = vsub.f32 1.0, %v7382_v18 }
0x14e9   :  { %v1425_v20 = vpop.permute.xlu0 %1424 }
0x14ea   :  { %v1427_v21 = vmul.f32 %v7382_v18, %v1425_v20  ;;  %v679_v20 = vsel %vm672_vm8, %v8098_v58, 0.0  ;;  %vm834_vm8 = vcmp.eq.s32.totalorder %v8033_v42, 3 }
0x14ec   :  { %1429 = vrot.lane.b32.xlu1 %v1427_v21, %s7760_s25  ;;  %v833_v21 = vsel %vm826_vm10, %v8123_v27, 0.0  ;;  %vm1143_vm10 = vcmp.eq.s32.totalorder %v8033_v42, 5 }
0x14f0   :  { %1441 = vrot.lane.b32.xlu1 %v1440_v22, %s7763_s5 }
0x155e   :  { %v1430_v19 = vpop.permute.xlu1 %1429 }
0x155f   :  { %v1432_v26 = vadd.f32 %v1430_v19, %v8023_v24  ;;  %v1501_v24 = vld [vmem:[#allocation10 + $0x10] sm:$0xff]  ;;  %v688_v19 = vrot.slane %v679_v20, %v8036_v48 }
0x1560   :  { %v8217_v17 = vpack.c.bf16 %v1502_v43, %v1501_v24 }
0x1561   :  { %7383 = vtanh.f32 %v1432_v26  ;;  %v842_v26 = vrot.slane %v833_v21, %v8036_v48  ;;  %v696_v23 = vrot.slane %v688_v19, %v8036_v48  ;;  %v689_v24 = vcombine.high %v688_v19, %v688_v19 }
0x1562   :  { %7086 = vmatpush3.bf16.msra.mxu0 %v8217_v17  ;;  %v1442_v46 = vpop.permute.xlu1 %1441 }
0x1563   :  { %7093 = vmatprep.subr.bf16.mxu0 %v7756_v0  ;;  %v1444_v50 = vmul.f32 %v7382_v18, %v1442_v46  ;;  %v517_v18 = vsel %vm509_vm6, %v8073_v25, 0.0  ;;  %v850_v31 = vrot.slane %v842_v26, %v8036_v48  ;;  %vm680_vm6 = vcmp.eq.s32.totalorder %v8033_v42, 2 }
0x1564   :  { %v526_v22 = vrot.slane %v517_v18, %v8036_v48  ;;  %v707_v27 = vrot.slane %v696_v23, %v8045_v53  ;;  %v843_v43 = vcombine.high %v842_v26, %v842_v26  ;;  %v703_v46 = vrot.slane %v689_v24, %v8036_v48 }
0x1565   :  { %v861_v35 = vrot.slane %v850_v31, %v8045_v53 }
0x1566   :  { %v527_v40 = vcombine.high %v526_v22, %v526_v22 }
0x1568   :  { %v541_v45 = vrot.slane %v527_v40, %v8036_v48 }
0x156b   :  { %v7384_v28 = vpop.eup %7383 }
0x156c   :  { %1436 = vrot.lane.b32.xlu0 %v7384_v28, %s7761_s4  ;;  %v534_v28 = vrot.slane %v526_v22, %v8036_v48 }
0x156e   :  { %v545_v58 = vrot.slane %v534_v28, %v8045_v53 }
0x1570   :  { %1449 = vperm.xlu0 %7336, %v1447_v29  }
0x15de   :  { %v1437_v49 = vpop.permute.xlu0 %1436 }
0x15df   :  { %v1439_v52 = vmul.f32 %v1437_v49, %v1434_v47 }
0x15e1   :  { %v1445_v54 = vadd.f32 %v1444_v50, %v1439_v52  ;;  %v857_v50 = vrot.slane %v843_v43, %v8036_v48  ;;  %v549_v52 = vrot.slane %v541_v45, %v8045_v53 }
0x15e3   :  { %v1453_v55 = vrot.slane %v1445_v54, 6  ;;  %v711_v54 = vrot.slane %v703_v46, %v8045_v53 }
0x15e5   :  { %1454 = vrot.lane.b32.xlu1 %v1453_v55, %s7761_s4 }
0x15ef   :  { %v8235_v39 = vpop.permute.xlu0 %1449 }
0x15f0   :  { %vm1451_vm7 = vcmp.eq.s32.totalorder %v8235_v39, 1 }
0x1657   :  { %v8238_v59 = vpop.permute.xlu1 %1454 }
0x1658   :  { %v1457_v60 = vsel %vm1451_vm7, %v8238_v59, %v8192_v7  ;;  %v391_v7 = vrot.slane %v380_v3, %v8045_v53 }
0x1659   :  { %6599 = vmatmul.mubr.msk.f32.vlgmr.msra.gmra.mrb[10].mxu0 %vm168_vm1, %v1457_v60 }
0x165a   :  { %6620 = vmatprep.mubr.msk.f32.mxu0 %vm7757_vm0, %v7758_v1  ;;  %v398_v10 = vsel %vm364_vm4, %v391_v7, 0.0  ;;  %vm518_vm4 = vcmp.eq.s32.totalorder %v8033_v42, 1 }
0x172c   :  { %v1678_v4 = vpop.f32.mrb[10].mxu0 }
0x172d   :  { %v1679_v9 = vadd.f32 %v8250_v2, %v1678_v4  ;;  %v6600_v8 = vpop.f32.mrb[11].mxu0  ;;  %v988_v4 = vrot.slane %v8144_v61, %v8036_v48 }
0x172f   :  { %1690 = vrot.lane.b32.xlu0 %v1679_v9, %s7760_s25  ;;  %v1682_v12 = vadd.f32 %v1679_v9, %v1600_v51  ;;  %v989_v9 = vcombine.high %v988_v4, %v988_v4 }
0x1731   :  { %v6179_v14 = vmul.f32 -1.442695, %v1682_v12  ;;  %v1003_v8 = vrot.slane %v989_v9, %v8036_v48 }
0x1733   :  { %554 = vrot.lane.b32.xlu0 %v398_v10, %s7761_s4  ;;  %7385 = vpow2.f32 %v6179_v14  ;;  %v1011_v10 = vrot.slane %v1003_v8, %v8045_v53 }
0x173d   :  { %v7386_v13 = vpop.eup %7385 }
0x173e   :  { %v1686_v15 = vadd.f32 1.0, %v7386_v13  ;;  %v996_v13 = vrot.slane %v988_v4, %v8036_v48 }
0x1740   :  { %7387 = vrcp.f32 %v1686_v15  ;;  %v1007_v61 = vrot.slane %v996_v13, %v8045_v53 }
0x174a   :  { %v7388_v29 = vpop.eup %7387 }
0x174b   :  { %v1700_v14 = vsub.f32 1.0, %v7388_v29 }
0x17a1   :  { %v1691_v25 = vpop.permute.xlu0 %1690 }
0x17a2   :  { %v1693_v57 = vmul.f32 %v7388_v29, %v1691_v25 }
0x17a4   :  { %1695 = vrot.lane.b32.xlu1 %v1693_v57, %s7760_s25  ;;  %v1142_v57 = vsel %vm1134_vm14, %v8166_v33, 0.0  ;;  %vm1769_vm14 = vcmask 58368  }
0x17a5   :  { %v555_v30 = vpop.permute.xlu0 %554 }
0x17a6   :  { %v560_v34 = vsel %vm518_vm4, %v545_v58, %v555_v30  ;;  %v1304_v58 = vsel %vm1297_vm2, %v8187_v6, 0.0  ;;  %v1458_v30 = vsel %vm1451_vm7, %v8238_v59, 0.0 }
0x17a7   :  { %v714_v37 = vsel %vm680_vm6, %v707_v27, %v560_v34  ;;  %v1151_v27 = vrot.slane %v1142_v57, %v8036_v48  ;;  %v1313_v34 = vrot.slane %v1304_v58, %v8036_v48 }
0x17a8   :  { %556 = vrot.lane.b32.xlu1 %v8052_v56, %s7761_s4  ;;  %v868_v38 = vsel %vm834_vm8, %v861_v35, %v714_v37  ;;  %v1467_v35 = vrot.slane %v1458_v30, %v8036_v48 }
0x17a9   :  { %v1152_v37 = vcombine.high %v1151_v27, %v1151_v27 }
0x17aa   :  { %v1468_v40 = vcombine.high %v1467_v35, %v1467_v35 }
0x17ab   :  { %v1166_v32 = vrot.slane %v1152_v37, %v8036_v48 }
0x17ac   :  { %1706 = vrot.lane.b32.xlu1 %v1457_v60, %s7763_s5  ;;  %v865_v60 = vrot.slane %v857_v50, %v8045_v53  ;;  %v1482_v5 = vrot.slane %v1468_v40, %v8036_v48  ;;  %v1475_v50 = vrot.slane %v1467_v35, %v8036_v48 }
0x17ad   :  { %v1174_v6 = vrot.slane %v1166_v32, %v8045_v53 }
0x17ae   :  { %v1490_v24 = vrot.slane %v1482_v5, %v8045_v53  ;;  %v1509_v5 = vld [vmem:[#allocation11] sm:$0xff] }
0x1816   :  { %v1696_v47 = vpop.permute.xlu1 %1695 }
0x1817   :  { %v1698_v49 = vadd.f32 %v1696_v47, %v1600_v51  ;;  %v1159_v47 = vrot.slane %v1151_v27, %v8036_v48 }
0x1819   :  { %7389 = vtanh.f32 %v1698_v49  ;;  %v1321_v49 = vrot.slane %v1313_v34, %v8036_v48 }
0x181a   :  { %v557_v56 = vpop.permute.xlu1 %556 }
0x181b   :  { %v561_v55 = vsel %vm518_vm4, %v549_v52, %v557_v56  ;;  %v1170_v52 = vrot.slane %v1159_v47, %v8045_v53  ;;  %v1332_v56 = vrot.slane %v1321_v49, %v8045_v53  ;;  %v1505_v47 = vld [vmem:[%s9141_s10] sm:$0xff]  ;;  %v1506_v49 = vld [vmem:[%s9141_s10 + $0x8] sm:$0xff] }
0x181c   :  { %v715_v62 = vsel %vm680_vm6, %v711_v54, %v561_v55  ;;  %v1486_v55 = vrot.slane %v1475_v50, %v8045_v53  ;;  %v8409_v50 = vpack.c.bf16 %v1506_v49, %v1505_v47 }
0x181d   :  { %v869_v63 = vsel %vm834_vm8, %v865_v60, %v715_v62  ;;  %vm2122_vm8 = vcmp.eq.s32.totalorder %v8225_v44, 0 }
0x181e   :  { %1018 = vrot.lane.b32.xlu1 %v869_v63, %s7763_s5  ;;  %v1707_v7 = vpop.permute.xlu1 %1706  ;;  %7095 = vmatpush3.bf16.msra.mxu0 %v8409_v50 }
0x181f   :  { %v1709_v18 = vmul.f32 %v7388_v29, %v1707_v7  ;;  %7096 = vmatprep.subr.bf16.mxu0 %v7756_v0 }
0x1823   :  { %v7390_v3 = vpop.eup %7389 }
0x1824   :  { %1702 = vrot.lane.b32.xlu0 %v7390_v3, %s7761_s4 }
0x1828   :  { %1016 = vrot.lane.b32.xlu0 %v868_v38, %s7763_s5  ;;  %v1314_v38 = vcombine.high %v1313_v34, %v1313_v34 }
0x182a   :  { %v1328_v33 = vrot.slane %v1314_v38, %v8036_v48 }
0x182c   :  { %v1336_v39 = vrot.slane %v1328_v33, %v8045_v53 }
0x1890   :  { %v1019_v51 = vpop.permute.xlu1 %1018 }
0x1891   :  { %v1023_v12 = vsel %vm980_vm9, %v1011_v10, %v1019_v51  ;;  %v8376_v51 = vsub.s32 %v8225_v44, %v8033_v42 }
0x1892   :  { %1181 = vrot.lane.b32.xlu1 %v1023_v12, %s7761_s4 }
0x1896   :  { %v1703_v15 = vpop.permute.xlu0 %1702 }
0x1897   :  { %v1705_v20 = vmul.f32 %v1703_v15, %v1700_v14 }
0x1899   :  { %v8319_v21 = vadd.f32 %v1709_v18, %v1705_v20 }
0x189a   :  { %v1017_v22 = vpop.permute.xlu0 %1016 }
0x189b   :  { %v1022_v19 = vsel %vm980_vm9, %v1007_v61, %v1017_v22  ;;  %v1718_v26 = vrot.slane %v8319_v21, %v8036_v48  ;;  %v8383_v61 = vsub.s32 1, %v8033_v42 }
0x189c   :  { %1179 = vrot.lane.b32.xlu0 %v1022_v19, %s7761_s4 }
0x189d   :  { %v1726_v28 = vrot.slane %v1718_v26, %v8036_v48  ;;  %v1719_v23 = vcombine.high %v1718_v26, %v1718_v26 }
0x189f   :  { %v1737_v25 = vrot.slane %v1726_v28, %v8045_v53  ;;  %v1733_v31 = vrot.slane %v1719_v23, %v8036_v48 }
0x18a1   :  { %1742 = vrot.lane.b32.xlu0 %v1737_v25, %s7761_s4  ;;  %v1741_v29 = vrot.slane %v1733_v31, %v8045_v53 }
0x18a3   :  { %1744 = vrot.lane.b32.xlu1 %v1741_v29, %s7761_s4 }
0x1904   :  { %v1182_v59 = vpop.permute.xlu1 %1181 }
0x1905   :  { %v1186_v43 = vsel %vm1143_vm10, %v1174_v6, %v1182_v59  ;;  %v1510_v6 = vld [vmem:[#allocation11 + $0x8] sm:$0xff] }
0x1906   :  { %v1340_v45 = vsel %vm1305_vm11, %v1336_v39, %v1186_v43  ;;  %v8393_v39 = vpack.c.bf16 %v1510_v6, %v1509_v5  ;;  %v1512_v43 = vld [vmem:[#allocation11 + $0x18] sm:$0xff] }
0x1907   :  { %v8356_v46 = vsel %vm1459_vm12, %v1490_v24, %v1340_v45  ;;  %v1511_v24 = vld [vmem:[#allocation11 + $0x10] sm:$0xff] }
0x1908   :  { %7089 = vmatpush3.bf16.msra.mxu1 %v8393_v39  ;;  %v8397_v45 = vpack.c.bf16 %v1512_v43, %v1511_v24 }
0x1909   :  { %7090 = vmatprep.subr.bf16.mxu1 %v7756_v0 }
0x190c   :  { %7092 = vmatpush3.bf16.msra.mxu1 %v8397_v45 }
0x190d   :  { %7099 = vmatprep.subr.bf16.mxu1 %v7756_v0 }
0x190e   :  { %v1180_v54 = vpop.permute.xlu0 %1179 }
0x190f   :  { %v1185_v60 = vsel %vm1143_vm10, %v1170_v52, %v1180_v54  ;;  %v1507_v52 = vld [vmem:[%s9141_s10 + $0x10] sm:$0xff] }
0x1910   :  { %v1339_v62 = vsel %vm1305_vm11, %v1332_v56, %v1185_v60  ;;  %v1508_v56 = vld [vmem:[%s9141_s10 + $0x18] sm:$0xff]  ;;  %vm3263_vm11 = vcmp.eq.s32.totalorder %v8225_v44, 2 }
0x1911   :  { %v8368_v63 = vsel %vm1459_vm12, %v1486_v55, %v1339_v62  ;;  %v8419_v54 = vpack.c.bf16 %v1508_v56, %v1507_v52 }
0x1913   :  { %v1743_v3 = vpop.permute.xlu0 %1742  ;;  %7098 = vmatpush3.bf16.msra.mxu0 %v8419_v54 }
0x1914   :  { %v1748_v4 = vmul.f32 %v1743_v3, %v8368_v63  ;;  %7105 = vmatprep.subr.bf16.mxu0 %v7756_v0 }
0x1915   :  { %v1745_v9 = vpop.permute.xlu1 %1744 }
0x1916   :  { %v1749_v8 = vmul.f32 %v1745_v9, %v8356_v46  ;;  %v1750_v7 = vsel %vm168_vm1, %v1748_v4, 0.0 }
0x1917   :  { %1751 = vadd.xlane.f32.xlu0 %v1750_v7 }
0x1918   :  { %v1753_v10 = vsel %vm168_vm1, %v1749_v8, 0.0 }
0x1919   :  { %1754 = vadd.xlane.f32.xlu1 %v1753_v10 }
0x19a4   :  { %v1752_v12 = vpop.xlane.xlu0 %1751 }
0x19a5   :  { %v1761_v13 = vrot.slane %v1752_v12, %v8376_v51 }
0x19a6   :  { %v1755_v14 = vpop.xlane.xlu1 %1754 }
0x19a7   :  { %v1765_v15 = vrot.slane %v1755_v14, %v8376_v51 }
0x19a9   :  { %v1767_v18 = vsel %vm1766_vm13, %v1765_v15, %v1761_v13 }
0x19aa   :  { %v1770_v20 = vsel %vm1769_vm14, %v1767_v18, -inf }
0x19ab   :  { %1771 = vmax.xlane.f32.xlu0 %v1770_v20 }
0x1a38   :  { %v1772_v22 = vpop.xlane.xlu0 %1771 }
0x1a39   :  { %v1777_v19 = vrot.slane %v1772_v22, %v8045_v53  ;;  %v1781_v26 = vrot.slane %v1772_v22, %v8383_v61 }
0x1a3b   :  { %v1784_v28 = vsub.f32 %v1752_v12, %v1777_v19  ;;  %v1785_v23 = vsub.f32 %v1755_v14, %v1781_v26 }
0x1a3d   :  { %v1786_v25 = vmul.f32 1.442695, %v1784_v28  ;;  %v1788_v31 = vmul.f32 1.442695, %v1785_v23 }
0x1a3f   :  { %7391 = vpow2.f32 %v1786_v25  ;;  %v1514_v25 = vld [vmem:[#allocation13] sm:$0xff] }
0x1a40   :  { %7393 = vpow2.f32 %v1788_v31  ;;  %v1515_v31 = vld [vmem:[#allocation13 + $0x8] sm:$0xff] }
0x1a49   :  { %v7392_v29 = vpop.eup %7391 }
0x1a4a   :  { %v7394_v57 = vpop.eup %7393  ;;  %1793 = vperm.xlu0 %7336, %v7392_v29  }
0x1a4b   :  { %1796 = vperm.xlu1 %7335, %v7394_v57  }
0x1ac9   :  { %v1794_v58 = vpop.permute.xlu0 %1793 }
0x1aca   :  { %v1797_v30 = vpop.permute.xlu1 %1796  ;;  %v1801_v42 = vrot.slane %v1794_v58, %v8376_v51  ;;  %v1517_v58 = vld [vmem:[#allocation13 + $0x18] sm:$0xff] }
0x1acb   :  { %v1805_v27 = vrot.slane %v1797_v30, %v8376_v51 }
0x1acd   :  { %v1806_v34 = vsel %vm1766_vm13, %v1805_v27, %v1801_v42 }
0x1ace   :  { %v1808_v35 = vsel %vm1769_vm14, %v1806_v34, 0.0  ;;  %v8449_v34 = vld [vmem:[%s9143_s12] ss:$0 sm:$0xff] }
0x1acf   :  { %1809 = vadd.xlane.f32.xlu1 %v1808_v35 }
0x1b5c   :  { %v1810_v37 = vpop.xlane.xlu1 %1809 }
0x1b5d   :  { %7395 = vrcp.f32 %v1810_v37 }
0x1b67   :  { %v7396_v38 = vpop.eup %7395 }
0x1b68   :  { %v1816_v40 = vrot.slane %v7396_v38, %v8045_v53  ;;  %v1820_v33 = vrot.slane %v7396_v38, %v8383_v61 }
0x1b6a   :  { %v1823_v32 = vmul.f32 %v7392_v29, %v1816_v40  ;;  %v1824_v59 = vmul.f32 %v7394_v57, %v1820_v33  ;;  %v1516_v29 = vld [vmem:[#allocation13 + $0x10] sm:$0xff]  ;;  %v8438_v57 = vpack.c.bf16 %v1515_v31, %v1514_v25 }
0x1b6b   :  { %v8441_v30 = vpack.c.bf16 %v1517_v58, %v1516_v29  ;;  %v8469_v33 = vld [vmem:[%s9145_s14] ss:$0 sm:$0xff] }
0x1b6c   :  { %1827 = vperm.xlu0 %7336, %v1823_v32  }
0x1b70   :  { %1832 = vperm.xlu0 %7336, %v1824_v59  }
0x1b74   :  { %1851 = vrot.lane.b32.xlu0 %v8319_v21, %s7761_s4 }
0x1beb   :  { %v1828_v55 = vpop.permute.xlu0 %1827 }
0x1bec   :  { %v1835_v60 = vmul.f32 %v1828_v55, %v8368_v63 }
0x1bee   :  { %v1837_v62 = vsel %vm168_vm1, %v1835_v60, 0.0 }
0x1bef   :  { %v1838_v3 = vrot.slane %v1837_v62, 4  ;;  %v1833_v4 = vpop.permute.xlu0 %1832 }
0x1bf0   :  { %v1836_v9 = vmul.f32 %v1833_v4, %v8356_v46 }
0x1bf1   :  { %v1839_v8 = vadd.f32 %v1838_v3, %v1837_v62 }
0x1bf2   :  { %v1844_v7 = vsel %vm168_vm1, %v1836_v9, 0.0 }
0x1bf3   :  { %v1840_v10 = vrot.slane %v1839_v8, 2  ;;  %v1845_v12 = vrot.slane %v1844_v7, 4  ;;  %v1852_v14 = vpop.permute.xlu0 %1851 }
0x1bf4   :  { %6610 = vmatmul.mubr.msk.f32.vlgmr.msra.gmra.mrb[10].mxu1 %vm168_vm1, %v1852_v14 }
0x1bf5   :  { %v1841_v13 = vadd.f32 %v1840_v10, %v1839_v8  ;;  %v1846_v15 = vadd.f32 %v1845_v12, %v1844_v7  ;;  %6631 = vmatprep.mubr.msk.f32.mxu1 %vm7757_vm0, %v7758_v1  ;;  %7101 = vmatpush3.bf16.msra.mxu1 %v8438_v57 }
0x1bf6   :  { %7102 = vmatprep.subr.bf16.mxu1 %v7756_v0 }
0x1bf7   :  { %v1847_v18 = vrot.slane %v1846_v15, 2  ;;  %v1842_v20 = vrot.slane %v1841_v13, 1 }
0x1bf9   :  { %v1848_v22 = vadd.f32 %v1847_v18, %v1846_v15  ;;  %v1843_v26 = vadd.f32 %v1842_v20, %v1841_v13  ;;  %7104 = vmatpush3.bf16.msra.mxu1 %v8441_v30 }
0x1bfa   :  { %7111 = vmatprep.subr.bf16.mxu1 %v7756_v0 }
0x1bfb   :  { %v1849_v19 = vrot.slane %v1848_v22, 1 }
0x1bfd   :  { %v1850_v28 = vadd.f32 %v1849_v19, %v1848_v22 }
0x1bff   :  { %v1927_v23 = vsel %vm1766_vm13, %v1850_v28, %v1843_v26 }
0x1c00   :  { %6621 = vmatmul.mubr.msk.f32.vlgmr.msra.gmra.mrb[12].mxu0 %vm168_vm1, %v1927_v23 }
0x1c01   :  { %7107 = vmatpush3.bf16.msra.mxu0 %v8208_v36  ;;  %6642 = vmatprep.mubr.msk.f32.mxu0 %vm7757_vm0, %v7758_v1 }
0x1c02   :  { %7108 = vmatprep.subr.bf16.mxu0 %v7756_v0 }
0x1c05   :  { %7110 = vmatpush3.bf16.msra.mxu0 %v8213_v16 }
0x1c06   :  { %7117 = vmatprep.subr.bf16.mxu0 %v7756_v0 }
0x1cc7   :  { %v1921_v42 = vpop.f32.mrb[10].mxu1 }
0x1cc8   :  { %v6611_v27 = vpop.f32.mrb[11].mxu1 }
0x1cd3   :  { %v1996_v35 = vpop.f32.mrb[12].mxu0 }
0x1cd4   :  { %v1997_v37 = vadd.f32 %v1996_v35, %v1921_v42  ;;  %v6622_v38 = vpop.f32.mrb[13].mxu0 }
0x1cd6   :  { %v2006_v40 = vadd.f32 %v8449_v34, %v1997_v37 }
0x1cd8   :  { %7397 = vtanh.f32 %v2006_v40 }
0x1ce2   :  { %v7398_v32 = vpop.eup %7397 }
0x1ce3   :  { %6632 = vmatmul.mubr.msk.f32.vlgmr.msra.gmra.mrb[12].mxu1 %vm168_vm1, %v7398_v32 }
0x1ce4   :  { %7113 = vmatpush3.bf16.msra.mxu1 %v8210_v41  ;;  %6653 = vmatprep.mubr.msk.f32.mxu1 %vm7757_vm0, %v7758_v1 }
0x1ce5   :  { %7114 = vmatprep.subr.bf16.mxu1 %v7756_v0 }
0x1ce8   :  { %7116 = vmatpush3.bf16.msra.mxu1 %v8217_v17 }
0x1ce9   :  { %7123 = vmatprep.subr.bf16.mxu1 %v7756_v0 }
0x1ceb   :  { %6654 = vmatmul.mubr.msk.f32.vlgmr.msra.gmra.mrb[14].mxu1 %vm168_vm1, %v1852_v14 }
0x1cec   :  { %7125 = vmatpush3.bf16.msra.mxu1 %v8409_v50  ;;  %6675 = vmatprep.mubr.msk.f32.mxu1 %vm7757_vm0, %v7758_v1 }
0x1ced   :  { %7126 = vmatprep.subr.bf16.mxu1 %v7756_v0 }
0x1cf0   :  { %7128 = vmatpush3.bf16.msra.mxu1 %v8419_v54 }
0x1cf1   :  { %7135 = vmatprep.subr.bf16.mxu1 %v7756_v0 }
0x1db6   :  { %v2083_v5 = vpop.f32.mrb[12].mxu1 }
0x1db7   :  { %v2084_v6 = vadd.f32 %v8469_v33, %v2083_v5  ;;  %v6633_v59 = vpop.f32.mrb[13].mxu1 }
0x1db9   :  { %v2088_v24 = vsel %vm2087_vm15, %v2084_v6, -inf }
0x1dba   :  { %2089 = vmax.xlane.f32.xlu0 %v2088_v24 }
0x1dbe   :  { %v2266_v43 = vpop.f32.mrb[14].mxu1 }
0x1dbf   :  { %v6655_v47 = vpop.f32.mrb[15].mxu1  ;;  %v2267_v18 = vadd.f32 %v8250_v2, %v2266_v43 }
0x1e47   :  { %v2090_v49 = vpop.xlane.xlu0 %2089 }
0x1e48   :  { %v2091_v52 = vsub.f32 %v2084_v6, %v2090_v49 }
0x1e4a   :  { %v2092_v56 = vmul.f32 1.442695, %v2091_v52 }
0x1e4c   :  { %7399 = vpow2.f32 %v2092_v56 }
0x1e56   :  { %v7400_v55 = vpop.eup %7399 }
0x1e57   :  { %v2094_v60 = vsel %vm2087_vm15, %v7400_v55, 0.0 }
0x1e58   :  { %2095 = vadd.xlane.f32.xlu1 %v2094_v60 }
0x1ee5   :  { %v2096_v62 = vpop.xlane.xlu1 %2095 }
0x1ee6   :  { %7401 = vlog2.f32 %v2096_v62 }
0x1ef0   :  { %v7402_v3 = vpop.eup %7401 }
0x1ef1   :  { %v2098_v4 = vmul.f32 0.6931472, %v7402_v3 }
0x1ef3   :  { %v2099_v9 = vadd.f32 %v2098_v4, %v2090_v49 }
0x1ef5   :  { %v2100_v8 = vsub.f32 %v2084_v6, %v2099_v9 }
0x1ef7   :  { %v2102_v7 = vsel %vm2087_vm15, %v2100_v8, -inf  ;;  %2101 = vst [vmem:[#allocation14] sm:$0x3] %v2100_v8 }
0x1ef8   :  { %2103 = vmax.xlane.f32.xlu1 %v2102_v7 }
0x1f85   :  { %v2104_v10 = vpop.xlane.xlu1 %2103 }
0x1f86   :  { %vm2105_vm2 = vcmp.ge.f32.partialorder %v2100_v8, %v2104_v10 }
0x1f87   :  { %v2106_v12 = vsel %vm2105_vm2, %v8225_v44, 128 }
0x1f88   :  { %v2107_v14 = vsel %vm2087_vm15, %v2106_v12, 2147483647 }
0x1f89   :  { %v2109_v13 = vshra.s32 %v2107_v14, 16  ;;  %v2108_v20 = vand.u32 65535, %v2107_v14 }
0x1f8b   :  { %v2111_v15 = vcvt.s32.f32 %v2109_v13  ;;  %v2110_v19 = vcvt.s32.f32 %v2108_v20 }
0x1f8d   :  { %2112 = vmin.xlane.f32.xlu1 %v2111_v15 }
0x1f9e   :  { %2278 = vrot.lane.b32.xlu1 %v2267_v18, %s7760_s25 }
0x201a   :  { %v2113_v22 = vpop.xlane.xlu1 %2112 }
0x201b   :  { %vm2114_vm3 = vcmp.eq.f32.partialorder %v2111_v15, %v2113_v22  ;;  %v2119_v28 = vcvt.f32.s32 %v2113_v22 }
0x201c   :  { %v2115_v26 = vsel %vm2114_vm3, %v2110_v19, inf }
0x201d   :  { %2116 = vmin.xlane.f32.xlu0 %v2115_v26  ;;  %v2120_v25 = vshll.u32 %v2119_v28, 16 }
0x201e   :  { %v2279_v6 = vpop.permute.xlu1 %2278 }
0x20aa   :  { %v2117_v23 = vpop.xlane.xlu0 %2116 }
0x20ab   :  { %v2118_v31 = vcvt.f32.s32 %v2117_v23 }
0x20ad   :  { %v8479_v29 = vadd.s32 %v2120_v25, %v2118_v31 }
0x20af   :  { %vm2124_vm7 = vcmp.eq.s32.totalorder %v8479_v29, %v8225_v44 }
0x20b0   :  { %v6185_v58 = vsel %vm2124_vm7, 1.0, %v7758_v1  ;;  %vm3834_vm7 = vcmp.eq.s32.totalorder %v8225_v44, 3 }
0x20b1   :  { %6643 = vmatmul.mubr.msk.f32.vlgmr.msra.gmra.mrb[14].mxu0 %vm168_vm1, %v6185_v58 }
0x20b2   :  { %7119 = vmatpush3.bf16.msra.mxu0 %v8393_v39  ;;  %6664 = vmatprep.mubr.msk.f32.mxu0 %vm7757_vm0, %v7758_v1 }
0x20b3   :  { %7120 = vmatprep.subr.bf16.mxu0 %v7756_v0 }
0x20b6   :  { %7122 = vmatpush3.bf16.msra.mxu0 %v8397_v45 }
0x20b7   :  { %7129 = vmatprep.subr.bf16.mxu0 %v7756_v0 }
0x2184   :  { %v2196_v42 = vpop.f32.mrb[14].mxu0 }
0x2185   :  { %v2197_v27 = vadd.f32 %v8263_v11, %v2196_v42  ;;  %v6644_v35 = vpop.f32.mrb[15].mxu0 }
0x2187   :  { %v2270_v37 = vadd.f32 %v2267_v18, %v2197_v27 }
0x2189   :  { %v6188_v38 = vmul.f32 -1.442695, %v2270_v37 }
0x218b   :  { %7403 = vpow2.f32 %v6188_v38 }
0x2195   :  { %v7404_v40 = vpop.eup %7403 }
0x2196   :  { %v2274_v32 = vadd.f32 1.0, %v7404_v40 }
0x2198   :  { %7405 = vrcp.f32 %v2274_v32 }
0x21a2   :  { %v7406_v5 = vpop.eup %7405 }
0x21a3   :  { %v2281_v59 = vmul.f32 %v7406_v5, %v2279_v6  ;;  %v2288_v49 = vsub.f32 1.0, %v7406_v5  ;;  %v2294_v56 = vmul.f32 %v7406_v5, %v8319_v21 }
0x21a5   :  { %2283 = vrot.lane.b32.xlu0 %v2281_v59, %s7760_s25 }
0x2217   :  { %v2284_v24 = vpop.permute.xlu0 %2283 }
0x2218   :  { %v2286_v43 = vadd.f32 %v2284_v24, %v2197_v27 }
0x221a   :  { %7407 = vtanh.f32 %v2286_v43 }
0x2224   :  { %v7408_v47 = vpop.eup %7407 }
0x2225   :  { %2290 = vrot.lane.b32.xlu1 %v7408_v47, %s7761_s4 }
0x2297   :  { %v2291_v52 = vpop.permute.xlu1 %2290 }
0x2298   :  { %v2293_v55 = vmul.f32 %v2291_v52, %v2288_v49 }
0x229a   :  { %v8495_v60 = vadd.f32 %v2294_v56, %v2293_v55 }
0x229c   :  { %v2303_v62 = vrot.slane %v8495_v60, %v8036_v48 }
0x229e   :  { %v2311_v3 = vrot.slane %v2303_v62, %v8036_v48  ;;  %v2304_v4 = vcombine.high %v2303_v62, %v2303_v62 }
0x22a0   :  { %v2322_v9 = vrot.slane %v2311_v3, %v8045_v53  ;;  %v2318_v8 = vrot.slane %v2304_v4, %v8036_v48 }
0x22a2   :  { %2327 = vrot.lane.b32.xlu1 %v2322_v9, %s7761_s4  ;;  %v2326_v7 = vrot.slane %v2318_v8, %v8045_v53 }
0x22a4   :  { %2329 = vrot.lane.b32.xlu0 %v2326_v7, %s7761_s4 }
0x2314   :  { %v2328_v21 = vpop.permute.xlu1 %2327 }
0x2315   :  { %v2333_v10 = vmul.f32 %v2328_v21, %v8368_v63 }
0x2316   :  { %v2330_v12 = vpop.permute.xlu0 %2329 }
0x2317   :  { %v2334_v14 = vmul.f32 %v2330_v12, %v8356_v46  ;;  %v2335_v13 = vsel %vm168_vm1, %v2333_v10, 0.0 }
0x2318   :  { %2336 = vadd.xlane.f32.xlu1 %v2335_v13 }
0x2319   :  { %v2338_v15 = vsel %vm168_vm1, %v2334_v14, 0.0 }
0x231a   :  { %2339 = vadd.xlane.f32.xlu0 %v2338_v15 }
0x23a5   :  { %v2337_v18 = vpop.xlane.xlu1 %2336 }
0x23a6   :  { %v2346_v22 = vrot.slane %v2337_v18, %v8376_v51 }
0x23a7   :  { %v2340_v20 = vpop.xlane.xlu0 %2339 }
0x23a8   :  { %v2350_v19 = vrot.slane %v2340_v20, %v8376_v51 }
0x23aa   :  { %v2351_v26 = vsel %vm1766_vm13, %v2350_v19, %v2346_v22 }
0x23ab   :  { %v2353_v28 = vsel %vm1769_vm14, %v2351_v26, -inf }
0x23ac   :  { %2354 = vmax.xlane.f32.xlu0 %v2353_v28 }
0x2439   :  { %v2355_v23 = vpop.xlane.xlu0 %2354 }
0x243a   :  { %v2360_v25 = vrot.slane %v2355_v23, %v8045_v53  ;;  %v2364_v31 = vrot.slane %v2355_v23, %v8383_v61 }
0x243c   :  { %v2367_v58 = vsub.f32 %v2337_v18, %v2360_v25  ;;  %v2368_v42 = vsub.f32 %v2340_v20, %v2364_v31 }
0x243e   :  { %v2369_v27 = vmul.f32 1.442695, %v2367_v58  ;;  %v2371_v35 = vmul.f32 1.442695, %v2368_v42 }
0x2440   :  { %7409 = vpow2.f32 %v2369_v27 }
0x2441   :  { %7411 = vpow2.f32 %v2371_v35 }
0x244a   :  { %v7410_v37 = vpop.eup %7409 }
0x244b   :  { %v7412_v38 = vpop.eup %7411  ;;  %2376 = vperm.xlu1 %7335, %v7410_v37  }
0x244c   :  { %2379 = vperm.xlu0 %7336, %v7412_v38  }
0x24ca   :  { %v2377_v40 = vpop.permute.xlu1 %2376 }
0x24cb   :  { %v2380_v32 = vpop.permute.xlu0 %2379  ;;  %v2384_v5 = vrot.slane %v2377_v40, %v8376_v51 }
0x24cc   :  { %v2388_v6 = vrot.slane %v2380_v32, %v8376_v51 }
0x24ce   :  { %v2389_v59 = vsel %vm1766_vm13, %v2388_v6, %v2384_v5 }
0x24cf   :  { %v2391_v24 = vsel %vm1769_vm14, %v2389_v59, 0.0 }
0x24d0   :  { %2392 = vadd.xlane.f32.xlu1 %v2391_v24 }
0x255d   :  { %v2393_v43 = vpop.xlane.xlu1 %2392 }
0x255e   :  { %7413 = vrcp.f32 %v2393_v43 }
0x2568   :  { %v7414_v47 = vpop.eup %7413 }
0x2569   :  { %v2399_v49 = vrot.slane %v7414_v47, %v8045_v53  ;;  %v2403_v56 = vrot.slane %v7414_v47, %v8383_v61 }
0x256b   :  { %v2406_v52 = vmul.f32 %v7410_v37, %v2399_v49  ;;  %v2407_v55 = vmul.f32 %v7412_v38, %v2403_v56 }
0x256d   :  { %2410 = vperm.xlu0 %7336, %v2406_v52  }
0x2571   :  { %2415 = vperm.xlu0 %7336, %v2407_v55  }
0x2575   :  { %2434 = vrot.lane.b32.xlu0 %v8495_v60, %s7761_s4 }
0x25ec   :  { %v2411_v62 = vpop.permute.xlu0 %2410 }
0x25ed   :  { %v2418_v3 = vmul.f32 %v2411_v62, %v8368_v63 }
0x25ef   :  { %v2420_v4 = vsel %vm168_vm1, %v2418_v3, 0.0 }
0x25f0   :  { %v2421_v9 = vrot.slane %v2420_v4, 4  ;;  %v2416_v8 = vpop.permute.xlu0 %2415 }
0x25f1   :  { %v2419_v7 = vmul.f32 %v2416_v8, %v8356_v46 }
0x25f2   :  { %v2422_v21 = vadd.f32 %v2421_v9, %v2420_v4 }
0x25f3   :  { %v2427_v10 = vsel %vm168_vm1, %v2419_v7, 0.0 }
0x25f4   :  { %v2423_v12 = vrot.slane %v2422_v21, 2  ;;  %v2428_v14 = vrot.slane %v2427_v10, 4  ;;  %v2435_v13 = vpop.permute.xlu0 %2434 }
0x25f5   :  { %6665 = vmatmul.mubr.msk.f32.vlgmr.msra.gmra.mrb[16].mxu0 %vm168_vm1, %v2435_v13 }
0x25f6   :  { %v2424_v15 = vadd.f32 %v2423_v12, %v2422_v21  ;;  %v2429_v18 = vadd.f32 %v2428_v14, %v2427_v10  ;;  %7131 = vmatpush3.bf16.msra.mxu0 %v8438_v57  ;;  %6686 = vmatprep.mubr.msk.f32.mxu0 %vm7757_vm0, %v7758_v1 }
0x25f7   :  { %7132 = vmatprep.subr.bf16.mxu0 %v7756_v0 }
0x25f8   :  { %v2430_v20 = vrot.slane %v2429_v18, 2  ;;  %v2425_v22 = vrot.slane %v2424_v15, 1 }
0x25fa   :  { %v2431_v19 = vadd.f32 %v2430_v20, %v2429_v18  ;;  %7134 = vmatpush3.bf16.msra.mxu0 %v8441_v30  ;;  %v2426_v28 = vadd.f32 %v2425_v22, %v2424_v15 }
0x25fb   :  { %7141 = vmatprep.subr.bf16.mxu0 %v7756_v0 }
0x25fc   :  { %v2432_v26 = vrot.slane %v2431_v19, 1 }
0x25fe   :  { %v2433_v23 = vadd.f32 %v2432_v26, %v2431_v19 }
0x2600   :  { %v2510_v25 = vsel %vm1766_vm13, %v2433_v23, %v2426_v28 }
0x2601   :  { %6676 = vmatmul.mubr.msk.f32.vlgmr.msra.gmra.mrb[16].mxu1 %vm168_vm1, %v2510_v25  ;;  %v2123_v25 = vsel %vm2122_vm8, %v8479_v29, 0 }
0x2602   :  { %7137 = vmatpush3.bf16.msra.mxu1 %v8208_v36  ;;  %6697 = vmatprep.mubr.msk.f32.mxu1 %vm7757_vm0, %v7758_v1 }
0x2603   :  { %7138 = vmatprep.subr.bf16.mxu1 %v7756_v0 }
0x2606   :  { %7140 = vmatpush3.bf16.msra.mxu1 %v8213_v16 }
0x2607   :  { %7147 = vmatprep.subr.bf16.mxu1 %v7756_v0 }
0x26c8   :  { %v2504_v31 = vpop.f32.mrb[16].mxu0 }
0x26c9   :  { %v6666_v58 = vpop.f32.mrb[17].mxu0 }
0x26d4   :  { %v2579_v42 = vpop.f32.mrb[16].mxu1 }
0x26d5   :  { %v2580_v27 = vadd.f32 %v2579_v42, %v2504_v31  ;;  %v6677_v35 = vpop.f32.mrb[17].mxu1 }
0x26d7   :  { %v2583_v37 = vadd.f32 %v8449_v34, %v2580_v27 }
0x26d9   :  { %7415 = vtanh.f32 %v2583_v37 }
0x26e3   :  { %v7416_v38 = vpop.eup %7415 }
0x26e4   :  { %6687 = vmatmul.mubr.msk.f32.vlgmr.msra.gmra.mrb[18].mxu0 %vm168_vm1, %v7416_v38 }
0x26e5   :  { %7143 = vmatpush3.bf16.msra.mxu0 %v8210_v41  ;;  %6708 = vmatprep.mubr.msk.f32.mxu0 %vm7757_vm0, %v7758_v1 }
0x26e6   :  { %7144 = vmatprep.subr.bf16.mxu0 %v7756_v0 }
0x26e9   :  { %7146 = vmatpush3.bf16.msra.mxu0 %v8217_v17 }
0x26ea   :  { %7153 = vmatprep.subr.bf16.mxu0 %v7756_v0 }
0x26ec   :  { %6709 = vmatmul.mubr.msk.f32.vlgmr.msra.gmra.mrb[20].mxu0 %vm168_vm1, %v2435_v13 }
0x26ed   :  { %7155 = vmatpush3.bf16.msra.mxu0 %v8409_v50  ;;  %6730 = vmatprep.mubr.msk.f32.mxu0 %vm7757_vm0, %v7758_v1 }
0x26ee   :  { %7156 = vmatprep.subr.bf16.mxu0 %v7756_v0 }
0x26f1   :  { %7158 = vmatpush3.bf16.msra.mxu0 %v8419_v54 }
0x26f2   :  { %7165 = vmatprep.subr.bf16.mxu0 %v7756_v0 }
0x27b7   :  { %v2654_v40 = vpop.f32.mrb[18].mxu0 }
0x27b8   :  { %v2655_v32 = vadd.f32 %v8469_v33, %v2654_v40  ;;  %v6688_v5 = vpop.f32.mrb[19].mxu0 }
0x27ba   :  { %v2658_v6 = vsel %vm2087_vm15, %v2655_v32, -inf }
0x27bb   :  { %2659 = vmax.xlane.f32.xlu0 %v2658_v6 }
0x27bf   :  { %v2836_v59 = vpop.f32.mrb[20].mxu0 }
0x27c0   :  { %v6710_v24 = vpop.f32.mrb[21].mxu0  ;;  %v2837_v43 = vadd.f32 %v8250_v2, %v2836_v59 }
0x27d1   :  { %2848 = vrot.lane.b32.xlu0 %v2837_v43, %s7760_s25 }
0x2848   :  { %v2660_v47 = vpop.xlane.xlu0 %2659 }
0x2849   :  { %v2661_v49 = vsub.f32 %v2655_v32, %v2660_v47 }
0x284b   :  { %v2662_v52 = vmul.f32 1.442695, %v2661_v49 }
0x284c   :  { %v2849_v5 = vpop.permute.xlu0 %2848 }
0x284d   :  { %7417 = vpow2.f32 %v2662_v52 }
0x2857   :  { %v7418_v56 = vpop.eup %7417 }
0x2858   :  { %v2664_v55 = vsel %vm2087_vm15, %v7418_v56, 0.0 }
0x2859   :  { %2665 = vadd.xlane.f32.xlu1 %v2664_v55 }
0x28e6   :  { %v2666_v62 = vpop.xlane.xlu1 %2665 }
0x28e7   :  { %7419 = vlog2.f32 %v2666_v62 }
0x28f1   :  { %v7420_v3 = vpop.eup %7419 }
0x28f2   :  { %v2668_v4 = vmul.f32 0.6931472, %v7420_v3 }
0x28f4   :  { %v2669_v9 = vadd.f32 %v2668_v4, %v2660_v47 }
0x28f6   :  { %v2670_v8 = vsub.f32 %v2655_v32, %v2669_v9 }
0x28f8   :  { %v2673_v7 = vsel %vm2087_vm15, %v2670_v8, -inf  ;;  %2672 = vst [vmem:[#allocation14 + $0x2] sm:$0x3] %v2670_v8 }
0x28f9   :  { %2674 = vmax.xlane.f32.xlu1 %v2673_v7 }
0x2986   :  { %v2675_v2 = vpop.xlane.xlu1 %2674 }
0x2987   :  { %vm2676_vm4 = vcmp.ge.f32.partialorder %v2670_v8, %v2675_v2 }
0x2988   :  { %v2677_v21 = vsel %vm2676_vm4, %v8225_v44, 128 }
0x2989   :  { %v2678_v10 = vsel %vm2087_vm15, %v2677_v21, 2147483647 }
0x298a   :  { %v2680_v12 = vshra.s32 %v2678_v10, 16  ;;  %v2679_v13 = vand.u32 65535, %v2678_v10 }
0x298c   :  { %v2682_v14 = vcvt.s32.f32 %v2680_v12  ;;  %v2681_v18 = vcvt.s32.f32 %v2679_v13 }
0x298e   :  { %2683 = vmin.xlane.f32.xlu1 %v2682_v14 }
0x2a1b   :  { %v2684_v15 = vpop.xlane.xlu1 %2683 }
0x2a1c   :  { %vm2685_vm6 = vcmp.eq.f32.partialorder %v2682_v14, %v2684_v15  ;;  %v2690_v22 = vcvt.f32.s32 %v2684_v15 }
0x2a1d   :  { %v2686_v20 = vsel %vm2685_vm6, %v2681_v18, inf }
0x2a1e   :  { %2687 = vmin.xlane.f32.xlu1 %v2686_v20  ;;  %v2691_v26 = vshll.u32 %v2690_v22, 16 }
0x2aab   :  { %v2688_v19 = vpop.xlane.xlu1 %2687 }
0x2aac   :  { %v2689_v28 = vcvt.f32.s32 %v2688_v19 }
0x2aae   :  { %v2692_v23 = vadd.s32 %v2691_v26, %v2689_v28 }
0x2ab0   :  { %v8569_v31 = vsel %vm1521_vm5, %v2692_v23, %v2123_v25  ;;  %vm2694_vm9 = vcmp.eq.s32.totalorder %v2692_v23, %v8225_v44 }
0x2ab1   :  { %v6192_v58 = vsel %vm2694_vm9, 1.0, %v7758_v1  ;;  %vm4405_vm9 = vcmp.eq.s32.totalorder %v8225_v44, 4 }
0x2ab2   :  { %6698 = vmatmul.mubr.msk.f32.vlgmr.msra.gmra.mrb[18].mxu1 %vm168_vm1, %v6192_v58 }
0x2ab3   :  { %7149 = vmatpush3.bf16.msra.mxu1 %v8393_v39  ;;  %6719 = vmatprep.mubr.msk.f32.mxu1 %vm7757_vm0, %v7758_v1 }
0x2ab4   :  { %7150 = vmatprep.subr.bf16.mxu1 %v7756_v0 }
0x2ab7   :  { %7152 = vmatpush3.bf16.msra.mxu1 %v8397_v45 }
0x2ab8   :  { %7159 = vmatprep.subr.bf16.mxu1 %v7756_v0 }
0x2b85   :  { %v2766_v29 = vpop.f32.mrb[18].mxu1 }
0x2b86   :  { %v2767_v42 = vadd.f32 %v8263_v11, %v2766_v29  ;;  %v6699_v27 = vpop.f32.mrb[19].mxu1 }
0x2b88   :  { %v2840_v35 = vadd.f32 %v2837_v43, %v2767_v42 }
0x2b8a   :  { %v6195_v37 = vmul.f32 -1.442695, %v2840_v35 }
0x2b8c   :  { %7421 = vpow2.f32 %v6195_v37 }
0x2b96   :  { %v7422_v38 = vpop.eup %7421 }
0x2b97   :  { %v2844_v40 = vadd.f32 1.0, %v7422_v38 }
0x2b99   :  { %7423 = vrcp.f32 %v2844_v40 }
0x2ba3   :  { %v7424_v32 = vpop.eup %7423 }
0x2ba4   :  { %v2851_v6 = vmul.f32 %v7424_v32, %v2849_v5  ;;  %v2858_v49 = vsub.f32 1.0, %v7424_v32  ;;  %v2864_v43 = vmul.f32 %v7424_v32, %v8495_v60 }
0x2ba6   :  { %2853 = vrot.lane.b32.xlu1 %v2851_v6, %s7760_s25 }
0x2c18   :  { %v2854_v59 = vpop.permute.xlu1 %2853 }
0x2c19   :  { %v2856_v24 = vadd.f32 %v2854_v59, %v2767_v42 }
0x2c1b   :  { %7425 = vtanh.f32 %v2856_v24 }
0x2c25   :  { %v7426_v47 = vpop.eup %7425 }
0x2c26   :  { %2860 = vrot.lane.b32.xlu1 %v7426_v47, %s7761_s4 }
0x2c98   :  { %v2861_v11 = vpop.permute.xlu1 %2860 }
0x2c99   :  { %v2863_v52 = vmul.f32 %v2861_v11, %v2858_v49 }
0x2c9b   :  { %v8584_v56 = vadd.f32 %v2864_v43, %v2863_v52 }
0x2c9d   :  { %v2873_v55 = vrot.slane %v8584_v56, %v8036_v48 }
0x2c9f   :  { %v2881_v62 = vrot.slane %v2873_v55, %v8036_v48  ;;  %v2874_v3 = vcombine.high %v2873_v55, %v2873_v55 }
0x2ca1   :  { %v2892_v4 = vrot.slane %v2881_v62, %v8045_v53  ;;  %v2888_v9 = vrot.slane %v2874_v3, %v8036_v48 }
0x2ca3   :  { %2897 = vrot.lane.b32.xlu0 %v2892_v4, %s7761_s4  ;;  %v2896_v8 = vrot.slane %v2888_v9, %v8045_v53 }
0x2ca5   :  { %2899 = vrot.lane.b32.xlu1 %v2896_v8, %s7761_s4 }
0x2d15   :  { %v2898_v60 = vpop.permute.xlu0 %2897 }
0x2d16   :  { %v2903_v7 = vmul.f32 %v2898_v60, %v8368_v63 }
0x2d17   :  { %v2900_v2 = vpop.permute.xlu1 %2899 }
0x2d18   :  { %v2904_v21 = vmul.f32 %v2900_v2, %v8356_v46  ;;  %v2905_v10 = vsel %vm168_vm1, %v2903_v7, 0.0 }
0x2d19   :  { %2906 = vadd.xlane.f32.xlu0 %v2905_v10 }
0x2d1a   :  { %v2908_v12 = vsel %vm168_vm1, %v2904_v21, 0.0 }
0x2d1b   :  { %2909 = vadd.xlane.f32.xlu1 %v2908_v12 }
0x2da6   :  { %v2907_v14 = vpop.xlane.xlu0 %2906 }
0x2da7   :  { %v2916_v15 = vrot.slane %v2907_v14, %v8376_v51 }
0x2da8   :  { %v2910_v13 = vpop.xlane.xlu1 %2909 }
0x2da9   :  { %v2920_v18 = vrot.slane %v2910_v13, %v8376_v51 }
0x2dab   :  { %v2921_v20 = vsel %vm1766_vm13, %v2920_v18, %v2916_v15 }
0x2dac   :  { %v2923_v22 = vsel %vm1769_vm14, %v2921_v20, -inf }
0x2dad   :  { %2924 = vmax.xlane.f32.xlu0 %v2923_v22 }
0x2e3a   :  { %v2925_v19 = vpop.xlane.xlu0 %2924 }
0x2e3b   :  { %v2930_v26 = vrot.slane %v2925_v19, %v8045_v53  ;;  %v2934_v28 = vrot.slane %v2925_v19, %v8383_v61 }
0x2e3d   :  { %v2937_v23 = vsub.f32 %v2907_v14, %v2930_v26  ;;  %v2938_v25 = vsub.f32 %v2910_v13, %v2934_v28 }
0x2e3f   :  { %v2939_v58 = vmul.f32 1.442695, %v2937_v23  ;;  %v2941_v29 = vmul.f32 1.442695, %v2938_v25 }
0x2e41   :  { %7427 = vpow2.f32 %v2939_v58 }
0x2e42   :  { %7429 = vpow2.f32 %v2941_v29 }
0x2e4b   :  { %v7428_v42 = vpop.eup %7427 }
0x2e4c   :  { %v7430_v27 = vpop.eup %7429  ;;  %2946 = vperm.xlu0 %7336, %v7428_v42  }
0x2e4d   :  { %2949 = vperm.xlu1 %7335, %v7430_v27  }
0x2ecb   :  { %v2947_v35 = vpop.permute.xlu0 %2946 }
0x2ecc   :  { %v2950_v37 = vpop.permute.xlu1 %2949  ;;  %v2954_v38 = vrot.slane %v2947_v35, %v8376_v51 }
0x2ecd   :  { %v2958_v40 = vrot.slane %v2950_v37, %v8376_v51 }
0x2ecf   :  { %v2959_v32 = vsel %vm1766_vm13, %v2958_v40, %v2954_v38 }
0x2ed0   :  { %v2961_v5 = vsel %vm1769_vm14, %v2959_v32, 0.0 }
0x2ed1   :  { %2962 = vadd.xlane.f32.xlu1 %v2961_v5 }
0x2f5e   :  { %v2963_v6 = vpop.xlane.xlu1 %2962 }
0x2f5f   :  { %7431 = vrcp.f32 %v2963_v6 }
0x2f69   :  { %v7432_v59 = vpop.eup %7431 }
0x2f6a   :  { %v2969_v24 = vrot.slane %v7432_v59, %v8045_v53  ;;  %v2973_v49 = vrot.slane %v7432_v59, %v8383_v61 }
0x2f6c   :  { %v2976_v47 = vmul.f32 %v7428_v42, %v2969_v24  ;;  %v2977_v11 = vmul.f32 %v7430_v27, %v2973_v49 }
0x2f6e   :  { %2980 = vperm.xlu0 %7336, %v2976_v47  }
0x2f72   :  { %2985 = vperm.xlu0 %7336, %v2977_v11  }
0x2f76   :  { %3004 = vrot.lane.b32.xlu0 %v8584_v56, %s7761_s4 }
0x2fed   :  { %v2981_v43 = vpop.permute.xlu0 %2980 }
0x2fee   :  { %v2988_v52 = vmul.f32 %v2981_v43, %v8368_v63 }
0x2ff0   :  { %v2990_v55 = vsel %vm168_vm1, %v2988_v52, 0.0 }
0x2ff1   :  { %v2991_v62 = vrot.slane %v2990_v55, 4  ;;  %v2986_v3 = vpop.permute.xlu0 %2985 }
0x2ff2   :  { %v2989_v4 = vmul.f32 %v2986_v3, %v8356_v46 }
0x2ff3   :  { %v2992_v9 = vadd.f32 %v2991_v62, %v2990_v55 }
0x2ff4   :  { %v2997_v8 = vsel %vm168_vm1, %v2989_v4, 0.0 }
0x2ff5   :  { %v2993_v60 = vrot.slane %v2992_v9, 2  ;;  %v2998_v7 = vrot.slane %v2997_v8, 4  ;;  %v3005_v2 = vpop.permute.xlu0 %3004 }
0x2ff6   :  { %6720 = vmatmul.mubr.msk.f32.vlgmr.msra.gmra.mrb[20].mxu1 %vm168_vm1, %v3005_v2 }
0x2ff7   :  { %v2994_v21 = vadd.f32 %v2993_v60, %v2992_v9  ;;  %v2999_v10 = vadd.f32 %v2998_v7, %v2997_v8  ;;  %7161 = vmatpush3.bf16.msra.mxu1 %v8438_v57  ;;  %6741 = vmatprep.mubr.msk.f32.mxu1 %vm7757_vm0, %v7758_v1  ;;  %v8655_v9 = vld [vmem:[%s9140_s9] ss:$0 sm:$0xff] }
0x2ff8   :  { %7162 = vmatprep.subr.bf16.mxu1 %v7756_v0 }
0x2ff9   :  { %v3000_v12 = vrot.slane %v2999_v10, 2  ;;  %v2995_v14 = vrot.slane %v2994_v21, 1 }
0x2ffb   :  { %v3001_v13 = vadd.f32 %v3000_v12, %v2999_v10  ;;  %7164 = vmatpush3.bf16.msra.mxu1 %v8441_v30  ;;  %v2996_v18 = vadd.f32 %v2995_v14, %v2994_v21 }
0x2ffc   :  { %7171 = vmatprep.subr.bf16.mxu1 %v7756_v0 }
0x2ffd   :  { %v3002_v15 = vrot.slane %v3001_v13, 1 }
0x2fff   :  { %v3003_v20 = vadd.f32 %v3002_v15, %v3001_v13 }
0x3001   :  { %v3080_v22 = vsel %vm1766_vm13, %v3003_v20, %v2996_v18 }
0x3002   :  { %6731 = vmatmul.mubr.msk.f32.vlgmr.msra.gmra.mrb[22].mxu0 %vm168_vm1, %v3080_v22 }
0x3003   :  { %7167 = vmatpush3.bf16.msra.mxu0 %v8208_v36  ;;  %6752 = vmatprep.mubr.msk.f32.mxu0 %vm7757_vm0, %v7758_v1 }
0x3004   :  { %7168 = vmatprep.subr.bf16.mxu0 %v7756_v0 }
0x3007   :  { %7170 = vmatpush3.bf16.msra.mxu0 %v8213_v16 }
0x3008   :  { %7177 = vmatprep.subr.bf16.mxu0 %v7756_v0 }
0x30c9   :  { %v3074_v19 = vpop.f32.mrb[20].mxu1 }
0x30ca   :  { %v6721_v26 = vpop.f32.mrb[21].mxu1 }
0x30d5   :  { %v3149_v28 = vpop.f32.mrb[22].mxu0 }
0x30d6   :  { %v3150_v23 = vadd.f32 %v3149_v28, %v3074_v19  ;;  %v6732_v25 = vpop.f32.mrb[23].mxu0 }
0x30d8   :  { %v3153_v58 = vadd.f32 %v8449_v34, %v3150_v23 }
0x30da   :  { %7433 = vtanh.f32 %v3153_v58 }
0x30e4   :  { %v7434_v29 = vpop.eup %7433 }
0x30e5   :  { %6742 = vmatmul.mubr.msk.f32.vlgmr.msra.gmra.mrb[22].mxu1 %vm168_vm1, %v7434_v29 }
0x30e6   :  { %7173 = vmatpush3.bf16.msra.mxu1 %v8210_v41  ;;  %6763 = vmatprep.mubr.msk.f32.mxu1 %vm7757_vm0, %v7758_v1 }
0x30e7   :  { %7174 = vmatprep.subr.bf16.mxu1 %v7756_v0 }
0x30ea   :  { %7176 = vmatpush3.bf16.msra.mxu1 %v8217_v17 }
0x30eb   :  { %7183 = vmatprep.subr.bf16.mxu1 %v7756_v0 }
0x30ed   :  { %6764 = vmatmul.mubr.msk.f32.vlgmr.msra.gmra.mrb[24].mxu1 %vm168_vm1, %v3005_v2 }
0x30ee   :  { %7185 = vmatpush3.bf16.msra.mxu1 %v8409_v50  ;;  %6785 = vmatprep.mubr.msk.f32.mxu1 %vm7757_vm0, %v7758_v1 }
0x30ef   :  { %7186 = vmatprep.subr.bf16.mxu1 %v7756_v0 }
0x30f2   :  { %7188 = vmatpush3.bf16.msra.mxu1 %v8419_v54 }
0x30f3   :  { %7195 = vmatprep.subr.bf16.mxu1 %v7756_v0 }
0x31b8   :  { %v3224_v34 = vpop.f32.mrb[22].mxu1 }
0x31b9   :  { %v3225_v42 = vadd.f32 %v8469_v33, %v3224_v34  ;;  %v6743_v27 = vpop.f32.mrb[23].mxu1 }
0x31bb   :  { %v3228_v35 = vsel %vm2087_vm15, %v3225_v42, -inf }
0x31bc   :  { %3229 = vmax.xlane.f32.xlu0 %v3228_v35 }
0x31c0   :  { %v3407_v37 = vpop.f32.mrb[24].mxu1 }
0x31c1   :  { %v6765_v38 = vpop.f32.mrb[25].mxu1  ;;  %v3408_v8 = vadd.f32 %v8655_v9, %v3407_v37 }
0x3249   :  { %v3230_v40 = vpop.xlane.xlu0 %3229 }
0x324a   :  { %v3231_v32 = vsub.f32 %v3225_v42, %v3230_v40 }
0x324c   :  { %v3232_v5 = vmul.f32 1.442695, %v3231_v32 }
0x324e   :  { %7435 = vpow2.f32 %v3232_v5 }
0x3258   :  { %v7436_v6 = vpop.eup %7435 }
0x3259   :  { %v3234_v59 = vsel %vm2087_vm15, %v7436_v6, 0.0 }
0x325a   :  { %3235 = vadd.xlane.f32.xlu1 %v3234_v59 }
0x32e7   :  { %v3236_v24 = vpop.xlane.xlu1 %3235 }
0x32e8   :  { %7437 = vlog2.f32 %v3236_v24 }
0x32f2   :  { %v7438_v47 = vpop.eup %7437 }
0x32f3   :  { %v3238_v49 = vmul.f32 0.6931472, %v7438_v47 }
0x32f5   :  { %v3239_v11 = vadd.f32 %v3238_v49, %v3230_v40 }
0x32f7   :  { %v3240_v33 = vsub.f32 %v3225_v42, %v3239_v11 }
0x32f9   :  { %v3243_v43 = vsel %vm2087_vm15, %v3240_v33, -inf  ;;  %3242 = vst [vmem:[#allocation14 + $0x4] sm:$0x3] %v3240_v33 }
0x32fa   :  { %3244 = vmax.xlane.f32.xlu1 %v3243_v43 }
0x3387   :  { %v3245_v52 = vpop.xlane.xlu1 %3244 }
0x3388   :  { %vm3246_vm5 = vcmp.ge.f32.partialorder %v3240_v33, %v3245_v52 }
0x3389   :  { %v3247_v55 = vsel %vm3246_vm5, %v8225_v44, 128 }
0x338a   :  { %v3248_v62 = vsel %vm2087_vm15, %v3247_v55, 2147483647 }
0x338b   :  { %v3250_v3 = vshra.s32 %v3248_v62, 16  ;;  %v3249_v60 = vand.u32 65535, %v3248_v62 }
0x338d   :  { %v3252_v4 = vcvt.s32.f32 %v3250_v3  ;;  %v3251_v2 = vcvt.s32.f32 %v3249_v60 }
0x338f   :  { %3253 = vmin.xlane.f32.xlu1 %v3252_v4 }
0x33a0   :  { %3419 = vrot.lane.b32.xlu1 %v3408_v8, %s7760_s25 }
0x341c   :  { %v3254_v7 = vpop.xlane.xlu1 %3253 }
0x341d   :  { %vm3255_vm10 = vcmp.eq.f32.partialorder %v3252_v4, %v3254_v7  ;;  %v3260_v10 = vcvt.f32.s32 %v3254_v7 }
0x341e   :  { %v3256_v21 = vsel %vm3255_vm10, %v3251_v2, inf }
0x341f   :  { %3257 = vmin.xlane.f32.xlu0 %v3256_v21  ;;  %v3261_v14 = vshll.u32 %v3260_v10, 16 }
0x3420   :  { %v3420_v34 = vpop.permute.xlu1 %3419 }
0x34ac   :  { %v3258_v12 = vpop.xlane.xlu0 %3257 }
0x34ad   :  { %v3259_v13 = vcvt.f32.s32 %v3258_v12 }
0x34af   :  { %v3262_v15 = vadd.s32 %v3261_v14, %v3259_v13 }
0x34b1   :  { %v8661_v18 = vsel %vm3263_vm11, %v3262_v15, %v8569_v31  ;;  %vm3265_vm12 = vcmp.eq.s32.totalorder %v3262_v15, %v8225_v44  ;;  %v8675_v31 = vld [vmem:[%s9139_s8] ss:$0 sm:$0xff] }
0x34b2   :  { %v6199_v20 = vsel %vm3265_vm12, 1.0, %v7758_v1  ;;  %vm4976_vm12 = vcmp.eq.s32.totalorder %v8225_v44, 5 }
0x34b3   :  { %6753 = vmatmul.mubr.msk.f32.vlgmr.msra.gmra.mrb[24].mxu0 %vm168_vm1, %v6199_v20 }
0x34b4   :  { %7179 = vmatpush3.bf16.msra.mxu0 %v8393_v39  ;;  %6774 = vmatprep.mubr.msk.f32.mxu0 %vm7757_vm0, %v7758_v1 }
0x34b5   :  { %7180 = vmatprep.subr.bf16.mxu0 %v7756_v0 }
0x34b8   :  { %7182 = vmatpush3.bf16.msra.mxu0 %v8397_v45 }
0x34b9   :  { %7189 = vmatprep.subr.bf16.mxu0 %v7756_v0 }
0x3586   :  { %v3337_v22 = vpop.f32.mrb[24].mxu0 }
0x3587   :  { %v3338_v19 = vadd.f32 %v8675_v31, %v3337_v22  ;;  %v6754_v26 = vpop.f32.mrb[25].mxu0 }
0x3589   :  { %v3411_v28 = vadd.f32 %v3408_v8, %v3338_v19 }
0x358b   :  { %v6202_v23 = vmul.f32 -1.442695, %v3411_v28 }
0x358d   :  { %7439 = vpow2.f32 %v6202_v23 }
0x3597   :  { %v7440_v25 = vpop.eup %7439 }
0x3598   :  { %v3415_v58 = vadd.f32 1.0, %v7440_v25 }
0x359a   :  { %7441 = vrcp.f32 %v3415_v58 }
0x35a4   :  { %v7442_v29 = vpop.eup %7441 }
0x35a5   :  { %v3422_v42 = vmul.f32 %v7442_v29, %v3420_v34  ;;  %v3429_v38 = vsub.f32 1.0, %v7442_v29  ;;  %v3435_v32 = vmul.f32 %v7442_v29, %v8584_v56 }
0x35a7   :  { %3424 = vrot.lane.b32.xlu0 %v3422_v42, %s7760_s25 }
0x3619   :  { %v3425_v27 = vpop.permute.xlu0 %3424 }
0x361a   :  { %v3427_v35 = vadd.f32 %v3425_v27, %v3338_v19 }
0x361c   :  { %7443 = vtanh.f32 %v3427_v35 }
0x3626   :  { %v7444_v37 = vpop.eup %7443 }
0x3627   :  { %3431 = vrot.lane.b32.xlu1 %v7444_v37, %s7761_s4 }
0x3699   :  { %v3432_v40 = vpop.permute.xlu1 %3431 }
0x369a   :  { %v3434_v5 = vmul.f32 %v3432_v40, %v3429_v38 }
0x369c   :  { %v8681_v6 = vadd.f32 %v3435_v32, %v3434_v5 }
0x369e   :  { %v3444_v59 = vrot.slane %v8681_v6, %v8036_v48 }
0x36a0   :  { %v3445_v24 = vcombine.high %v3444_v59, %v3444_v59  ;;  %v3452_v47 = vrot.slane %v3444_v59, %v8036_v48 }
0x36a2   :  { %v3463_v49 = vrot.slane %v3452_v47, %v8045_v53  ;;  %v3459_v11 = vrot.slane %v3445_v24, %v8036_v48 }
0x36a4   :  { %3468 = vrot.lane.b32.xlu1 %v3463_v49, %s7761_s4  ;;  %v3467_v33 = vrot.slane %v3459_v11, %v8045_v53 }
0x36a6   :  { %3470 = vrot.lane.b32.xlu0 %v3467_v33, %s7761_s4 }
0x3716   :  { %v3469_v56 = vpop.permute.xlu1 %3468 }
0x3717   :  { %v3474_v43 = vmul.f32 %v3469_v56, %v8368_v63 }
0x3718   :  { %v3471_v52 = vpop.permute.xlu0 %3470 }
0x3719   :  { %v3475_v55 = vmul.f32 %v3471_v52, %v8356_v46  ;;  %v3476_v62 = vsel %vm168_vm1, %v3474_v43, 0.0 }
0x371a   :  { %3477 = vadd.xlane.f32.xlu1 %v3476_v62 }
0x371b   :  { %v3479_v3 = vsel %vm168_vm1, %v3475_v55, 0.0 }
0x371c   :  { %3480 = vadd.xlane.f32.xlu0 %v3479_v3 }
0x37a7   :  { %v3478_v4 = vpop.xlane.xlu1 %3477 }
0x37a8   :  { %v3487_v60 = vrot.slane %v3478_v4, %v8376_v51 }
0x37a9   :  { %v3481_v8 = vpop.xlane.xlu0 %3480 }
0x37aa   :  { %v3491_v7 = vrot.slane %v3481_v8, %v8376_v51 }
0x37ac   :  { %v3492_v2 = vsel %vm1766_vm13, %v3491_v7, %v3487_v60 }
0x37ad   :  { %v3494_v21 = vsel %vm1769_vm14, %v3492_v2, -inf }
0x37ae   :  { %3495 = vmax.xlane.f32.xlu0 %v3494_v21 }
0x383b   :  { %v3496_v10 = vpop.xlane.xlu0 %3495 }
0x383c   :  { %v3501_v12 = vrot.slane %v3496_v10, %v8045_v53  ;;  %v3505_v14 = vrot.slane %v3496_v10, %v8383_v61 }
0x383e   :  { %v3508_v13 = vsub.f32 %v3478_v4, %v3501_v12  ;;  %v3509_v15 = vsub.f32 %v3481_v8, %v3505_v14 }
0x3840   :  { %v3510_v20 = vmul.f32 1.442695, %v3508_v13  ;;  %v3512_v22 = vmul.f32 1.442695, %v3509_v15 }
0x3842   :  { %7445 = vpow2.f32 %v3510_v20  ;;  %v8731_v20 = vld [vmem:[%s9143_s12] ss:$0 sm:$0xff] }
0x3843   :  { %7447 = vpow2.f32 %v3512_v22 }
0x384c   :  { %v7446_v19 = vpop.eup %7445 }
0x384d   :  { %v7448_v26 = vpop.eup %7447  ;;  %3517 = vperm.xlu1 %7335, %v7446_v19  }
0x384e   :  { %3520 = vperm.xlu0 %7336, %v7448_v26  }
0x38cc   :  { %v3518_v28 = vpop.permute.xlu1 %3517 }
0x38cd   :  { %v3521_v23 = vpop.permute.xlu0 %3520  ;;  %v3525_v25 = vrot.slane %v3518_v28, %v8376_v51  ;;  %v8751_v28 = vld [vmem:[%s9145_s14] ss:$0 sm:$0xff] }
0x38ce   :  { %v3529_v58 = vrot.slane %v3521_v23, %v8376_v51 }
0x38d0   :  { %v3530_v29 = vsel %vm1766_vm13, %v3529_v58, %v3525_v25 }
0x38d1   :  { %v3532_v34 = vsel %vm1769_vm14, %v3530_v29, 0.0 }
0x38d2   :  { %3533 = vadd.xlane.f32.xlu1 %v3532_v34 }
0x395f   :  { %v3534_v42 = vpop.xlane.xlu1 %3533 }
0x3960   :  { %7449 = vrcp.f32 %v3534_v42 }
0x396a   :  { %v7450_v27 = vpop.eup %7449 }
0x396b   :  { %v3540_v35 = vrot.slane %v7450_v27, %v8045_v53  ;;  %v3544_v38 = vrot.slane %v7450_v27, %v8383_v61 }
0x396d   :  { %v3547_v37 = vmul.f32 %v7446_v19, %v3540_v35  ;;  %v3548_v40 = vmul.f32 %v7448_v26, %v3544_v38 }
0x396f   :  { %3551 = vperm.xlu0 %7336, %v3547_v37  }
0x3973   :  { %3556 = vperm.xlu0 %7336, %v3548_v40  }
0x3977   :  { %3575 = vrot.lane.b32.xlu0 %v8681_v6, %s7761_s4 }
0x39ee   :  { %v3552_v32 = vpop.permute.xlu0 %3551 }
0x39ef   :  { %v3559_v5 = vmul.f32 %v3552_v32, %v8368_v63 }
0x39f1   :  { %v3561_v59 = vsel %vm168_vm1, %v3559_v5, 0.0 }
0x39f2   :  { %v3562_v24 = vrot.slane %v3561_v59, 4  ;;  %v3557_v47 = vpop.permute.xlu0 %3556 }
0x39f3   :  { %v3560_v49 = vmul.f32 %v3557_v47, %v8356_v46 }
0x39f4   :  { %v3563_v11 = vadd.f32 %v3562_v24, %v3561_v59 }
0x39f5   :  { %v3568_v33 = vsel %vm168_vm1, %v3560_v49, 0.0 }
0x39f6   :  { %v3564_v56 = vrot.slane %v3563_v11, 2  ;;  %v3569_v43 = vrot.slane %v3568_v33, 4  ;;  %v3576_v52 = vpop.permute.xlu0 %3575 }
0x39f7   :  { %6775 = vmatmul.mubr.msk.f32.vlgmr.msra.gmra.mrb[26].mxu0 %vm168_vm1, %v3576_v52 }
0x39f8   :  { %v3565_v55 = vadd.f32 %v3564_v56, %v3563_v11  ;;  %v3570_v62 = vadd.f32 %v3569_v43, %v3568_v33  ;;  %7191 = vmatpush3.bf16.msra.mxu0 %v8438_v57  ;;  %6796 = vmatprep.mubr.msk.f32.mxu0 %vm7757_vm0, %v7758_v1 }
0x39f9   :  { %7192 = vmatprep.subr.bf16.mxu0 %v7756_v0 }
0x39fa   :  { %v3571_v3 = vrot.slane %v3570_v62, 2  ;;  %v3566_v4 = vrot.slane %v3565_v55, 1 }
0x39fc   :  { %v3572_v8 = vadd.f32 %v3571_v3, %v3570_v62  ;;  %7194 = vmatpush3.bf16.msra.mxu0 %v8441_v30  ;;  %v3567_v7 = vadd.f32 %v3566_v4, %v3565_v55 }
0x39fd   :  { %7201 = vmatprep.subr.bf16.mxu0 %v7756_v0 }
0x39fe   :  { %v3573_v60 = vrot.slane %v3572_v8, 1 }
0x3a00   :  { %v3574_v2 = vadd.f32 %v3573_v60, %v3572_v8 }
0x3a02   :  { %v3651_v21 = vsel %vm1766_vm13, %v3574_v2, %v3567_v7 }
0x3a03   :  { %6786 = vmatmul.mubr.msk.f32.vlgmr.msra.gmra.mrb[26].mxu1 %vm168_vm1, %v3651_v21 }
0x3a04   :  { %7197 = vmatpush3.bf16.msra.mxu1 %v8208_v36  ;;  %6807 = vmatprep.mubr.msk.f32.mxu1 %vm7757_vm0, %v7758_v1 }
0x3a05   :  { %7198 = vmatprep.subr.bf16.mxu1 %v7756_v0 }
0x3a08   :  { %7200 = vmatpush3.bf16.msra.mxu1 %v8213_v16 }
0x3a09   :  { %7207 = vmatprep.subr.bf16.mxu1 %v7756_v0 }
0x3aca   :  { %v3645_v10 = vpop.f32.mrb[26].mxu0 }
0x3acb   :  { %v6776_v12 = vpop.f32.mrb[27].mxu0 }
0x3ad6   :  { %v3720_v14 = vpop.f32.mrb[26].mxu1 }
0x3ad7   :  { %v3721_v13 = vadd.f32 %v3720_v14, %v3645_v10  ;;  %v6787_v15 = vpop.f32.mrb[27].mxu1 }
0x3ad9   :  { %v3724_v22 = vadd.f32 %v8731_v20, %v3721_v13 }
0x3adb   :  { %7451 = vtanh.f32 %v3724_v22 }
0x3ae5   :  { %v7452_v19 = vpop.eup %7451 }
0x3ae6   :  { %6797 = vmatmul.mubr.msk.f32.vlgmr.msra.gmra.mrb[28].mxu0 %vm168_vm1, %v7452_v19 }
0x3ae7   :  { %7203 = vmatpush3.bf16.msra.mxu0 %v8210_v41  ;;  %6818 = vmatprep.mubr.msk.f32.mxu0 %vm7757_vm0, %v7758_v1 }
0x3ae8   :  { %7204 = vmatprep.subr.bf16.mxu0 %v7756_v0 }
0x3aeb   :  { %7206 = vmatpush3.bf16.msra.mxu0 %v8217_v17 }
0x3aec   :  { %7213 = vmatprep.subr.bf16.mxu0 %v7756_v0 }
0x3aee   :  { %6819 = vmatmul.mubr.msk.f32.vlgmr.msra.gmra.mrb[30].mxu0 %vm168_vm1, %v3576_v52 }
0x3aef   :  { %7215 = vmatpush3.bf16.msra.mxu0 %v8409_v50  ;;  %6840 = vmatprep.mubr.msk.f32.mxu0 %vm7757_vm0, %v7758_v1 }
0x3af0   :  { %7216 = vmatprep.subr.bf16.mxu0 %v7756_v0 }
0x3af3   :  { %7218 = vmatpush3.bf16.msra.mxu0 %v8419_v54 }
0x3af4   :  { %7225 = vmatprep.subr.bf16.mxu0 %v7756_v0 }
0x3bb9   :  { %v3795_v26 = vpop.f32.mrb[28].mxu0 }
0x3bba   :  { %v3796_v23 = vadd.f32 %v8751_v28, %v3795_v26  ;;  %v6798_v25 = vpop.f32.mrb[29].mxu0 }
0x3bbc   :  { %v3799_v58 = vsel %vm2087_vm15, %v3796_v23, -inf }
0x3bbd   :  { %3800 = vmax.xlane.f32.xlu0 %v3799_v58 }
0x3bc1   :  { %v3978_v29 = vpop.f32.mrb[30].mxu0 }
0x3bc2   :  { %v6820_v34 = vpop.f32.mrb[31].mxu0  ;;  %v3979_v42 = vadd.f32 %v8655_v9, %v3978_v29 }
0x3bd3   :  { %3990 = vrot.lane.b32.xlu0 %v3979_v42, %s7760_s25 }
0x3c4a   :  { %v3801_v27 = vpop.xlane.xlu0 %3800 }
0x3c4b   :  { %v3802_v35 = vsub.f32 %v3796_v23, %v3801_v27 }
0x3c4d   :  { %v3803_v37 = vmul.f32 1.442695, %v3802_v35 }
0x3c4e   :  { %v3991_v25 = vpop.permute.xlu0 %3990 }
0x3c4f   :  { %7453 = vpow2.f32 %v3803_v37 }
0x3c59   :  { %v7454_v38 = vpop.eup %7453 }
0x3c5a   :  { %v3805_v40 = vsel %vm2087_vm15, %v7454_v38, 0.0 }
0x3c5b   :  { %3806 = vadd.xlane.f32.xlu1 %v3805_v40 }
0x3ce8   :  { %v3807_v32 = vpop.xlane.xlu1 %3806 }
0x3ce9   :  { %7455 = vlog2.f32 %v3807_v32 }
0x3cf3   :  { %v7456_v5 = vpop.eup %7455 }
0x3cf4   :  { %v3809_v59 = vmul.f32 0.6931472, %v7456_v5 }
0x3cf6   :  { %v3810_v24 = vadd.f32 %v3809_v59, %v3801_v27 }
0x3cf8   :  { %v3811_v47 = vsub.f32 %v3796_v23, %v3810_v24 }
0x3cfa   :  { %v3814_v49 = vsel %vm2087_vm15, %v3811_v47, -inf  ;;  %3813 = vst [vmem:[#allocation14 + $0x6] sm:$0x3] %v3811_v47 }
0x3cfb   :  { %3815 = vmax.xlane.f32.xlu1 %v3814_v49 }
0x3d88   :  { %v3816_v11 = vpop.xlane.xlu1 %3815 }
0x3d89   :  { %vm3817_vm2 = vcmp.ge.f32.partialorder %v3811_v47, %v3816_v11 }
0x3d8a   :  { %v3818_v33 = vsel %vm3817_vm2, %v8225_v44, 128 }
0x3d8b   :  { %v3819_v56 = vsel %vm2087_vm15, %v3818_v33, 2147483647 }
0x3d8c   :  { %v3821_v43 = vshra.s32 %v3819_v56, 16  ;;  %v3820_v55 = vand.u32 65535, %v3819_v56 }
0x3d8e   :  { %v3823_v52 = vcvt.s32.f32 %v3821_v43  ;;  %v3822_v3 = vcvt.s32.f32 %v3820_v55 }
0x3d90   :  { %3824 = vmin.xlane.f32.xlu1 %v3823_v52 }
0x3e1d   :  { %v3825_v62 = vpop.xlane.xlu1 %3824 }
0x3e1e   :  { %vm3826_vm3 = vcmp.eq.f32.partialorder %v3823_v52, %v3825_v62  ;;  %v3831_v8 = vcvt.f32.s32 %v3825_v62 }
0x3e1f   :  { %v3827_v4 = vsel %vm3826_vm3, %v3822_v3, inf }
0x3e20   :  { %3828 = vmin.xlane.f32.xlu1 %v3827_v4  ;;  %v3832_v7 = vshll.u32 %v3831_v8, 16 }
0x3ead   :  { %v3829_v60 = vpop.xlane.xlu1 %3828 }
0x3eae   :  { %v3830_v2 = vcvt.f32.s32 %v3829_v60 }
0x3eb0   :  { %v3833_v21 = vadd.s32 %v3832_v7, %v3830_v2 }
0x3eb2   :  { %v8763_v10 = vsel %vm3834_vm7, %v3833_v21, %v8661_v18  ;;  %vm3836_vm4 = vcmp.eq.s32.totalorder %v3833_v21, %v8225_v44 }
0x3eb3   :  { %v6206_v12 = vsel %vm3836_vm4, 1.0, %v7758_v1  ;;  %vm5547_vm4 = vcmp.eq.s32.totalorder %v8225_v44, 6 }
0x3eb4   :  { %6808 = vmatmul.mubr.msk.f32.vlgmr.msra.gmra.mrb[28].mxu1 %vm168_vm1, %v6206_v12 }
0x3eb5   :  { %7209 = vmatpush3.bf16.msra.mxu1 %v8393_v39  ;;  %6829 = vmatprep.mubr.msk.f32.mxu1 %vm7757_vm0, %v7758_v1 }
0x3eb6   :  { %7210 = vmatprep.subr.bf16.mxu1 %v7756_v0 }
0x3eb9   :  { %7212 = vmatpush3.bf16.msra.mxu1 %v8397_v45 }
0x3eba   :  { %7219 = vmatprep.subr.bf16.mxu1 %v7756_v0 }
0x3f87   :  { %v3908_v14 = vpop.f32.mrb[28].mxu1 }
0x3f88   :  { %v3909_v18 = vadd.f32 %v8675_v31, %v3908_v14  ;;  %v6809_v13 = vpop.f32.mrb[29].mxu1 }
0x3f8a   :  { %v3982_v15 = vadd.f32 %v3979_v42, %v3909_v18 }
0x3f8c   :  { %v6209_v22 = vmul.f32 -1.442695, %v3982_v15 }
0x3f8e   :  { %7457 = vpow2.f32 %v6209_v22 }
0x3f98   :  { %v7458_v19 = vpop.eup %7457 }
0x3f99   :  { %v3986_v26 = vadd.f32 1.0, %v7458_v19 }
0x3f9b   :  { %7459 = vrcp.f32 %v3986_v26 }
0x3fa5   :  { %v7460_v23 = vpop.eup %7459 }
0x3fa6   :  { %v3993_v58 = vmul.f32 %v7460_v23, %v3991_v25  ;;  %v4000_v35 = vsub.f32 1.0, %v7460_v23  ;;  %v4006_v42 = vmul.f32 %v7460_v23, %v8681_v6 }
0x3fa8   :  { %3995 = vrot.lane.b32.xlu1 %v3993_v58, %s7760_s25 }
0x401a   :  { %v3996_v29 = vpop.permute.xlu1 %3995 }
0x401b   :  { %v3998_v34 = vadd.f32 %v3996_v29, %v3909_v18 }
0x401d   :  { %7461 = vtanh.f32 %v3998_v34 }
0x4027   :  { %v7462_v27 = vpop.eup %7461 }
0x4028   :  { %4002 = vrot.lane.b32.xlu1 %v7462_v27, %s7761_s4 }
0x409a   :  { %v4003_v37 = vpop.permute.xlu1 %4002 }
0x409b   :  { %v4005_v38 = vmul.f32 %v4003_v37, %v4000_v35 }
0x409d   :  { %v8778_v40 = vadd.f32 %v4006_v42, %v4005_v38 }
0x409f   :  { %v4015_v32 = vrot.slane %v8778_v40, %v8036_v48 }
0x40a1   :  { %v4016_v5 = vcombine.high %v4015_v32, %v4015_v32  ;;  %v4023_v59 = vrot.slane %v4015_v32, %v8036_v48 }
0x40a3   :  { %v4034_v24 = vrot.slane %v4023_v59, %v8045_v53  ;;  %v4030_v47 = vrot.slane %v4016_v5, %v8036_v48 }
0x40a5   :  { %4039 = vrot.lane.b32.xlu0 %v4034_v24, %s7761_s4  ;;  %v4038_v49 = vrot.slane %v4030_v47, %v8045_v53 }
0x40a7   :  { %4041 = vrot.lane.b32.xlu1 %v4038_v49, %s7761_s4 }
0x4117   :  { %v4040_v6 = vpop.permute.xlu0 %4039 }
0x4118   :  { %v4045_v11 = vmul.f32 %v4040_v6, %v8368_v63 }
0x4119   :  { %v4042_v33 = vpop.permute.xlu1 %4041 }
0x411a   :  { %v4046_v56 = vmul.f32 %v4042_v33, %v8356_v46  ;;  %v4047_v43 = vsel %vm168_vm1, %v4045_v11, 0.0 }
0x411b   :  { %4048 = vadd.xlane.f32.xlu0 %v4047_v43 }
0x411c   :  { %v4050_v52 = vsel %vm168_vm1, %v4046_v56, 0.0 }
0x411d   :  { %4051 = vadd.xlane.f32.xlu1 %v4050_v52 }
0x41a8   :  { %v4049_v55 = vpop.xlane.xlu0 %4048 }
0x41a9   :  { %v4058_v3 = vrot.slane %v4049_v55, %v8376_v51 }
0x41aa   :  { %v4052_v62 = vpop.xlane.xlu1 %4051 }
0x41ab   :  { %v4062_v4 = vrot.slane %v4052_v62, %v8376_v51 }
0x41ad   :  { %v4063_v8 = vsel %vm1766_vm13, %v4062_v4, %v4058_v3 }
0x41ae   :  { %v4065_v60 = vsel %vm1769_vm14, %v4063_v8, -inf }
0x41af   :  { %4066 = vmax.xlane.f32.xlu0 %v4065_v60 }
0x423c   :  { %v4067_v7 = vpop.xlane.xlu0 %4066 }
0x423d   :  { %v4072_v2 = vrot.slane %v4067_v7, %v8045_v53  ;;  %v4076_v21 = vrot.slane %v4067_v7, %v8383_v61 }
0x423f   :  { %v4079_v12 = vsub.f32 %v4049_v55, %v4072_v2  ;;  %v4080_v14 = vsub.f32 %v4052_v62, %v4076_v21 }
0x4241   :  { %v4081_v18 = vmul.f32 1.442695, %v4079_v12  ;;  %v4083_v13 = vmul.f32 1.442695, %v4080_v14 }
0x4243   :  { %7463 = vpow2.f32 %v4081_v18 }
0x4244   :  { %7465 = vpow2.f32 %v4083_v13 }
0x424d   :  { %v7464_v15 = vpop.eup %7463 }
0x424e   :  { %v7466_v22 = vpop.eup %7465  ;;  %4088 = vperm.xlu0 %7336, %v7464_v15  }
0x424f   :  { %4091 = vperm.xlu1 %7335, %v7466_v22  }
0x42cd   :  { %v4089_v19 = vpop.permute.xlu0 %4088 }
0x42ce   :  { %v4092_v26 = vpop.permute.xlu1 %4091  ;;  %v4096_v23 = vrot.slane %v4089_v19, %v8376_v51 }
0x42cf   :  { %v4100_v25 = vrot.slane %v4092_v26, %v8376_v51 }
0x42d1   :  { %v4101_v58 = vsel %vm1766_vm13, %v4100_v25, %v4096_v23 }
0x42d2   :  { %v4103_v29 = vsel %vm1769_vm14, %v4101_v58, 0.0 }
0x42d3   :  { %4104 = vadd.xlane.f32.xlu1 %v4103_v29 }
0x4360   :  { %v4105_v34 = vpop.xlane.xlu1 %4104 }
0x4361   :  { %7467 = vrcp.f32 %v4105_v34 }
0x436b   :  { %v7468_v27 = vpop.eup %7467 }
0x436c   :  { %v4111_v35 = vrot.slane %v7468_v27, %v8045_v53  ;;  %v4115_v42 = vrot.slane %v7468_v27, %v8383_v61 }
0x436e   :  { %v4118_v37 = vmul.f32 %v7464_v15, %v4111_v35  ;;  %v4119_v38 = vmul.f32 %v7466_v22, %v4115_v42 }
0x4370   :  { %4122 = vperm.xlu0 %7336, %v4118_v37  }
0x4374   :  { %4127 = vperm.xlu0 %7336, %v4119_v38  }
0x4378   :  { %4146 = vrot.lane.b32.xlu0 %v8778_v40, %s7761_s4 }
0x43ef   :  { %v4123_v32 = vpop.permute.xlu0 %4122 }
0x43f0   :  { %v4130_v5 = vmul.f32 %v4123_v32, %v8368_v63 }
0x43f2   :  { %v4132_v59 = vsel %vm168_vm1, %v4130_v5, 0.0 }
0x43f3   :  { %v4133_v24 = vrot.slane %v4132_v59, 4  ;;  %v4128_v47 = vpop.permute.xlu0 %4127 }
0x43f4   :  { %v4131_v49 = vmul.f32 %v4128_v47, %v8356_v46 }
0x43f5   :  { %v4134_v6 = vadd.f32 %v4133_v24, %v4132_v59 }
0x43f6   :  { %v4139_v11 = vsel %vm168_vm1, %v4131_v49, 0.0 }
0x43f7   :  { %v4135_v33 = vrot.slane %v4134_v6, 2  ;;  %v4140_v56 = vrot.slane %v4139_v11, 4  ;;  %v4147_v43 = vpop.permute.xlu0 %4146 }
0x43f8   :  { %6830 = vmatmul.mubr.msk.f32.vlgmr.msra.gmra.mrb[30].mxu1 %vm168_vm1, %v4147_v43 }
0x43f9   :  { %v4136_v52 = vadd.f32 %v4135_v33, %v4134_v6  ;;  %v4141_v55 = vadd.f32 %v4140_v56, %v4139_v11  ;;  %7221 = vmatpush3.bf16.msra.mxu1 %v8438_v57  ;;  %6851 = vmatprep.mubr.msk.f32.mxu1 %vm7757_vm0, %v7758_v1 }
0x43fa   :  { %7222 = vmatprep.subr.bf16.mxu1 %v7756_v0 }
0x43fb   :  { %v4142_v62 = vrot.slane %v4141_v55, 2  ;;  %v4137_v3 = vrot.slane %v4136_v52, 1 }
0x43fd   :  { %v4143_v4 = vadd.f32 %v4142_v62, %v4141_v55  ;;  %7224 = vmatpush3.bf16.msra.mxu1 %v8441_v30  ;;  %v4138_v60 = vadd.f32 %v4137_v3, %v4136_v52 }
0x43fe   :  { %7231 = vmatprep.subr.bf16.mxu1 %v7756_v0 }
0x43ff   :  { %v4144_v8 = vrot.slane %v4143_v4, 1 }
0x4401   :  { %v4145_v7 = vadd.f32 %v4144_v8, %v4143_v4 }
0x4403   :  { %v4222_v2 = vsel %vm1766_vm13, %v4145_v7, %v4138_v60 }
0x4404   :  { %6841 = vmatmul.mubr.msk.f32.vlgmr.msra.gmra.mrb[32].mxu0 %vm168_vm1, %v4222_v2 }
0x4405   :  { %7227 = vmatpush3.bf16.msra.mxu0 %v8208_v36  ;;  %6862 = vmatprep.mubr.msk.f32.mxu0 %vm7757_vm0, %v7758_v1 }
0x4406   :  { %7228 = vmatprep.subr.bf16.mxu0 %v7756_v0 }
0x4409   :  { %7230 = vmatpush3.bf16.msra.mxu0 %v8213_v16 }
0x440a   :  { %7237 = vmatprep.subr.bf16.mxu0 %v7756_v0 }
0x44cb   :  { %v4216_v21 = vpop.f32.mrb[30].mxu1 }
0x44cc   :  { %v6831_v12 = vpop.f32.mrb[31].mxu1 }
0x44d7   :  { %v4291_v14 = vpop.f32.mrb[32].mxu0 }
0x44d8   :  { %v4292_v18 = vadd.f32 %v4291_v14, %v4216_v21  ;;  %v6842_v13 = vpop.f32.mrb[33].mxu0 }
0x44da   :  { %v4295_v15 = vadd.f32 %v8731_v20, %v4292_v18 }
0x44dc   :  { %7469 = vtanh.f32 %v4295_v15 }
0x44e6   :  { %v7470_v22 = vpop.eup %7469 }
0x44e7   :  { %6852 = vmatmul.mubr.msk.f32.vlgmr.msra.gmra.mrb[32].mxu1 %vm168_vm1, %v7470_v22 }
0x44e8   :  { %7233 = vmatpush3.bf16.msra.mxu1 %v8210_v41  ;;  %6873 = vmatprep.mubr.msk.f32.mxu1 %vm7757_vm0, %v7758_v1 }
0x44e9   :  { %7234 = vmatprep.subr.bf16.mxu1 %v7756_v0 }
0x44ec   :  { %7236 = vmatpush3.bf16.msra.mxu1 %v8217_v17 }
0x44ed   :  { %7243 = vmatprep.subr.bf16.mxu1 %v7756_v0 }
0x44ef   :  { %6874 = vmatmul.mubr.msk.f32.vlgmr.msra.gmra.mrb[34].mxu1 %vm168_vm1, %v4147_v43 }
0x44f0   :  { %7245 = vmatpush3.bf16.msra.mxu1 %v8409_v50  ;;  %6895 = vmatprep.mubr.msk.f32.mxu1 %vm7757_vm0, %v7758_v1 }
0x44f1   :  { %7246 = vmatprep.subr.bf16.mxu1 %v7756_v0 }
0x44f4   :  { %7248 = vmatpush3.bf16.msra.mxu1 %v8419_v54 }
0x44f5   :  { %7255 = vmatprep.subr.bf16.mxu1 %v7756_v0 }
0x45ba   :  { %v4366_v19 = vpop.f32.mrb[32].mxu1 }
0x45bb   :  { %v4367_v26 = vadd.f32 %v8751_v28, %v4366_v19  ;;  %v6853_v23 = vpop.f32.mrb[33].mxu1 }
0x45bd   :  { %v4370_v25 = vsel %vm2087_vm15, %v4367_v26, -inf }
0x45be   :  { %4371 = vmax.xlane.f32.xlu0 %v4370_v25 }
0x45c2   :  { %v4549_v58 = vpop.f32.mrb[34].mxu1 }
0x45c3   :  { %v6875_v29 = vpop.f32.mrb[35].mxu1  ;;  %v4550_v43 = vadd.f32 %v8655_v9, %v4549_v58 }
0x464b   :  { %v4372_v34 = vpop.xlane.xlu0 %4371 }
0x464c   :  { %v4373_v27 = vsub.f32 %v4367_v26, %v4372_v34 }
0x464e   :  { %v4374_v35 = vmul.f32 1.442695, %v4373_v27 }
0x4650   :  { %7471 = vpow2.f32 %v4374_v35 }
0x465a   :  { %v7472_v37 = vpop.eup %7471 }
0x465b   :  { %v4376_v42 = vsel %vm2087_vm15, %v7472_v37, 0.0 }
0x465c   :  { %4377 = vadd.xlane.f32.xlu1 %v4376_v42 }
0x46e9   :  { %v4378_v38 = vpop.xlane.xlu1 %4377 }
0x46ea   :  { %7473 = vlog2.f32 %v4378_v38 }
0x46f4   :  { %v7474_v32 = vpop.eup %7473 }
0x46f5   :  { %v4380_v5 = vmul.f32 0.6931472, %v7474_v32 }
0x46f7   :  { %v4381_v59 = vadd.f32 %v4380_v5, %v4372_v34 }
0x46f9   :  { %v4382_v24 = vsub.f32 %v4367_v26, %v4381_v59 }
0x46fb   :  { %v4385_v47 = vsel %vm2087_vm15, %v4382_v24, -inf  ;;  %4384 = vst [vmem:[#allocation14 + $0x8] sm:$0x3] %v4382_v24 }
0x46fc   :  { %4386 = vmax.xlane.f32.xlu1 %v4385_v47 }
0x4789   :  { %v4387_v49 = vpop.xlane.xlu1 %4386 }
0x478a   :  { %vm4388_vm6 = vcmp.ge.f32.partialorder %v4382_v24, %v4387_v49 }
0x478b   :  { %v4389_v6 = vsel %vm4388_vm6, %v8225_v44, 128 }
0x478c   :  { %v4390_v11 = vsel %vm2087_vm15, %v4389_v6, 2147483647 }
0x478d   :  { %v4392_v33 = vshra.s32 %v4390_v11, 16  ;;  %v4391_v52 = vand.u32 65535, %v4390_v11 }
0x478f   :  { %v4394_v56 = vcvt.s32.f32 %v4392_v33  ;;  %v4393_v62 = vcvt.s32.f32 %v4391_v52 }
0x4791   :  { %4395 = vmin.xlane.f32.xlu1 %v4394_v56 }
0x47a2   :  { %4561 = vrot.lane.b32.xlu1 %v4550_v43, %s7760_s25 }
0x481e   :  { %v4396_v55 = vpop.xlane.xlu1 %4395 }
0x481f   :  { %vm4397_vm8 = vcmp.eq.f32.partialorder %v4394_v56, %v4396_v55  ;;  %v4402_v4 = vcvt.f32.s32 %v4396_v55 }
0x4820   :  { %v4398_v3 = vsel %vm4397_vm8, %v4393_v62, inf }
0x4821   :  { %4399 = vmin.xlane.f32.xlu0 %v4398_v3  ;;  %v4403_v60 = vshll.u32 %v4402_v4, 16 }
0x4822   :  { %v4562_v26 = vpop.permute.xlu1 %4561 }
0x48ae   :  { %v4400_v8 = vpop.xlane.xlu0 %4399 }
0x48af   :  { %v4401_v7 = vcvt.f32.s32 %v4400_v8 }
0x48b1   :  { %v4404_v2 = vadd.s32 %v4403_v60, %v4401_v7 }
0x48b3   :  { %v8850_v21 = vsel %vm4405_vm9, %v4404_v2, %v8763_v10  ;;  %vm4407_vm5 = vcmp.eq.s32.totalorder %v4404_v2, %v8225_v44 }
0x48b4   :  { %v6213_v9 = vsel %vm4407_vm5, 1.0, %v7758_v1 }
0x48b5   :  { %6863 = vmatmul.mubr.msk.f32.vlgmr.msra.gmra.mrb[34].mxu0 %vm168_vm1, %v6213_v9 }
0x48b6   :  { %7239 = vmatpush3.bf16.msra.mxu0 %v8393_v39  ;;  %6884 = vmatprep.mubr.msk.f32.mxu0 %vm7757_vm0, %v7758_v1 }
0x48b7   :  { %7240 = vmatprep.subr.bf16.mxu0 %v7756_v0 }
0x48ba   :  { %7242 = vmatpush3.bf16.msra.mxu0 %v8397_v45 }
0x48bb   :  { %7249 = vmatprep.subr.bf16.mxu0 %v7756_v0 }
0x4988   :  { %v4479_v12 = vpop.f32.mrb[34].mxu0 }
0x4989   :  { %v4480_v10 = vadd.f32 %v8675_v31, %v4479_v12  ;;  %v6864_v14 = vpop.f32.mrb[35].mxu0 }
0x498b   :  { %v4553_v18 = vadd.f32 %v4550_v43, %v4480_v10 }
0x498d   :  { %v6216_v13 = vmul.f32 -1.442695, %v4553_v18 }
0x498f   :  { %7475 = vpow2.f32 %v6216_v13 }
0x4999   :  { %v7476_v15 = vpop.eup %7475 }
0x499a   :  { %v4557_v22 = vadd.f32 1.0, %v7476_v15 }
0x499c   :  { %7477 = vrcp.f32 %v4557_v22 }
0x49a6   :  { %v7478_v19 = vpop.eup %7477 }
0x49a7   :  { %v4564_v23 = vmul.f32 %v7478_v19, %v4562_v26  ;;  %v4571_v34 = vsub.f32 1.0, %v7478_v19  ;;  %v4577_v27 = vmul.f32 %v7478_v19, %v8778_v40 }
0x49a9   :  { %4566 = vrot.lane.b32.xlu0 %v4564_v23, %s7760_s25 }
0x4a1b   :  { %v4567_v25 = vpop.permute.xlu0 %4566 }
0x4a1c   :  { %v4569_v58 = vadd.f32 %v4567_v25, %v4480_v10 }
0x4a1e   :  { %7479 = vtanh.f32 %v4569_v58 }
0x4a28   :  { %v7480_v29 = vpop.eup %7479 }
0x4a29   :  { %4573 = vrot.lane.b32.xlu1 %v7480_v29, %s7761_s4 }
0x4a9b   :  { %v4574_v31 = vpop.permute.xlu1 %4573 }
0x4a9c   :  { %v4576_v35 = vmul.f32 %v4574_v31, %v4571_v34 }
0x4a9e   :  { %v8865_v37 = vadd.f32 %v4577_v27, %v4576_v35 }
0x4aa0   :  { %v4586_v42 = vrot.slane %v8865_v37, %v8036_v48 }
0x4aa2   :  { %v4587_v38 = vcombine.high %v4586_v42, %v4586_v42  ;;  %v4594_v32 = vrot.slane %v4586_v42, %v8036_v48 }
0x4aa4   :  { %v4605_v5 = vrot.slane %v4594_v32, %v8045_v53  ;;  %v4601_v59 = vrot.slane %v4587_v38, %v8036_v48 }
0x4aa6   :  { %4610 = vrot.lane.b32.xlu1 %v4605_v5, %s7761_s4  ;;  %v4609_v24 = vrot.slane %v4601_v59, %v8045_v53 }
0x4aa8   :  { %4612 = vrot.lane.b32.xlu0 %v4609_v24, %s7761_s4 }
0x4b18   :  { %v4611_v40 = vpop.permute.xlu1 %4610 }
0x4b19   :  { %v4616_v47 = vmul.f32 %v4611_v40, %v8368_v63 }
0x4b1a   :  { %v4613_v49 = vpop.permute.xlu0 %4612 }
0x4b1b   :  { %v4617_v6 = vmul.f32 %v4613_v49, %v8356_v46  ;;  %v4618_v11 = vsel %vm168_vm1, %v4616_v47, 0.0 }
0x4b1c   :  { %4619 = vadd.xlane.f32.xlu1 %v4618_v11 }
0x4b1d   :  { %v4621_v33 = vsel %vm168_vm1, %v4617_v6, 0.0 }
0x4b1e   :  { %4622 = vadd.xlane.f32.xlu0 %v4621_v33 }
0x4ba9   :  { %v4620_v56 = vpop.xlane.xlu1 %4619 }
0x4baa   :  { %v4629_v52 = vrot.slane %v4620_v56, %v8376_v51 }
0x4bab   :  { %v4623_v43 = vpop.xlane.xlu0 %4622 }
0x4bac   :  { %v4633_v55 = vrot.slane %v4623_v43, %v8376_v51 }
0x4bae   :  { %v4634_v62 = vsel %vm1766_vm13, %v4633_v55, %v4629_v52 }
0x4baf   :  { %v4636_v3 = vsel %vm1769_vm14, %v4634_v62, -inf }
0x4bb0   :  { %4637 = vmax.xlane.f32.xlu0 %v4636_v3 }
0x4c3d   :  { %v4638_v4 = vpop.xlane.xlu0 %4637 }
0x4c3e   :  { %v4643_v8 = vrot.slane %v4638_v4, %v8045_v53  ;;  %v4647_v60 = vrot.slane %v4638_v4, %v8383_v61 }
0x4c40   :  { %v4650_v7 = vsub.f32 %v4620_v56, %v4643_v8  ;;  %v4651_v2 = vsub.f32 %v4623_v43, %v4647_v60 }
0x4c42   :  { %v4652_v9 = vmul.f32 1.442695, %v4650_v7  ;;  %v4654_v12 = vmul.f32 1.442695, %v4651_v2 }
0x4c44   :  { %7481 = vpow2.f32 %v4652_v9 }
0x4c45   :  { %7483 = vpow2.f32 %v4654_v12 }
0x4c4e   :  { %v7482_v10 = vpop.eup %7481 }
0x4c4f   :  { %v7484_v14 = vpop.eup %7483  ;;  %4659 = vperm.xlu1 %7335, %v7482_v10  }
0x4c50   :  { %4662 = vperm.xlu0 %7336, %v7484_v14  }
0x4cce   :  { %v4660_v18 = vpop.permute.xlu1 %4659 }
0x4ccf   :  { %v4663_v13 = vpop.permute.xlu0 %4662  ;;  %v4667_v15 = vrot.slane %v4660_v18, %v8376_v51 }
0x4cd0   :  { %v4671_v22 = vrot.slane %v4663_v13, %v8376_v51 }
0x4cd2   :  { %v4672_v19 = vsel %vm1766_vm13, %v4671_v22, %v4667_v15  ;;  %v8932_v22 = vld [vmem:[%s9140_s9] ss:$0 sm:$0xff] }
0x4cd3   :  { %v4674_v26 = vsel %vm1769_vm14, %v4672_v19, 0.0 }
0x4cd4   :  { %4675 = vadd.xlane.f32.xlu1 %v4674_v26 }
0x4d61   :  { %v4676_v23 = vpop.xlane.xlu1 %4675 }
0x4d62   :  { %7485 = vrcp.f32 %v4676_v23 }
0x4d6c   :  { %v7486_v25 = vpop.eup %7485 }
0x4d6d   :  { %v4682_v58 = vrot.slane %v7486_v25, %v8045_v53  ;;  %v4686_v34 = vrot.slane %v7486_v25, %v8383_v61 }
0x4d6f   :  { %v4689_v29 = vmul.f32 %v7482_v10, %v4682_v58  ;;  %v4690_v31 = vmul.f32 %v7484_v14, %v4686_v34 }
0x4d71   :  { %4693 = vperm.xlu0 %7336, %v4689_v29  }
0x4d75   :  { %4698 = vperm.xlu0 %7336, %v4690_v31  }
0x4d79   :  { %4717 = vrot.lane.b32.xlu0 %v8865_v37, %s7761_s4 }
0x4df0   :  { %v4694_v27 = vpop.permute.xlu0 %4693 }
0x4df1   :  { %v4701_v35 = vmul.f32 %v4694_v27, %v8368_v63 }
0x4df3   :  { %v4703_v42 = vsel %vm168_vm1, %v4701_v35, 0.0 }
0x4df4   :  { %v4704_v38 = vrot.slane %v4703_v42, 4  ;;  %v4699_v32 = vpop.permute.xlu0 %4698 }
0x4df5   :  { %v4702_v5 = vmul.f32 %v4699_v32, %v8356_v46 }
0x4df6   :  { %v4705_v59 = vadd.f32 %v4704_v38, %v4703_v42 }
0x4df7   :  { %v4710_v24 = vsel %vm168_vm1, %v4702_v5, 0.0 }
0x4df8   :  { %v4706_v40 = vrot.slane %v4705_v59, 2  ;;  %v4711_v47 = vrot.slane %v4710_v24, 4  ;;  %v4718_v49 = vpop.permute.xlu0 %4717 }
0x4df9   :  { %6885 = vmatmul.mubr.msk.f32.vlgmr.msra.gmra.mrb[36].mxu0 %vm168_vm1, %v4718_v49 }
0x4dfa   :  { %v4707_v6 = vadd.f32 %v4706_v40, %v4705_v59  ;;  %v4712_v11 = vadd.f32 %v4711_v47, %v4710_v24  ;;  %7251 = vmatpush3.bf16.msra.mxu0 %v8438_v57  ;;  %6906 = vmatprep.mubr.msk.f32.mxu0 %vm7757_vm0, %v7758_v1 }
0x4dfb   :  { %7252 = vmatprep.subr.bf16.mxu0 %v7756_v0 }
0x4dfc   :  { %v4713_v33 = vrot.slane %v4712_v11, 2  ;;  %v4708_v56 = vrot.slane %v4707_v6, 1 }
0x4dfe   :  { %v4714_v43 = vadd.f32 %v4713_v33, %v4712_v11  ;;  %7254 = vmatpush3.bf16.msra.mxu0 %v8441_v30  ;;  %v4709_v55 = vadd.f32 %v4708_v56, %v4707_v6 }
0x4dff   :  { %7261 = vmatprep.subr.bf16.mxu0 %v7756_v0 }
0x4e00   :  { %v4715_v52 = vrot.slane %v4714_v43, 1 }
0x4e02   :  { %v4716_v62 = vadd.f32 %v4715_v52, %v4714_v43 }
0x4e04   :  { %v4793_v3 = vsel %vm1766_vm13, %v4716_v62, %v4709_v55 }
0x4e05   :  { %6896 = vmatmul.mubr.msk.f32.vlgmr.msra.gmra.mrb[36].mxu1 %vm168_vm1, %v4793_v3 }
0x4e06   :  { %7257 = vmatpush3.bf16.msra.mxu1 %v8208_v36  ;;  %6917 = vmatprep.mubr.msk.f32.mxu1 %vm7757_vm0, %v7758_v1 }
0x4e07   :  { %7258 = vmatprep.subr.bf16.mxu1 %v7756_v0 }
0x4e0a   :  { %7260 = vmatpush3.bf16.msra.mxu1 %v8213_v16 }
0x4e0b   :  { %7267 = vmatprep.subr.bf16.mxu1 %v7756_v0 }
0x4ecc   :  { %v4787_v4 = vpop.f32.mrb[36].mxu0 }
0x4ecd   :  { %v6886_v8 = vpop.f32.mrb[37].mxu0 }
0x4ed8   :  { %v4862_v60 = vpop.f32.mrb[36].mxu1 }
0x4ed9   :  { %v4863_v7 = vadd.f32 %v4862_v60, %v4787_v4  ;;  %v6897_v2 = vpop.f32.mrb[37].mxu1 }
0x4edb   :  { %v4866_v9 = vadd.f32 %v8731_v20, %v4863_v7 }
0x4edd   :  { %7487 = vtanh.f32 %v4866_v9 }
0x4ee7   :  { %v7488_v12 = vpop.eup %7487 }
0x4ee8   :  { %6907 = vmatmul.mubr.msk.f32.vlgmr.msra.gmra.mrb[38].mxu0 %vm168_vm1, %v7488_v12 }
0x4ee9   :  { %7263 = vmatpush3.bf16.msra.mxu0 %v8210_v41  ;;  %6928 = vmatprep.mubr.msk.f32.mxu0 %vm7757_vm0, %v7758_v1 }
0x4eea   :  { %7264 = vmatprep.subr.bf16.mxu0 %v7756_v0 }
0x4eed   :  { %7266 = vmatpush3.bf16.msra.mxu0 %v8217_v17 }
0x4eee   :  { %7273 = vmatprep.subr.bf16.mxu0 %v7756_v0 }
0x4ef0   :  { %6929 = vmatmul.mubr.msk.f32.vlgmr.msra.gmra.mrb[40].mxu0 %vm168_vm1, %v4718_v49 }
0x4ef1   :  { %7275 = vmatpush3.bf16.msra.mxu0 %v8409_v50  ;;  %6950 = vmatprep.mubr.msk.f32.mxu0 %vm7757_vm0, %v7758_v1 }
0x4ef2   :  { %7276 = vmatprep.subr.bf16.mxu0 %v7756_v0 }
0x4ef5   :  { %7278 = vmatpush3.bf16.msra.mxu0 %v8419_v54 }
0x4ef6   :  { %7285 = vmatprep.subr.bf16.mxu0 %v7756_v0 }
0x4fbb   :  { %v4937_v20 = vpop.f32.mrb[38].mxu0 }
0x4fbc   :  { %v4938_v10 = vadd.f32 %v8751_v28, %v4937_v20  ;;  %v6908_v14 = vpop.f32.mrb[39].mxu0 }
0x4fbe   :  { %v4941_v18 = vsel %vm2087_vm15, %v4938_v10, -inf }
0x4fbf   :  { %4942 = vmax.xlane.f32.xlu0 %v4941_v18 }
0x4fc3   :  { %v5120_v13 = vpop.f32.mrb[40].mxu0 }
0x4fc4   :  { %v6930_v15 = vpop.f32.mrb[41].mxu0  ;;  %v5121_v19 = vadd.f32 %v8932_v22, %v5120_v13 }
0x4fd5   :  { %5132 = vrot.lane.b32.xlu0 %v5121_v19, %s7760_s25 }
0x504c   :  { %v4943_v26 = vpop.xlane.xlu0 %4942 }
0x504d   :  { %v4944_v23 = vsub.f32 %v4938_v10, %v4943_v26 }
0x504f   :  { %v4945_v25 = vmul.f32 1.442695, %v4944_v23 }
0x5050   :  { %v5133_v20 = vpop.permute.xlu0 %5132 }
0x5051   :  { %7489 = vpow2.f32 %v4945_v25 }
0x505b   :  { %v7490_v28 = vpop.eup %7489 }
0x505c   :  { %v4947_v58 = vsel %vm2087_vm15, %v7490_v28, 0.0 }
0x505d   :  { %4948 = vadd.xlane.f32.xlu1 %v4947_v58 }
0x50ea   :  { %v4949_v29 = vpop.xlane.xlu1 %4948 }
0x50eb   :  { %7491 = vlog2.f32 %v4949_v29 }
0x50f5   :  { %v7492_v34 = vpop.eup %7491 }
0x50f6   :  { %v4951_v31 = vmul.f32 0.6931472, %v7492_v34 }
0x50f8   :  { %v4952_v27 = vadd.f32 %v4951_v31, %v4943_v26 }
0x50fa   :  { %v4953_v35 = vsub.f32 %v4938_v10, %v4952_v27 }
0x50fc   :  { %v4956_v42 = vsel %vm2087_vm15, %v4953_v35, -inf  ;;  %4955 = vst [vmem:[#allocation14 + $0xa] sm:$0x3] %v4953_v35 }
0x50fd   :  { %4957 = vmax.xlane.f32.xlu1 %v4956_v42 }
0x518a   :  { %v4958_v38 = vpop.xlane.xlu1 %4957 }
0x518b   :  { %vm4959_vm10 = vcmp.ge.f32.partialorder %v4953_v35, %v4958_v38 }
0x518c   :  { %v4960_v32 = vsel %vm4959_vm10, %v8225_v44, 128 }
0x518d   :  { %v4961_v5 = vsel %vm2087_vm15, %v4960_v32, 2147483647 }
0x518e   :  { %v4963_v59 = vshra.s32 %v4961_v5, 16  ;;  %v4962_v40 = vand.u32 65535, %v4961_v5 }
0x5190   :  { %v4965_v24 = vcvt.s32.f32 %v4963_v59  ;;  %v4964_v49 = vcvt.s32.f32 %v4962_v40 }
0x5192   :  { %4966 = vmin.xlane.f32.xlu1 %v4965_v24 }
0x521f   :  { %v4967_v47 = vpop.xlane.xlu1 %4966 }
0x5220   :  { %vm4968_vm11 = vcmp.eq.f32.partialorder %v4965_v24, %v4967_v47  ;;  %v4973_v11 = vcvt.f32.s32 %v4967_v47 }
0x5221   :  { %v4969_v6 = vsel %vm4968_vm11, %v4964_v49, inf }
0x5222   :  { %4970 = vmin.xlane.f32.xlu1 %v4969_v6  ;;  %v4974_v56 = vshll.u32 %v4973_v11, 16 }
0x52af   :  { %v4971_v33 = vpop.xlane.xlu1 %4970 }
0x52b0   :  { %v4972_v43 = vcvt.f32.s32 %v4971_v33 }
0x52b2   :  { %v4975_v52 = vadd.s32 %v4974_v56, %v4972_v43 }
0x52b4   :  { %v8942_v55 = vsel %vm4976_vm12, %v4975_v52, %v8850_v21  ;;  %vm4978_vm2 = vcmp.eq.s32.totalorder %v4975_v52, %v8225_v44  ;;  %v8956_v21 = vld [vmem:[%s9139_s8] ss:$0 sm:$0xff] }
0x52b5   :  { %v6220_v62 = vsel %vm4978_vm2, 1.0, %v7758_v1 }
0x52b6   :  { %6918 = vmatmul.mubr.msk.f32.vlgmr.msra.gmra.mrb[38].mxu1 %vm168_vm1, %v6220_v62 }
0x52b7   :  { %7269 = vmatpush3.bf16.msra.mxu1 %v8393_v39  ;;  %6939 = vmatprep.mubr.msk.f32.mxu1 %vm7757_vm0, %v7758_v1 }
0x52b8   :  { %7270 = vmatprep.subr.bf16.mxu1 %v7756_v0 }
0x52bb   :  { %7272 = vmatpush3.bf16.msra.mxu1 %v8397_v45 }
0x52bc   :  { %7279 = vmatprep.subr.bf16.mxu1 %v7756_v0 }
0x5389   :  { %v5050_v3 = vpop.f32.mrb[38].mxu1 }
0x538a   :  { %v5051_v4 = vadd.f32 %v8956_v21, %v5050_v3  ;;  %v6919_v8 = vpop.f32.mrb[39].mxu1 }
0x538c   :  { %v5124_v60 = vadd.f32 %v5121_v19, %v5051_v4 }
0x538e   :  { %v6223_v7 = vmul.f32 -1.442695, %v5124_v60 }
0x5390   :  { %7493 = vpow2.f32 %v6223_v7 }
0x539a   :  { %v7494_v2 = vpop.eup %7493 }
0x539b   :  { %v5128_v9 = vadd.f32 1.0, %v7494_v2 }
0x539d   :  { %7495 = vrcp.f32 %v5128_v9 }
0x53a7   :  { %v7496_v12 = vpop.eup %7495 }
0x53a8   :  { %v5135_v10 = vmul.f32 %v7496_v12, %v5133_v20  ;;  %v5142_v15 = vsub.f32 1.0, %v7496_v12  ;;  %v5148_v19 = vmul.f32 %v7496_v12, %v8865_v37 }
0x53aa   :  { %5137 = vrot.lane.b32.xlu1 %v5135_v10, %s7760_s25 }
0x541c   :  { %v5138_v14 = vpop.permute.xlu1 %5137 }
0x541d   :  { %v5140_v18 = vadd.f32 %v5138_v14, %v5051_v4 }
0x541f   :  { %7497 = vtanh.f32 %v5140_v18 }
0x5429   :  { %v7498_v13 = vpop.eup %7497 }
0x542a   :  { %5144 = vrot.lane.b32.xlu1 %v7498_v13, %s7761_s4 }
0x549c   :  { %v5145_v26 = vpop.permute.xlu1 %5144 }
0x549d   :  { %v5147_v23 = vmul.f32 %v5145_v26, %v5142_v15 }
0x549f   :  { %v8962_v25 = vadd.f32 %v5148_v19, %v5147_v23 }
0x54a1   :  { %v5157_v28 = vrot.slane %v8962_v25, %v8036_v48 }
0x54a3   :  { %v5158_v58 = vcombine.high %v5157_v28, %v5157_v28  ;;  %v5165_v29 = vrot.slane %v5157_v28, %v8036_v48 }
0x54a5   :  { %v5176_v34 = vrot.slane %v5165_v29, %v8045_v53  ;;  %v5172_v31 = vrot.slane %v5158_v58, %v8036_v48 }
0x54a7   :  { %5181 = vrot.lane.b32.xlu0 %v5176_v34, %s7761_s4  ;;  %v5180_v27 = vrot.slane %v5172_v31, %v8045_v53 }
0x54a9   :  { %5183 = vrot.lane.b32.xlu1 %v5180_v27, %s7761_s4 }
0x5519   :  { %v5182_v37 = vpop.permute.xlu0 %5181 }
0x551a   :  { %v5187_v35 = vmul.f32 %v5182_v37, %v8368_v63 }
0x551b   :  { %v5184_v42 = vpop.permute.xlu1 %5183 }
0x551c   :  { %v5188_v38 = vmul.f32 %v5184_v42, %v8356_v46  ;;  %v5189_v32 = vsel %vm168_vm1, %v5187_v35, 0.0 }
0x551d   :  { %5190 = vadd.xlane.f32.xlu0 %v5189_v32 }
0x551e   :  { %v5192_v5 = vsel %vm168_vm1, %v5188_v38, 0.0 }
0x551f   :  { %5193 = vadd.xlane.f32.xlu1 %v5192_v5 }
0x55aa   :  { %v5191_v59 = vpop.xlane.xlu0 %5190 }
0x55ab   :  { %v5200_v40 = vrot.slane %v5191_v59, %v8376_v51 }
0x55ac   :  { %v5194_v24 = vpop.xlane.xlu1 %5193 }
0x55ad   :  { %v5204_v47 = vrot.slane %v5194_v24, %v8376_v51 }
0x55af   :  { %v5205_v49 = vsel %vm1766_vm13, %v5204_v47, %v5200_v40 }
0x55b0   :  { %v5207_v6 = vsel %vm1769_vm14, %v5205_v49, -inf }
0x55b1   :  { %5208 = vmax.xlane.f32.xlu0 %v5207_v6 }
0x563e   :  { %v5209_v11 = vpop.xlane.xlu0 %5208 }
0x563f   :  { %v5214_v33 = vrot.slane %v5209_v11, %v8045_v53  ;;  %v5218_v56 = vrot.slane %v5209_v11, %v8383_v61 }
0x5641   :  { %v5221_v43 = vsub.f32 %v5191_v59, %v5214_v33  ;;  %v5222_v52 = vsub.f32 %v5194_v24, %v5218_v56 }
0x5643   :  { %v5223_v62 = vmul.f32 1.442695, %v5221_v43  ;;  %v5225_v3 = vmul.f32 1.442695, %v5222_v52 }
0x5645   :  { %7499 = vpow2.f32 %v5223_v62  ;;  %v9012_v62 = vld [vmem:[%s9143_s12] ss:$0 sm:$0xff] }
0x5646   :  { %7501 = vpow2.f32 %v5225_v3 }
0x564f   :  { %v7500_v4 = vpop.eup %7499 }
0x5650   :  { %v7502_v8 = vpop.eup %7501  ;;  %5230 = vperm.xlu0 %7336, %v7500_v4  }
0x5651   :  { %5233 = vperm.xlu1 %7335, %v7502_v8  }
0x56cf   :  { %v5231_v60 = vpop.permute.xlu0 %5230 }
0x56d0   :  { %v5234_v7 = vpop.permute.xlu1 %5233  ;;  %v5238_v2 = vrot.slane %v5231_v60, %v8376_v51 }
0x56d1   :  { %v5242_v9 = vrot.slane %v5234_v7, %v8376_v51 }
0x56d3   :  { %v5243_v12 = vsel %vm1766_vm13, %v5242_v9, %v5238_v2 }
0x56d4   :  { %v5245_v20 = vsel %vm1769_vm14, %v5243_v12, 0.0 }
0x56d5   :  { %5246 = vadd.xlane.f32.xlu1 %v5245_v20 }
0x5762   :  { %v5247_v10 = vpop.xlane.xlu1 %5246 }
0x5763   :  { %7503 = vrcp.f32 %v5247_v10 }
0x576d   :  { %v7504_v14 = vpop.eup %7503 }
0x576e   :  { %v5253_v18 = vrot.slane %v7504_v14, %v8045_v53  ;;  %v5257_v15 = vrot.slane %v7504_v14, %v8383_v61 }
0x5770   :  { %v5260_v13 = vmul.f32 %v7500_v4, %v5253_v18  ;;  %v5261_v26 = vmul.f32 %v7502_v8, %v5257_v15 }
0x5772   :  { %5264 = vperm.xlu0 %7336, %v5260_v13  }
0x5776   :  { %5269 = vperm.xlu0 %7336, %v5261_v26  }
0x577a   :  { %5288 = vrot.lane.b32.xlu0 %v8962_v25, %s7761_s4 }
0x57f1   :  { %v5265_v19 = vpop.permute.xlu0 %5264 }
0x57f2   :  { %v5272_v23 = vmul.f32 %v5265_v19, %v8368_v63 }
0x57f4   :  { %v5274_v28 = vsel %vm168_vm1, %v5272_v23, 0.0 }
0x57f5   :  { %v5275_v58 = vrot.slane %v5274_v28, 4  ;;  %v5270_v29 = vpop.permute.xlu0 %5269 }
0x57f6   :  { %v5273_v34 = vmul.f32 %v5270_v29, %v8356_v46 }
0x57f7   :  { %v5276_v31 = vadd.f32 %v5275_v58, %v5274_v28 }
0x57f8   :  { %v5281_v27 = vsel %vm168_vm1, %v5273_v34, 0.0 }
0x57f9   :  { %v5277_v37 = vrot.slane %v5276_v31, 2  ;;  %v5282_v35 = vrot.slane %v5281_v27, 4  ;;  %v5289_v42 = vpop.permute.xlu0 %5288 }
0x57fa   :  { %6940 = vmatmul.mubr.msk.f32.vlgmr.msra.gmra.mrb[40].mxu1 %vm168_vm1, %v5289_v42 }
0x57fb   :  { %v5278_v38 = vadd.f32 %v5277_v37, %v5276_v31  ;;  %v5283_v32 = vadd.f32 %v5282_v35, %v5281_v27  ;;  %7281 = vmatpush3.bf16.msra.mxu1 %v8438_v57  ;;  %6961 = vmatprep.mubr.msk.f32.mxu1 %vm7757_vm0, %v7758_v1 }
0x57fc   :  { %7282 = vmatprep.subr.bf16.mxu1 %v7756_v0 }
0x57fd   :  { %v5284_v5 = vrot.slane %v5283_v32, 2  ;;  %v5279_v59 = vrot.slane %v5278_v38, 1 }
0x57ff   :  { %v5285_v24 = vadd.f32 %v5284_v5, %v5283_v32  ;;  %7284 = vmatpush3.bf16.msra.mxu1 %v8441_v30  ;;  %v5280_v47 = vadd.f32 %v5279_v59, %v5278_v38 }
0x5800   :  { %7291 = vmatprep.subr.bf16.mxu1 %v7756_v0 }
0x5801   :  { %v5286_v40 = vrot.slane %v5285_v24, 1 }
0x5803   :  { %v5287_v49 = vadd.f32 %v5286_v40, %v5285_v24 }
0x5805   :  { %v5364_v6 = vsel %vm1766_vm13, %v5287_v49, %v5280_v47 }
0x5806   :  { %6951 = vmatmul.mubr.msk.f32.vlgmr.msra.gmra.mrb[42].mxu0 %vm168_vm1, %v5364_v6 }
0x5807   :  { %7287 = vmatpush3.bf16.msra.mxu0 %v8208_v36  ;;  %6972 = vmatprep.mubr.msk.f32.mxu0 %vm7757_vm0, %v7758_v1 }
0x5808   :  { %7288 = vmatprep.subr.bf16.mxu0 %v7756_v0 }
0x580b   :  { %7290 = vmatpush3.bf16.msra.mxu0 %v8213_v16  ;;  %v9031_v16 = vld [vmem:[%s9145_s14] ss:$0 sm:$0xff]  ;;  %s7764_s14 = smov [#allocation14]  }
0x580c   :  { %7297 = vmatprep.subr.bf16.mxu0 %v7756_v0 }
0x58cd   :  { %v5358_v11 = vpop.f32.mrb[40].mxu1 }
0x58ce   :  { %v6941_v33 = vpop.f32.mrb[41].mxu1 }
0x58d9   :  { %v5433_v56 = vpop.f32.mrb[42].mxu0 }
0x58da   :  { %v5434_v43 = vadd.f32 %v5433_v56, %v5358_v11  ;;  %v6952_v52 = vpop.f32.mrb[43].mxu0 }
0x58dc   :  { %v5437_v36 = vadd.f32 %v9012_v62, %v5434_v43 }
0x58de   :  { %7505 = vtanh.f32 %v5437_v36 }
0x58e8   :  { %v7506_v3 = vpop.eup %7505 }
0x58e9   :  { %6962 = vmatmul.mubr.msk.f32.vlgmr.msra.gmra.mrb[42].mxu1 %vm168_vm1, %v7506_v3 }
0x58ea   :  { %7293 = vmatpush3.bf16.msra.mxu1 %v8210_v41  ;;  %6983 = vmatprep.mubr.msk.f32.mxu1 %vm7757_vm0, %v7758_v1 }
0x58eb   :  { %7294 = vmatprep.subr.bf16.mxu1 %v7756_v0 }
0x58ee   :  { %7296 = vmatpush3.bf16.msra.mxu1 %v8217_v17 }
0x58ef   :  { %7303 = vmatprep.subr.bf16.mxu1 %v7756_v0 }
0x58f1   :  { %6984 = vmatmul.mubr.msk.f32.vlgmr.msra.gmra.mrb[44].mxu1 %vm168_vm1, %v5289_v42 }
0x58f2   :  { %7305 = vmatpush3.bf16.msra.mxu1 %v8409_v50  ;;  %7005 = vmatprep.mubr.msk.f32.mxu1 %vm7757_vm0, %v7758_v1 }
0x58f3   :  { %7306 = vmatprep.subr.bf16.mxu1 %v7756_v0 }
0x58f6   :  { %7308 = vmatpush3.bf16.msra.mxu1 %v8419_v54 }
0x59bc   :  { %v5508_v41 = vpop.f32.mrb[42].mxu1 }
0x59bd   :  { %v5509_v17 = vadd.f32 %v9031_v16, %v5508_v41  ;;  %v6963_v4 = vpop.f32.mrb[43].mxu1 }
0x59bf   :  { %v5512_v8 = vsel %vm2087_vm15, %v5509_v17, -inf }
0x59c0   :  { %5513 = vmax.xlane.f32.xlu0 %v5512_v8 }
0x59c4   :  { %v5691_v50 = vpop.f32.mrb[44].mxu1 }
0x59c5   :  { %v6985_v60 = vpop.f32.mrb[45].mxu1  ;;  %v5692_v29 = vadd.f32 %v8932_v22, %v5691_v50 }
0x5a4d   :  { %v5514_v7 = vpop.xlane.xlu0 %5513 }
0x5a4e   :  { %v5515_v2 = vsub.f32 %v5509_v17, %v5514_v7 }
0x5a50   :  { %v5516_v9 = vmul.f32 1.442695, %v5515_v2 }
0x5a52   :  { %7507 = vpow2.f32 %v5516_v9 }
0x5a5c   :  { %v7508_v12 = vpop.eup %7507 }
0x5a5d   :  { %v5518_v54 = vsel %vm2087_vm15, %v7508_v12, 0.0 }
0x5a5e   :  { %5519 = vadd.xlane.f32.xlu1 %v5518_v54 }
0x5aeb   :  { %v5520_v20 = vpop.xlane.xlu1 %5519 }
0x5aec   :  { %7509 = vlog2.f32 %v5520_v20 }
0x5af6   :  { %v7510_v10 = vpop.eup %7509 }
0x5af7   :  { %v5522_v14 = vmul.f32 0.6931472, %v7510_v10 }
0x5af9   :  { %v5523_v18 = vadd.f32 %v5522_v14, %v5514_v7 }
0x5afb   :  { %v5524_v13 = vsub.f32 %v5509_v17, %v5523_v18 }
0x5afd   :  { %v5527_v15 = vsel %vm2087_vm15, %v5524_v13, -inf  ;;  %5526 = vst [vmem:[#allocation14 + $0xc] sm:$0x3] %v5524_v13 }
0x5afe   :  { %5528 = vmax.xlane.f32.xlu1 %v5527_v15 }
0x5b8b   :  { %v5529_v26 = vpop.xlane.xlu1 %5528 }
0x5b8c   :  { %vm5530_vm3 = vcmp.ge.f32.partialorder %v5524_v13, %v5529_v26 }
0x5b8d   :  { %v5531_v19 = vsel %vm5530_vm3, %v8225_v44, 128 }
0x5b8e   :  { %v5532_v23 = vsel %vm2087_vm15, %v5531_v19, 2147483647 }
0x5b8f   :  { %v5534_v28 = vshra.s32 %v5532_v23, 16  ;;  %v5533_v34 = vand.u32 65535, %v5532_v23 }
0x5b91   :  { %v5536_v58 = vcvt.s32.f32 %v5534_v28  ;;  %v5535_v27 = vcvt.s32.f32 %v5533_v34 }
0x5b93   :  { %5537 = vmin.xlane.f32.xlu1 %v5536_v58 }
0x5ba4   :  { %5703 = vrot.lane.b32.xlu1 %v5692_v29, %s7760_s25 }
0x5c20   :  { %v5538_v31 = vpop.xlane.xlu1 %5537 }
0x5c21   :  { %vm5539_vm7 = vcmp.eq.f32.partialorder %v5536_v58, %v5538_v31  ;;  %v5544_v35 = vcvt.f32.s32 %v5538_v31 }
0x5c22   :  { %v5540_v37 = vsel %vm5539_vm7, %v5535_v27, inf }
0x5c23   :  { %5541 = vmin.xlane.f32.xlu0 %v5540_v37  ;;  %v5545_v38 = vshll.u32 %v5544_v35, 16 }
0x5c24   :  { %v5704_v33 = vpop.permute.xlu1 %5703 }
0x5cb0   :  { %v5542_v42 = vpop.xlane.xlu0 %5541 }
0x5cb1   :  { %v5543_v32 = vcvt.f32.s32 %v5542_v42 }
0x5cb3   :  { %v5546_v5 = vadd.s32 %v5545_v38, %v5543_v32 }
0x5cb5   :  { %vm5549_vm6 = vcmp.eq.s32.totalorder %v5546_v5, %v8225_v44  ;;  %v9044_v59 = vsel %vm5547_vm4, %v5546_v5, %v8942_v55 }
0x5cb6   :  { %v6227_v22 = vsel %vm5549_vm6, 1.0, %v7758_v1 }
0x5cb7   :  { %6973 = vmatmul.mubr.msk.f32.vlgmr.msra.gmra.mrb[44].mxu0 %vm168_vm1, %v6227_v22 }
0x5cb8   :  { %7299 = vmatpush3.bf16.msra.mxu0 %v8393_v39  ;;  %6994 = vmatprep.mubr.msk.f32.mxu0 %vm7757_vm0, %v7758_v1 }
0x5cb9   :  { %7300 = vmatprep.subr.bf16.mxu0 %v7756_v0 }
0x5cbc   :  { %7302 = vmatpush3.bf16.msra.mxu0 %v8397_v45 }
0x5cbd   :  { %7309 = vmatprep.subr.bf16.mxu0 %v7756_v0 }
0x5d8a   :  { %v5621_v24 = vpop.f32.mrb[44].mxu0 }
0x5d8b   :  { %v5622_v40 = vadd.f32 %v8956_v21, %v5621_v24  ;;  %v6974_v55 = vpop.f32.mrb[45].mxu0 }
0x5d8d   :  { %v5695_v47 = vadd.f32 %v5692_v29, %v5622_v40 }
0x5d8f   :  { %v6230_v49 = vmul.f32 -1.442695, %v5695_v47 }
0x5d91   :  { %7511 = vpow2.f32 %v6230_v49 }
0x5d9b   :  { %v7512_v6 = vpop.eup %7511 }
0x5d9c   :  { %v5699_v11 = vadd.f32 1.0, %v7512_v6 }
0x5d9e   :  { %7513 = vrcp.f32 %v5699_v11 }
0x5da8   :  { %v7514_v39 = vpop.eup %7513 }
0x5da9   :  { %v5706_v56 = vmul.f32 %v7514_v39, %v5704_v33  ;;  %v5713_v36 = vsub.f32 1.0, %v7514_v39  ;;  %v5719_v3 = vmul.f32 %v7514_v39, %v8962_v25 }
0x5dab   :  { %5708 = vrot.lane.b32.xlu0 %v5706_v56, %s7760_s25  ;;  %s6126_s25 = sshll.u32 %s7764_s14, 4  ;;  %s6127_s25 = int_to_ptr.vmem [resolvable:$true] %s6126_s25 }
0x5dac   :  { %p7696_p1 = scmp.lt.s32.totalorder %s6127_s25, %s6127_s25 }
0x5e1d   :  { %v5709_v43 = vpop.permute.xlu0 %5708 }
0x5e1e   :  { %v5711_v52 = vadd.f32 %v5709_v43, %v5622_v40 }
0x5e20   :  { %7515 = vtanh.f32 %v5711_v52 }
0x5e2a   :  { %v7516_v45 = vpop.eup %7515 }
0x5e2b   :  { %5715 = vrot.lane.b32.xlu1 %v7516_v45, %s7761_s4 }
0x5e9d   :  { %v5716_v21 = vpop.permute.xlu1 %5715 }
0x5e9e   :  { %v5718_v41 = vmul.f32 %v5716_v21, %v5713_v36 }
0x5ea0   :  { %v5720_v17 = vadd.f32 %v5719_v3, %v5718_v41 }
0x5ea2   :  { %v5728_v4 = vrot.slane %v5720_v17, %v8036_v48 }
0x5ea4   :  { %v5729_v8 = vcombine.high %v5728_v4, %v5728_v4  ;;  %v5736_v50 = vrot.slane %v5728_v4, %v8036_v48 }
0x5ea6   :  { %v5743_v60 = vrot.slane %v5729_v8, %v8036_v48  ;;  %v5747_v7 = vrot.slane %v5736_v50, %v8045_v53 }
0x5ea8   :  { %5752 = vrot.lane.b32.xlu1 %v5747_v7, %s7761_s4  ;;  %v5751_v2 = vrot.slane %v5743_v60, %v8045_v53 }
0x5eaa   :  { %5754 = vrot.lane.b32.xlu0 %v5751_v2, %s7761_s4 }
0x5f1a   :  { %v5753_v9 = vpop.permute.xlu1 %5752 }
0x5f1b   :  { %v5758_v25 = vmul.f32 %v5753_v9, %v8368_v63 }
0x5f1c   :  { %v5755_v12 = vpop.permute.xlu0 %5754 }
0x5f1d   :  { %v5759_v54 = vmul.f32 %v5755_v12, %v8356_v46  ;;  %v5760_v20 = vsel %vm168_vm1, %v5758_v25, 0.0 }
0x5f1e   :  { %5761 = vadd.xlane.f32.xlu1 %v5760_v20 }
0x5f1f   :  { %v5763_v10 = vsel %vm168_vm1, %v5759_v54, 0.0 }
0x5f20   :  { %5764 = vadd.xlane.f32.xlu0 %v5763_v10 }
0x5fab   :  { %v5762_v48 = vpop.xlane.xlu1 %5761 }
0x5fac   :  { %v5771_v18 = vrot.slane %v5762_v48, %v8376_v51 }
0x5fad   :  { %v5765_v14 = vpop.xlane.xlu0 %5764 }
0x5fae   :  { %v5775_v13 = vrot.slane %v5765_v14, %v8376_v51 }
0x5fb0   :  { %v5776_v15 = vsel %vm1766_vm13, %v5775_v13, %v5771_v18 }
0x5fb1   :  { %v5778_v26 = vsel %vm1769_vm14, %v5776_v15, -inf }
0x5fb2   :  { %5779 = vmax.xlane.f32.xlu0 %v5778_v26 }
0x603f   :  { %v5780_v19 = vpop.xlane.xlu0 %5779 }
0x6040   :  { %v5785_v23 = vrot.slane %v5780_v19, %v8045_v53  ;;  %v5789_v28 = vrot.slane %v5780_v19, %v8383_v61 }
0x6042   :  { %v5792_v58 = vsub.f32 %v5762_v48, %v5785_v23  ;;  %v5793_v29 = vsub.f32 %v5765_v14, %v5789_v28 }
0x6044   :  { %v5794_v34 = vmul.f32 1.442695, %v5792_v58  ;;  %v5796_v31 = vmul.f32 1.442695, %v5793_v29 }
0x6046   :  { %7517 = vpow2.f32 %v5794_v34 }
0x6047   :  { %7519 = vpow2.f32 %v5796_v31 }
0x6050   :  { %v7518_v27 = vpop.eup %7517 }
0x6051   :  { %v7520_v37 = vpop.eup %7519  ;;  %5801 = vperm.xlu1 %7335, %v7518_v27  }
0x6052   :  { %5804 = vperm.xlu0 %7336, %v7520_v37  }
0x60d0   :  { %v5802_v35 = vpop.permute.xlu1 %5801 }
0x60d1   :  { %v5805_v42 = vpop.permute.xlu0 %5804  ;;  %v5809_v38 = vrot.slane %v5802_v35, %v8376_v51 }
0x60d2   :  { %v5813_v32 = vrot.slane %v5805_v42, %v8376_v51 }
0x60d4   :  { %v5814_v5 = vsel %vm1766_vm13, %v5813_v32, %v5809_v38 }
0x60d5   :  { %v5816_v22 = vsel %vm1769_vm14, %v5814_v5, 0.0 }
0x60d6   :  { %5817 = vadd.xlane.f32.xlu1 %v5816_v22 }
0x6163   :  { %v5818_v24 = vpop.xlane.xlu1 %5817 }
0x6164   :  { %7521 = vrcp.f32 %v5818_v24 }
0x616e   :  { %v7522_v40 = vpop.eup %7521 }
0x616f   :  { %v5824_v55 = vrot.slane %v7522_v40, %v8045_v53  ;;  %v5828_v49 = vrot.slane %v7522_v40, %v8383_v61 }
0x6171   :  { %v5831_v47 = vmul.f32 %v7518_v27, %v5824_v55  ;;  %v5832_v6 = vmul.f32 %v7520_v37, %v5828_v49 }
0x6173   :  { %5835 = vperm.xlu0 %7336, %v5831_v47  }
0x6177   :  { %5840 = vperm.xlu0 %7336, %v5832_v6  }
0x617b   :  { %5859 = vrot.lane.b32.xlu0 %v5720_v17, %s7761_s4  ;;  %s7691_s4 = scalar_lea.vmem %s6127_s25, 256 }
0x617c   :  { %p7692_p0 = scmp.ne.s32.totalorder %s6127_s25, %s7691_s4  ;;  %p7697_p2 = scmp.lt.s32.totalorder %s7691_s4, %s7691_s4 }
0x617e   :  { %p7698_p3 = por %p7697_p2, %p7696_p1 }
0x6180   :  { %p7699_p4 = pnand %p7698_p3, %p7692_p0 }
0x61f2   :  { %v5836_v11 = vpop.permute.xlu0 %5835 }
0x61f3   :  { %v5843_v51 = vmul.f32 %v5836_v11, %v8368_v63 }
0x61f5   :  { %v5845_v39 = vsel %vm168_vm1, %v5843_v51, 0.0 }
0x61f6   :  { %v5846_v33 = vrot.slane %v5845_v39, 4  ;;  %v5841_v56 = vpop.permute.xlu0 %5840 }
0x61f7   :  { %v5844_v43 = vmul.f32 %v5841_v56, %v8356_v46 }
0x61f8   :  { %v5847_v52 = vadd.f32 %v5846_v33, %v5845_v39 }
0x61f9   :  { %v5852_v53 = vsel %vm168_vm1, %v5844_v43, 0.0 }
0x61fa   :  { %v5848_v45 = vrot.slane %v5847_v52, 2  ;;  %v5853_v36 = vrot.slane %v5852_v53, 4  ;;  %v5860_v61 = vpop.permute.xlu0 %5859 }
0x61fb   :  { %6995 = vmatmul.mubr.msk.f32.vlgmr.msra.gmra.mrb[46].mxu0 %vm168_vm1, %v5860_v61 }
0x61fc   :  { %v5849_v21 = vadd.f32 %v5848_v45, %v5847_v52  ;;  %v5854_v3 = vadd.f32 %v5853_v36, %v5852_v53  ;;  %7311 = vmatpush3.bf16.msra.mxu0 %v8438_v57  ;;  %7016 = vmatprep.mubr.msk.f32.mxu0 %vm7757_vm0, %v7758_v1 }
0x61fd   :  { %7312 = vmatprep.subr.bf16.mxu0 %v7756_v0 }
0x61fe   :  { %v5855_v63 = vrot.slane %v5854_v3, 2  ;;  %v5850_v41 = vrot.slane %v5849_v21, 1 }
0x6200   :  { %v5856_v46 = vadd.f32 %v5855_v63, %v5854_v3  ;;  %7314 = vmatpush3.bf16.msra.mxu0 %v8441_v30  ;;  %v5851_v4 = vadd.f32 %v5850_v41, %v5849_v21 }
0x6202   :  { %v5857_v17 = vrot.slane %v5856_v46, 1 }
0x6204   :  { %v5858_v8 = vadd.f32 %v5857_v17, %v5856_v46 }
0x6206   :  { %v5935_v50 = vsel %vm1766_vm13, %v5858_v8, %v5851_v4 }
0x6207   :  { %7006 = vmatmul.mubr.msk.f32.vlgmr.msra.gmra.mrb[46].mxu1 %vm168_vm1, %v5935_v50 }
0x62ce   :  { %v5929_v60 = vpop.f32.mrb[46].mxu0 }
0x62cf   :  { %v6996_v7 = vpop.f32.mrb[47].mxu0 }
0x62da   :  { %v6004_v57 = vpop.f32.mrb[46].mxu1 }
0x62db   :  { %v6005_v2 = vadd.f32 %v6004_v57, %v5929_v60  ;;  %v7007_v9 = vpop.f32.mrb[47].mxu1 }
0x62dd   :  { %v6008_v1 = vadd.f32 %v9012_v62, %v6005_v2 }
0x62df   :  { %7523 = vtanh.f32 %v6008_v1 }
0x62e9   :  { %v7524_v0 = vpop.eup %7523 }
0x62ea   :  { %7017 = vmatmul.mubr.msk.f32.vlgmr.msra.gmra.mrb[48].mxu0 %vm168_vm1, %v7524_v0 }
0x63bd   :  { %v6079_v25 = vpop.f32.mrb[48].mxu0 }
0x63be   :  { %v6080_v30 = vadd.f32 %v9031_v16, %v6079_v25  ;;  %v7018_v12 = vpop.f32.mrb[49].mxu0 }
0x63c0   :  { %v6083_v54 = vsel %vm2087_vm15, %v6080_v30, -inf }
0x63c1   :  { %6084 = vmax.xlane.f32.xlu0 %v6083_v54 }
0x644e   :  { %v6085_v20 = vpop.xlane.xlu0 %6084 }
0x644f   :  { %v6086_v10 = vsub.f32 %v6080_v30, %v6085_v20 }
0x6451   :  { %v6087_v48 = vmul.f32 1.442695, %v6086_v10 }
0x6453   :  { %7525 = vpow2.f32 %v6087_v48 }
0x645d   :  { %v7526_v14 = vpop.eup %7525 }
0x645e   :  { %v6089_v18 = vsel %vm2087_vm15, %v7526_v14, 0.0 }
0x645f   :  { %6090 = vadd.xlane.f32.xlu1 %v6089_v18 }
0x64ec   :  { %v6091_v62 = vpop.xlane.xlu1 %6090 }
0x64ed   :  { %7527 = vlog2.f32 %v6091_v62 }
0x64f7   :  { %v7528_v13 = vpop.eup %7527 }
0x64f8   :  { %v6093_v15 = vmul.f32 0.6931472, %v7528_v13 }
0x64fa   :  { %v6094_v26 = vadd.f32 %v6093_v15, %v6085_v20 }
0x64fc   :  { %v6095_v19 = vsub.f32 %v6080_v30, %v6094_v26 }
0x64fe   :  { %v6098_v16 = vsel %vm2087_vm15, %v6095_v19, -inf  ;;  %6097 = vst [vmem:[#allocation14 + $0xe] sm:$0x3] %v6095_v19 }
0x64ff   :  { %6099 = vmax.xlane.f32.xlu1 %v6098_v16 }
0x658c   :  { %v6100_v23 = vpop.xlane.xlu1 %6099 }
0x658d   :  { %vm6101_vm0 = vcmp.ge.f32.partialorder %v6095_v19, %v6100_v23 }
0x658e   :  { %v6102_v28 = vsel %vm6101_vm0, %v8225_v44, 128 }
0x658f   :  { %v6103_v58 = vsel %vm2087_vm15, %v6102_v28, 2147483647 }
0x6590   :  { %v6105_v29 = vshra.s32 %v6103_v58, 16  ;;  %v6104_v31 = vand.u32 65535, %v6103_v58 }
0x6592   :  { %v6107_v34 = vcvt.s32.f32 %v6105_v29  ;;  %v6106_v37 = vcvt.s32.f32 %v6104_v31 }
0x6594   :  { %6108 = vmin.xlane.f32.xlu1 %v6107_v34 }
0x6621   :  { %v6109_v27 = vpop.xlane.xlu1 %6108 }
0x6622   :  { %vm6110_vm1 = vcmp.eq.f32.partialorder %v6107_v34, %v6109_v27 }
0x6623   :  { %v6111_v35 = vsel %vm6110_vm1, %v6106_v37, inf }
0x6624   :  { %6112 = vmin.xlane.f32.xlu1 %v6111_v35 }
0x6625   :  { %7702 = shalt.err (!%p7699_p4)
}
0x6626   :  { %s7703_s11 = scalar_lea.hbm %s9146_s15, 256 }
0x6627   :  { %p7704_p5 = scmp.ne.s32.totalorder %s9146_s15, %s7703_s11  ;;  %p7707_p6 = scmp.lt.u32.totalorder %s7703_s11, %s9146_s15 }
0x6629   :  { %p7709_p7 = pnand %p7707_p6, %p7704_p5 }
0x662b   :  { %7712 = shalt.err (!%p7709_p7)
}
0x662c   :  { %s7765_s7 = smov 2   ;;  %v6115_v42 = vcvt.f32.s32 %v6109_v27  ;;  %s7766_s18 = smov [#allocation15]   ;;  %vm6118_vm13 = vcmp.eq.s32.totalorder %v8225_v44, 7 }
0x662d   :  { %6132 = dma.vmem_to_hbm [thread:$0]  %s6127_s25, 256, %s9146_s15, [#allocation4], %s7763_s5, %s7763_s5, %s7765_s7  }
0x662e   :  { %v6116_v32 = vshll.u32 %v6115_v42, 16  ;;  %s6139_s19 = sshll.u32 %s7766_s18, 4  ;;  %s6140_s19 = int_to_ptr.vmem [resolvable:$true] %s6139_s19 }
0x662f   :  { %s7713_s22 = scalar_lea.vmem %s6140_s19, 32  ;;  %p7718_p9 = scmp.lt.s32.totalorder %s6140_s19, %s6140_s19 }
0x6630   :  { %p7714_p8 = scmp.ne.s32.totalorder %s6140_s19, %s7713_s22  ;;  %p7719_p10 = scmp.lt.s32.totalorder %s7713_s22, %s7713_s22 }
0x6632   :  { %p7720_p11 = por %p7719_p10, %p7718_p9 }
0x6634   :  { %p7721_p12 = pnand %p7720_p11, %p7714_p8 }
0x66b1   :  { %v6113_v38 = vpop.xlane.xlu1 %6112 }
0x66b2   :  { %v6114_v5 = vcvt.f32.s32 %v6113_v38 }
0x66b4   :  { %v6117_v22 = vadd.s32 %v6116_v32, %v6114_v5 }
0x66b6   :  { %v6119_v24 = vsel %vm6118_vm13, %v6117_v22, %v9044_v59 }
0x66b7   :  { %6120 = vst.msk [vmem:[#allocation15] sm:$0x3] %vm1769_vm14, %v6119_v24 }
0x66b8   :  { %7724 = shalt.err (!%p7721_p12)
}
0x66b9   :  { %s7725_s17 = scalar_lea.hbm %s9147_s16, 32 }
0x66ba   :  { %p7726_p13 = scmp.ne.s32.totalorder %s9147_s16, %s7725_s17  ;;  %p7729_p0 = scmp.lt.u32.totalorder %s7725_s17, %s9147_s16 }
0x66bc   :  { %p7731_p1 = pnand %p7729_p0, %p7726_p13 }
0x66be   :  { %7734 = shalt.err (!%p7731_p1)
}
0x66bf   :  { %6142 = dma.vmem_to_hbm [thread:$0]  %s6140_s19, 32, %s9147_s16, [#allocation16]  }
0x66c0   :  { %7743 = dma.done.wait [#allocation4], 256  }
0x66c1   :  { %7744 = vsyncadd [#allocation4], 4294967040 }
0x66c2   :  { %7745 = dma.done.wait [#allocation16], 32  }
0x66c3   :  { %7746 = vsyncadd [#allocation16], 4294967264 }
0x66c4   :  { %6149 = vsyncpa [#allocation3], 1 }
0x66c5   :  { %6150 = vsyncpa [#allocation6], 1 }
0x66c6   :  { %6151 = vsyncpa [#allocation9], 1 }
0x66c7   :  { %6152 = vsyncpa [#allocation12], 1 }
0x66c8   :  { %6153 = vsyncpa [#allocation4], 1 }
0x66c9   :  { %6154 = vsyncpa [#allocation16], 1 }

</bundles_post_ra>
